<compile_context>
chip_gen: v5e
topology: v5e:2x2
jax: 0.10.0
libtpu: 0.0.40
codegen_flags: <defaults>
</compile_context>

<pallas_src>
import math

import jax
import jax.numpy as jnp
import numpy as np
from jax.experimental import pallas as pl
from jax.experimental.pallas import tpu as pltpu


def mobile_synthesis_block_forward(hidden, style, params, noise1, noise2):
    """MobileSynthesisBlock forward.

    hidden : (B, Cin, H, W), Cin divisible by 4
    style  : (B, S) or (B, >=3, S)
    noise1 : (B, 1, 2H, 2W)   explicit noise for conv1 (NoiseInjection)
    noise2 : (B, 1, 2H, 2W)   explicit noise for conv2
    returns (hidden_out, img) : (B, Cout, 2H, 2W), (B, 12, 2H, 2W)
    """
    f32 = jnp.float32
    B, CIN, H, W = hidden.shape
    assert CIN % 4 == 0
    C1 = CIN // 4
    OH, OW = 2 * H, 2 * W
    HW, OHW = H * W, OH * OW
    PAD = OW + 1                     # halo large enough for a +-(OW+1) flat shift
    PADW = OHW + 2 * PAD
    COUT = params["conv1_w"].shape[0]
    CIMG = params["img_w"].shape[0]

    # ---- styles: one (S, B) matrix per stage (handles w_size>=3 styles) -----
    if style.ndim == 2:
        s_stack = jnp.stack([style, style, style], axis=0)
    else:
        s_stack = jnp.stack([style[:, 0], style[:, 1], style[:, 2]], axis=0)
    styles_t = jnp.transpose(s_stack, (0, 2, 1)).astype(f32)        # (3, S, B)

    # ---- band de-interleave: reorder channels to [ll | lh | hl | hh] --------
    c = np.arange(C1)
    perm = np.concatenate([c, CIN // 4 + 3 * c, CIN // 4 + 3 * c + 1,
                           CIN // 4 + 3 * c + 2])
    x_p = hidden.reshape(B, CIN, HW)[:, perm, :].astype(f32)        # (B, CIN, HW)
    wm_up = params["up_mod_w"][perm, :].astype(f32)                 # (CIN, S)
    bm_up = params["up_mod_b"][perm].reshape(CIN, 1).astype(f32)    # (CIN, 1)

    # ---- Haar spreading matrices: quadrant (r,s) -> interleaved pixel index --
    # TODO(synk): DWTInverse is specialized to wave='db1', mode='zero' (the
    # configuration MobileSynthesisBlock constructs); other wavelets/modes are
    # not implemented.
    g = np.zeros((4, HW, OHW), np.float32)
    for r in (0, 1):
        for s_ in (0, 1):
            for i in range(H):
                for j in range(W):
                    g[2 * r + s_, i * W + j, (2 * i + r) * OW + (2 * j + s_)] = 1.0
    g = jnp.asarray(g)

    # ---- column-wrap masks for the flattened 3x3 conv shifts ----------------
    col = np.arange(OHW) % OW
    masks = np.stack([(col != 0), (col != OW - 1)]).astype(np.float32)
    masks = jnp.asarray(masks.reshape(2, 1, OHW))     # [0]: dx=-1, [1]: dx=+1

    # ---- styled-conv parameter folding (scale -> modulation, demod -> taps) --
    def _prep_styled_conv(w, mod_w, mod_b, style_inv):
        cout, cin, k, _ = w.shape
        scale = 1.0 / math.sqrt(cin * k * k)
        wm = (scale * mod_w).astype(f32)                            # (cin, S)
        bm = (scale * mod_b).reshape(cin, 1).astype(f32)            # (cin, 1)
        demod = jax.lax.rsqrt(
            jnp.sum((scale * style_inv * w[None]) ** 2, axis=(2, 3, 4)) + 1e-8
        )                                                           # (1, cout)
        taps = jnp.transpose(w, (2, 3, 0, 1)).reshape(k * k, cout, cin)
        taps = (taps * demod.reshape(1, cout, 1)).astype(f32)       # (9, cout, cin)
        return wm, bm, taps

    wm1, bm1, wt1 = _prep_styled_conv(
        params["conv1_w"], params["conv1_mod_w"], params["conv1_mod_b"],
        params["conv1_style_inv"])
    wm2, bm2, wt2 = _prep_styled_conv(
        params["conv2_w"], params["conv2_mod_w"], params["conv2_mod_b"],
        params["conv2_style_inv"])
    b1 = params["conv1_bias"].reshape(COUT, 1).astype(f32)
    b2 = params["conv2_bias"].reshape(COUT, 1).astype(f32)
    # NoiseInjection: weight * noise (the scalar weight is folded here).
    n1 = (params["conv1_noise_w"] * noise1).reshape(B, 1, OHW).astype(f32)
    n2 = (params["conv2_noise_w"] * noise2).reshape(B, 1, OHW).astype(f32)

    # ---- to_img (1x1 modulated conv, demodulate=False) ----------------------
    scale_i = 1.0 / math.sqrt(COUT)
    wmi = (scale_i * params["img_mod_w"]).astype(f32)               # (COUT, S)
    bmi = (scale_i * params["img_mod_b"]).reshape(COUT, 1).astype(f32)
    wi = params["img_w"].reshape(CIMG, COUT).astype(f32)
    bi = params["img_bias"].reshape(CIMG, 1).astype(f32)

    taps = [(dy, dx) for dy in (-1, 0, 1) for dx in (-1, 0, 1)]

    def kernel(x_ref, st_ref, g_ref, msk_ref,
               wmu_ref, bmu_ref,
               wm1_ref, bm1_ref, wt1_ref, b1_ref, n1_ref,
               wm2_ref, bm2_ref, wt2_ref, b2_ref, n2_ref,
               wmi_ref, bmi_ref, wi_ref, bi_ref,
               hid_ref, img_ref,
               xp1_ref, xp2_ref):
        s0 = st_ref[0]                                   # (S, B)
        s1 = st_ref[1]
        s2 = st_ref[2]
        # Per-channel style modulations, channels-as-rows: (C, B).
        mod_up = jnp.dot(wmu_ref[...], s0, preferred_element_type=jnp.float32) + bmu_ref[...]
        mod1 = jnp.dot(wm1_ref[...], s0, preferred_element_type=jnp.float32) + bm1_ref[...]
        mod2 = jnp.dot(wm2_ref[...], s1, preferred_element_type=jnp.float32) + bm2_ref[...]
        modi = jnp.dot(wmi_ref[...], s2, preferred_element_type=jnp.float32) + bmi_ref[...]

        # Zero the halos of the padded conv scratch rows once.
        xp1_ref[:, :, 0:PAD] = jnp.zeros((B, C1, PAD), jnp.float32)
        xp1_ref[:, :, PAD + OHW:PADW] = jnp.zeros((B, C1, PAD), jnp.float32)
        xp2_ref[:, :, 0:PAD] = jnp.zeros((B, COUT, PAD), jnp.float32)
        xp2_ref[:, :, PAD + OHW:PADW] = jnp.zeros((B, COUT, PAD), jnp.float32)

        mask_l = msk_ref[0]                              # (1, OHW), for dx = -1
        mask_r = msk_ref[1]                              # (1, OHW), for dx = +1

        def conv3x3(xpad, wt_ref):
            # xpad: (Cin, PADW) zero-padded flattened row; 9 shifted MXU matmuls.
            acc = jnp.zeros((COUT, OHW), jnp.float32)
            for t, (dy, dx) in enumerate(taps):
                off = PAD + dy * OW + dx
                xs = xpad[:, off:off + OHW]
                if dx == -1:
                    xs = xs * mask_l
                elif dx == 1:
                    xs = xs * mask_r
                acc = acc + jnp.dot(wt_ref[t], xs,
                                    preferred_element_type=jnp.float32)
            return acc

        for b in range(B):
            # ---- IDWTUpsampler: modulate + inverse Haar (2x upsample) -------
            xb = x_ref[b] * mod_up[:, b:b + 1]           # (4*C1, HW)
            ll = xb[0:C1]
            lh = xb[C1:2 * C1]
            hl = xb[2 * C1:3 * C1]
            hh = xb[3 * C1:4 * C1]
            q00 = (ll + lh + hl + hh) * 0.5
            q01 = (ll + lh - hl - hh) * 0.5
            q10 = (ll - lh + hl - hh) * 0.5
            q11 = (ll - lh - hl + hh) * 0.5
            y = (jnp.dot(q00, g_ref[0], preferred_element_type=jnp.float32)
                 + jnp.dot(q01, g_ref[1], preferred_element_type=jnp.float32)
                 + jnp.dot(q10, g_ref[2], preferred_element_type=jnp.float32)
                 + jnp.dot(q11, g_ref[3], preferred_element_type=jnp.float32))

            # ---- conv1: StyledConv2d(C1 -> COUT, 3x3) -----------------------
            xp1_ref[b, :, PAD:PAD + OHW] = y * mod1[:, b:b + 1]
            h1 = conv3x3(xp1_ref[b], wt1_ref) + n1_ref[b] + b1_ref[...]
            h1 = jnp.maximum(h1, 0.2 * h1)               # LeakyReLU(0.2)

            # ---- conv2: StyledConv2d(COUT -> COUT, 3x3) ---------------------
            xp2_ref[b, :, PAD:PAD + OHW] = h1 * mod2[:, b:b + 1]
            h2 = conv3x3(xp2_ref[b], wt2_ref) + n2_ref[b] + b2_ref[...]
            h2 = jnp.maximum(h2, 0.2 * h2)
            hid_ref[b] = h2                              # lane-dense (COUT, 256) store

            # ---- to_img: MultichannelImage (1x1 modulated conv + bias) ------
            xi = h2 * modi[:, b:b + 1]
            img_ref[b] = jnp.dot(wi_ref[...], xi,
                                 preferred_element_type=jnp.float32) + bi_ref[...]

    vmem = pltpu.MemorySpace.VMEM
    hidden_flat, img_flat = pl.pallas_call(
        kernel,
        out_shape=(
            jax.ShapeDtypeStruct((B, COUT, OHW), f32),
            jax.ShapeDtypeStruct((B, CIMG, OHW), f32),
        ),
        in_specs=[pl.BlockSpec(memory_space=vmem)] * 20,
        out_specs=(pl.BlockSpec(memory_space=vmem),
                   pl.BlockSpec(memory_space=vmem)),
        scratch_shapes=[
            pltpu.VMEM((B, C1, PADW), f32),
            pltpu.VMEM((B, COUT, PADW), f32),
        ],
    )(
        x_p, styles_t, g, masks,
        wm_up, bm_up,
        wm1, bm1, wt1, b1, n1,
        wm2, bm2, wt2, b2, n2,
        wmi, bmi, wi, bi,
    )

    return (hidden_flat.reshape(B, COUT, OH, OW),
            img_flat.reshape(B, CIMG, OH, OW))


# ----------------------------- pure-JAX reference ---------------------------
def _reference_forward(hidden, style, params, noise1, noise2):
    f32 = jnp.float32
    B, CIN, H, W = hidden.shape
    C1 = CIN // 4
    hi_prec = jax.lax.Precision.HIGHEST
    if style.ndim == 2:
        s0 = s1 = s2 = style
    else:
        s0, s1, s2 = style[:, 0], style[:, 1], style[:, 2]

    # IDWTUpsampler
    mod = jnp.dot(s0, params["up_mod_w"].T, precision=hi_prec) + params["up_mod_b"]
    x = hidden * mod[:, :, None, None]
    low = x[:, :C1]
    high = x[:, C1:].reshape(B, C1, 3, H, W)
    lh, hl, hh = high[:, :, 0], high[:, :, 1], high[:, :, 2]
    y = jnp.zeros((B, C1, 2 * H, 2 * W), f32)
    y = y.at[:, :, 0::2, 0::2].set((low + lh + hl + hh) * 0.5)
    y = y.at[:, :, 0::2, 1::2].set((low + lh - hl - hh) * 0.5)
    y = y.at[:, :, 1::2, 0::2].set((low - lh + hl - hh) * 0.5)
    y = y.at[:, :, 1::2, 1::2].set((low - lh - hl + hh) * 0.5)

    def styled_conv(xin, s, w, mw, mb, style_inv, bias, noise_w, noise):
        cout, cin, k, _ = w.shape
        scale = 1.0 / math.sqrt(cin * k * k)
        m = scale * (jnp.dot(s, mw.T, precision=hi_prec) + mb)
        xm = xin * m[:, :, None, None]
        out = jax.lax.conv_general_dilated(
            xm, w, (1, 1), ((k // 2, k // 2), (k // 2, k // 2)),
            dimension_numbers=("NCHW", "OIHW", "NCHW"), precision=hi_prec)
        demod = jax.lax.rsqrt(
            jnp.sum((scale * style_inv * w[None]) ** 2, axis=(2, 3, 4)) + 1e-8)
        out = out * demod.reshape(1, cout, 1, 1)
        out = out + noise_w * noise
        out = out + bias.reshape(1, cout, 1, 1)
        return jnp.maximum(out, 0.2 * out)

    h1 = styled_conv(y, s0, params["conv1_w"], params["conv1_mod_w"],
                     params["conv1_mod_b"], params["conv1_style_inv"],
                     params["conv1_bias"], params["conv1_noise_w"], noise1)
    h2 = styled_conv(h1, s1, params["conv2_w"], params["conv2_mod_w"],
                     params["conv2_mod_b"], params["conv2_style_inv"],
                     params["conv2_bias"], params["conv2_noise_w"], noise2)

    cimg, cout = params["img_w"].shape[:2]
    scale = 1.0 / math.sqrt(cout)
    m = scale * (jnp.dot(s2, params["img_mod_w"].T, precision=hi_prec)
                 + params["img_mod_b"])
    xm = h2 * m[:, :, None, None]
    img = jax.lax.conv_general_dilated(
        xm, params["img_w"], (1, 1), ((0, 0), (0, 0)),
        dimension_numbers=("NCHW", "OIHW", "NCHW"), precision=hi_prec)
    img = img + params["img_bias"].reshape(1, cimg, 1, 1)
    return h2, img


if __name__ == "__main__":
    key = jax.random.PRNGKey(0)
    keys = jax.random.split(key, 16)

    B = 2          # batch
    CIN = 16       # channels_in  (IDWT -> 4 channels, 2x spatial)
    COUT = 8       # channels_out
    S = 16         # style_dim
    H = W = 8      # input spatial  -> output spatial 16 x 16
    C1 = CIN // 4

    hidden = jax.random.normal(keys[0], (B, CIN, H, W), jnp.float32)
    style = jax.random.normal(keys[1], (B, S), jnp.float32)
    noise1 = jax.random.normal(keys[2], (B, 1, 2 * H, 2 * W), jnp.float32)
    noise2 = jax.random.normal(keys[3], (B, 1, 2 * H, 2 * W), jnp.float32)

    def lin_w(k, out_f, in_f):
        return jax.random.normal(k, (out_f, in_f), jnp.float32) / math.sqrt(in_f)

    # Noise weights / biases are given small nonzero values (module init is 0)
    # so that those code paths are actually exercised by the check.
    params = {
        "up_mod_w": lin_w(keys[4], CIN, S),
        "up_mod_b": jnp.ones((CIN,), jnp.float32),
        "conv1_w": jax.random.normal(keys[5], (COUT, C1, 3, 3), jnp.float32),
        "conv1_mod_w": lin_w(keys[6], C1, S),
        "conv1_mod_b": jnp.ones((C1,), jnp.float32),
        "conv1_style_inv": jax.random.normal(keys[7], (1, 1, C1, 1, 1), jnp.float32),
        "conv1_bias": 0.1 * jax.random.normal(keys[8], (COUT,), jnp.float32),
        "conv1_noise_w": jnp.full((1,), 0.1, jnp.float32),
        "conv2_w": jax.random.normal(keys[9], (COUT, COUT, 3, 3), jnp.float32),
        "conv2_mod_w": lin_w(keys[10], COUT, S),
        "conv2_mod_b": jnp.ones((COUT,), jnp.float32),
        "conv2_style_inv": jax.random.normal(keys[11], (1, 1, COUT, 1, 1), jnp.float32),
        "conv2_bias": 0.1 * jax.random.normal(keys[12], (COUT,), jnp.float32),
        "conv2_noise_w": jnp.full((1,), 0.1, jnp.float32),
        "img_w": jax.random.normal(keys[13], (12, COUT, 1, 1), jnp.float32),
        "img_mod_w": lin_w(keys[14], COUT, S),
        "img_mod_b": jnp.ones((COUT,), jnp.float32),
        "img_bias": 0.1 * jax.random.normal(keys[15], (12,), jnp.float32),
    }

    out_hidden, out_img = jax.jit(mobile_synthesis_block_forward)(
        hidden, style, params, noise1, noise2)
    out_hidden = jax.block_until_ready(out_hidden)
    out_img = jax.block_until_ready(out_img)

    ref_hidden, ref_img = _reference_forward(hidden, style, params, noise1, noise2)

    assert out_hidden.shape == (B, COUT, 2 * H, 2 * W)
    assert out_img.shape == (B, 12, 2 * H, 2 * W)

    def _check(got, ref, name):
        err = float(jnp.max(jnp.abs(got - ref)))
        scale = float(jnp.max(jnp.abs(ref))) + 1e-6
        assert err <= 3e-2 * scale, f"{name}: max|err|={err}, max|ref|={scale}"

    _check(out_hidden, ref_hidden, "hidden")
    _check(out_img, ref_img, "img")

    print("KERNEL_OK")
</pallas_src>

<mosaic_0001>
module attributes {stable_mosaic.version = 11 : i64} {
  func.func @kernel(%arg0: memref<2x16x64xf32, #tpu.memory_space<vmem>>, %arg1: memref<3x16x2xf32, #tpu.memory_space<vmem>>, %arg2: memref<4x64x256xf32, #tpu.memory_space<vmem>>, %arg3: memref<2x1x256xf32, #tpu.memory_space<vmem>>, %arg4: memref<16x16xf32, #tpu.memory_space<vmem>>, %arg5: memref<16x1xf32, #tpu.memory_space<vmem>>, %arg6: memref<4x16xf32, #tpu.memory_space<vmem>>, %arg7: memref<4x1xf32, #tpu.memory_space<vmem>>, %arg8: memref<9x8x4xf32, #tpu.memory_space<vmem>>, %arg9: memref<8x1xf32, #tpu.memory_space<vmem>>, %arg10: memref<2x1x256xf32, #tpu.memory_space<vmem>>, %arg11: memref<8x16xf32, #tpu.memory_space<vmem>>, %arg12: memref<8x1xf32, #tpu.memory_space<vmem>>, %arg13: memref<9x8x8xf32, #tpu.memory_space<vmem>>, %arg14: memref<8x1xf32, #tpu.memory_space<vmem>>, %arg15: memref<2x1x256xf32, #tpu.memory_space<vmem>>, %arg16: memref<8x16xf32, #tpu.memory_space<vmem>>, %arg17: memref<8x1xf32, #tpu.memory_space<vmem>>, %arg18: memref<12x8xf32, #tpu.memory_space<vmem>>, %arg19: memref<12x1xf32, #tpu.memory_space<vmem>>, %arg20: memref<2x8x256xf32, #tpu.memory_space<vmem>>, %arg21: memref<2x12x256xf32, #tpu.memory_space<vmem>>, %arg22: memref<2x4x290xf32, #tpu.memory_space<vmem>>, %arg23: memref<2x8x290xf32, #tpu.memory_space<vmem>>) attributes {dimension_semantics = [], scalar_prefetch = 0 : i64, scratch_operands = 2 : i64, tpu.core_type = #tpu.core_type<tc>} {
    %c0 = arith.constant 0 : index
    %c0_0 = arith.constant 0 : index
    %c0_1 = arith.constant 0 : index
    %0 = vector.load %arg1[%c0, %c0_0, %c0_1] : memref<3x16x2xf32, #tpu.memory_space<vmem>>, vector<1x16x2xf32>
    %1 = vector.shape_cast %0 : vector<1x16x2xf32> to vector<16x2xf32>
    %c1 = arith.constant 1 : index
    %c0_2 = arith.constant 0 : index
    %c0_3 = arith.constant 0 : index
    %2 = vector.load %arg1[%c1, %c0_2, %c0_3] : memref<3x16x2xf32, #tpu.memory_space<vmem>>, vector<1x16x2xf32>
    %3 = vector.shape_cast %2 : vector<1x16x2xf32> to vector<16x2xf32>
    %c2 = arith.constant 2 : index
    %c0_4 = arith.constant 0 : index
    %c0_5 = arith.constant 0 : index
    %4 = vector.load %arg1[%c2, %c0_4, %c0_5] : memref<3x16x2xf32, #tpu.memory_space<vmem>>, vector<1x16x2xf32>
    %5 = vector.shape_cast %4 : vector<1x16x2xf32> to vector<16x2xf32>
    %c0_6 = arith.constant 0 : index
    %c0_7 = arith.constant 0 : index
    %6 = vector.load %arg4[%c0_6, %c0_7] : memref<16x16xf32, #tpu.memory_space<vmem>>, vector<16x16xf32>
    %cst = arith.constant dense<0.000000e+00> : vector<16x2xf32>
    %7 = tpu.matmul %6, %1, %cst {dimension_numbers = #tpu.dot_dimension_numbers<[1], [0], [0], [1], [0, 0, 1, 1], [], []>} : vector<16x16xf32>, vector<16x2xf32>, vector<16x2xf32> -> vector<16x2xf32>
    %c0_8 = arith.constant 0 : index
    %c0_9 = arith.constant 0 : index
    %8 = vector.load %arg5[%c0_8, %c0_9] : memref<16x1xf32, #tpu.memory_space<vmem>>, vector<16x1xf32>
    %9 = vector.broadcast %8 : vector<16x1xf32> to vector<16x2xf32>
    %10 = arith.addf %7, %9 : vector<16x2xf32>
    %c0_10 = arith.constant 0 : index
    %c0_11 = arith.constant 0 : index
    %11 = vector.load %arg6[%c0_10, %c0_11] : memref<4x16xf32, #tpu.memory_space<vmem>>, vector<4x16xf32>
    %cst_12 = arith.constant dense<0.000000e+00> : vector<4x2xf32>
    %12 = tpu.matmul %11, %1, %cst_12 {dimension_numbers = #tpu.dot_dimension_numbers<[1], [0], [0], [1], [0, 0, 1, 1], [], []>} : vector<4x16xf32>, vector<16x2xf32>, vector<4x2xf32> -> vector<4x2xf32>
    %c0_13 = arith.constant 0 : index
    %c0_14 = arith.constant 0 : index
    %13 = vector.load %arg7[%c0_13, %c0_14] : memref<4x1xf32, #tpu.memory_space<vmem>>, vector<4x1xf32>
    %14 = vector.broadcast %13 : vector<4x1xf32> to vector<4x2xf32>
    %15 = arith.addf %12, %14 : vector<4x2xf32>
    %c0_15 = arith.constant 0 : index
    %c0_16 = arith.constant 0 : index
    %16 = vector.load %arg11[%c0_15, %c0_16] : memref<8x16xf32, #tpu.memory_space<vmem>>, vector<8x16xf32>
    %cst_17 = arith.constant dense<0.000000e+00> : vector<8x2xf32>
    %17 = tpu.matmul %16, %3, %cst_17 {dimension_numbers = #tpu.dot_dimension_numbers<[1], [0], [0], [1], [0, 0, 1, 1], [], []>} : vector<8x16xf32>, vector<16x2xf32>, vector<8x2xf32> -> vector<8x2xf32>
    %c0_18 = arith.constant 0 : index
    %c0_19 = arith.constant 0 : index
    %18 = vector.load %arg12[%c0_18, %c0_19] : memref<8x1xf32, #tpu.memory_space<vmem>>, vector<8x1xf32>
    %19 = vector.broadcast %18 : vector<8x1xf32> to vector<8x2xf32>
    %20 = arith.addf %17, %19 : vector<8x2xf32>
    %c0_20 = arith.constant 0 : index
    %c0_21 = arith.constant 0 : index
    %21 = vector.load %arg16[%c0_20, %c0_21] : memref<8x16xf32, #tpu.memory_space<vmem>>, vector<8x16xf32>
    %cst_22 = arith.constant dense<0.000000e+00> : vector<8x2xf32>
    %22 = tpu.matmul %21, %5, %cst_22 {dimension_numbers = #tpu.dot_dimension_numbers<[1], [0], [0], [1], [0, 0, 1, 1], [], []>} : vector<8x16xf32>, vector<16x2xf32>, vector<8x2xf32> -> vector<8x2xf32>
    %c0_23 = arith.constant 0 : index
    %c0_24 = arith.constant 0 : index
    %23 = vector.load %arg17[%c0_23, %c0_24] : memref<8x1xf32, #tpu.memory_space<vmem>>, vector<8x1xf32>
    %24 = vector.broadcast %23 : vector<8x1xf32> to vector<8x2xf32>
    %25 = arith.addf %22, %24 : vector<8x2xf32>
    %cst_25 = arith.constant 0.000000e+00 : f32
    %26 = vector.broadcast %cst_25 : f32 to vector<2x4x17xf32>
    %c0_26 = arith.constant 0 : index
    %c0_27 = arith.constant 0 : index
    %c0_28 = arith.constant 0 : index
    %27 = vector.load %arg22[%c0_26, %c0_27, %c0_28] : memref<2x4x290xf32, #tpu.memory_space<vmem>>, vector<2x4x17xf32>
    tpu.vector_store %arg22[%c0_26, %c0_27, %c0_28], %26 {strides = array<i32>} : memref<2x4x290xf32, #tpu.memory_space<vmem>>, vector<2x4x17xf32>,
    %cst_29 = arith.constant 0.000000e+00 : f32
    %28 = vector.broadcast %cst_29 : f32 to vector<2x4x17xf32>
    %c0_30 = arith.constant 0 : index
    %c0_31 = arith.constant 0 : index
    %c273 = arith.constant 273 : index
    %29 = vector.load %arg22[%c0_30, %c0_31, %c273] : memref<2x4x290xf32, #tpu.memory_space<vmem>>, vector<2x4x17xf32>
    tpu.vector_store %arg22[%c0_30, %c0_31, %c273], %28 {strides = array<i32>} : memref<2x4x290xf32, #tpu.memory_space<vmem>>, vector<2x4x17xf32>,
    %cst_32 = arith.constant 0.000000e+00 : f32
    %30 = vector.broadcast %cst_32 : f32 to vector<2x8x17xf32>
    %c0_33 = arith.constant 0 : index
    %c0_34 = arith.constant 0 : index
    %c0_35 = arith.constant 0 : index
    %31 = vector.load %arg23[%c0_33, %c0_34, %c0_35] : memref<2x8x290xf32, #tpu.memory_space<vmem>>, vector<2x8x17xf32>
    tpu.vector_store %arg23[%c0_33, %c0_34, %c0_35], %30 {strides = array<i32>} : memref<2x8x290xf32, #tpu.memory_space<vmem>>, vector<2x8x17xf32>,
    %cst_36 = arith.constant 0.000000e+00 : f32
    %32 = vector.broadcast %cst_36 : f32 to vector<2x8x17xf32>
    %c0_37 = arith.constant 0 : index
    %c0_38 = arith.constant 0 : index
    %c273_39 = arith.constant 273 : index
    %33 = vector.load %arg23[%c0_37, %c0_38, %c273_39] : memref<2x8x290xf32, #tpu.memory_space<vmem>>, vector<2x8x17xf32>
    tpu.vector_store %arg23[%c0_37, %c0_38, %c273_39], %32 {strides = array<i32>} : memref<2x8x290xf32, #tpu.memory_space<vmem>>, vector<2x8x17xf32>,
    %c0_40 = arith.constant 0 : index
    %c0_41 = arith.constant 0 : index
    %c0_42 = arith.constant 0 : index
    %34 = vector.load %arg3[%c0_40, %c0_41, %c0_42] : memref<2x1x256xf32, #tpu.memory_space<vmem>>, vector<1x1x256xf32>
    %35 = vector.shape_cast %34 : vector<1x1x256xf32> to vector<1x256xf32>
    %c1_43 = arith.constant 1 : index
    %c0_44 = arith.constant 0 : index
    %c0_45 = arith.constant 0 : index
    %36 = vector.load %arg3[%c1_43, %c0_44, %c0_45] : memref<2x1x256xf32, #tpu.memory_space<vmem>>, vector<1x1x256xf32>
    %37 = vector.shape_cast %36 : vector<1x1x256xf32> to vector<1x256xf32>
    %c0_46 = arith.constant 0 : index
    %c0_47 = arith.constant 0 : index
    %c0_48 = arith.constant 0 : index
    %38 = vector.load %arg0[%c0_46, %c0_47, %c0_48] : memref<2x16x64xf32, #tpu.memory_space<vmem>>, vector<1x16x64xf32>
    %39 = vector.shape_cast %38 : vector<1x16x64xf32> to vector<16x64xf32>
    %40 = vector.extract_strided_slice %10 {offsets = [0, 0], sizes = [16, 1], strides = [1, 1]} : vector<16x2xf32> to vector<16x1xf32>
    %41 = vector.broadcast %40 : vector<16x1xf32> to vector<16x64xf32>
    %42 = arith.mulf %39, %41 : vector<16x64xf32>
    %43 = vector.extract_strided_slice %42 {offsets = [0, 0], sizes = [4, 64], strides = [1, 1]} : vector<16x64xf32> to vector<4x64xf32>
    %44 = vector.extract_strided_slice %42 {offsets = [4, 0], sizes = [4, 64], strides = [1, 1]} : vector<16x64xf32> to vector<4x64xf32>
    %45 = vector.extract_strided_slice %42 {offsets = [8, 0], sizes = [4, 64], strides = [1, 1]} : vector<16x64xf32> to vector<4x64xf32>
    %46 = vector.extract_strided_slice %42 {offsets = [12, 0], sizes = [4, 64], strides = [1, 1]} : vector<16x64xf32> to vector<4x64xf32>
    %47 = arith.addf %43, %44 : vector<4x64xf32>
    %48 = arith.addf %47, %45 : vector<4x64xf32>
    %49 = arith.addf %48, %46 : vector<4x64xf32>
    %cst_49 = arith.constant 5.000000e-01 : f32
    %50 = vector.broadcast %cst_49 : f32 to vector<4x64xf32>
    %51 = arith.mulf %49, %50 : vector<4x64xf32>
    %52 = arith.addf %43, %44 : vector<4x64xf32>
    %53 = arith.subf %52, %45 : vector<4x64xf32>
    %54 = arith.subf %53, %46 : vector<4x64xf32>
    %cst_50 = arith.constant 5.000000e-01 : f32
    %55 = vector.broadcast %cst_50 : f32 to vector<4x64xf32>
    %56 = arith.mulf %54, %55 : vector<4x64xf32>
    %57 = arith.subf %43, %44 : vector<4x64xf32>
    %58 = arith.addf %57, %45 : vector<4x64xf32>
    %59 = arith.subf %58, %46 : vector<4x64xf32>
    %cst_51 = arith.constant 5.000000e-01 : f32
    %60 = vector.broadcast %cst_51 : f32 to vector<4x64xf32>
    %61 = arith.mulf %59, %60 : vector<4x64xf32>
    %62 = arith.subf %43, %44 : vector<4x64xf32>
    %63 = arith.subf %62, %45 : vector<4x64xf32>
    %64 = arith.addf %63, %46 : vector<4x64xf32>
    %cst_52 = arith.constant 5.000000e-01 : f32
    %65 = vector.broadcast %cst_52 : f32 to vector<4x64xf32>
    %66 = arith.mulf %64, %65 : vector<4x64xf32>
    %c0_53 = arith.constant 0 : index
    %c0_54 = arith.constant 0 : index
    %c0_55 = arith.constant 0 : index
    %67 = vector.load %arg2[%c0_53, %c0_54, %c0_55] : memref<4x64x256xf32, #tpu.memory_space<vmem>>, vector<1x64x256xf32>
    %68 = vector.shape_cast %67 : vector<1x64x256xf32> to vector<64x256xf32>
    %cst_56 = arith.constant dense<0.000000e+00> : vector<4x256xf32>
    %69 = tpu.matmul %51, %68, %cst_56 {dimension_numbers = #tpu.dot_dimension_numbers<[1], [0], [0], [1], [0, 0, 1, 1], [], []>} : vector<4x64xf32>, vector<64x256xf32>, vector<4x256xf32> -> vector<4x256xf32>
    %c1_57 = arith.constant 1 : index
    %c0_58 = arith.constant 0 : index
    %c0_59 = arith.constant 0 : index
    %70 = vector.load %arg2[%c1_57, %c0_58, %c0_59] : memref<4x64x256xf32, #tpu.memory_space<vmem>>, vector<1x64x256xf32>
    %71 = vector.shape_cast %70 : vector<1x64x256xf32> to vector<64x256xf32>
    %cst_60 = arith.constant dense<0.000000e+00> : vector<4x256xf32>
    %72 = tpu.matmul %56, %71, %cst_60 {dimension_numbers = #tpu.dot_dimension_numbers<[1], [0], [0], [1], [0, 0, 1, 1], [], []>} : vector<4x64xf32>, vector<64x256xf32>, vector<4x256xf32> -> vector<4x256xf32>
    %73 = arith.addf %69, %72 : vector<4x256xf32>
    %c2_61 = arith.constant 2 : index
    %c0_62 = arith.constant 0 : index
    %c0_63 = arith.constant 0 : index
    %74 = vector.load %arg2[%c2_61, %c0_62, %c0_63] : memref<4x64x256xf32, #tpu.memory_space<vmem>>, vector<1x64x256xf32>
    %75 = vector.shape_cast %74 : vector<1x64x256xf32> to vector<64x256xf32>
    %cst_64 = arith.constant dense<0.000000e+00> : vector<4x256xf32>
    %76 = tpu.matmul %61, %75, %cst_64 {dimension_numbers = #tpu.dot_dimension_numbers<[1], [0], [0], [1], [0, 0, 1, 1], [], []>} : vector<4x64xf32>, vector<64x256xf32>, vector<4x256xf32> -> vector<4x256xf32>
    %77 = arith.addf %73, %76 : vector<4x256xf32>
    %c3 = arith.constant 3 : index
    %c0_65 = arith.constant 0 : index
    %c0_66 = arith.constant 0 : index
    %78 = vector.load %arg2[%c3, %c0_65, %c0_66] : memref<4x64x256xf32, #tpu.memory_space<vmem>>, vector<1x64x256xf32>
    %79 = vector.shape_cast %78 : vector<1x64x256xf32> to vector<64x256xf32>
    %cst_67 = arith.constant dense<0.000000e+00> : vector<4x256xf32>
    %80 = tpu.matmul %66, %79, %cst_67 {dimension_numbers = #tpu.dot_dimension_numbers<[1], [0], [0], [1], [0, 0, 1, 1], [], []>} : vector<4x64xf32>, vector<64x256xf32>, vector<4x256xf32> -> vector<4x256xf32>
    %81 = arith.addf %77, %80 : vector<4x256xf32>
    %82 = vector.extract_strided_slice %15 {offsets = [0, 0], sizes = [4, 1], strides = [1, 1]} : vector<4x2xf32> to vector<4x1xf32>
    %83 = vector.broadcast %82 : vector<4x1xf32> to vector<4x256xf32>
    %84 = arith.mulf %81, %83 : vector<4x256xf32>
    %c0_68 = arith.constant 0 : index
    %c0_69 = arith.constant 0 : index
    %c17 = arith.constant 17 : index
    %85 = vector.load %arg22[%c0_68, %c0_69, %c17] : memref<2x4x290xf32, #tpu.memory_space<vmem>>, vector<1x4x256xf32>
    %86 = vector.shape_cast %85 : vector<1x4x256xf32> to vector<4x256xf32>
    %87 = vector.shape_cast %84 : vector<4x256xf32> to vector<1x4x256xf32>
    tpu.vector_store %arg22[%c0_68, %c0_69, %c17], %87 {strides = array<i32>} : memref<2x4x290xf32, #tpu.memory_space<vmem>>, vector<1x4x256xf32>,
    %c0_70 = arith.constant 0 : index
    %c0_71 = arith.constant 0 : index
    %c0_72 = arith.constant 0 : index
    %88 = vector.load %arg22[%c0_70, %c0_71, %c0_72] : memref<2x4x290xf32, #tpu.memory_space<vmem>>, vector<1x4x290xf32>
    %89 = vector.shape_cast %88 : vector<1x4x290xf32> to vector<4x290xf32>
    %cst_73 = arith.constant 0.000000e+00 : f32
    %90 = vector.broadcast %cst_73 : f32 to vector<8x256xf32>
    %91 = vector.extract_strided_slice %89 {offsets = [0, 0], sizes = [4, 256], strides = [1, 1]} : vector<4x290xf32> to vector<4x256xf32>
    %92 = vector.broadcast %35 : vector<1x256xf32> to vector<4x256xf32>
    %93 = arith.mulf %91, %92 : vector<4x256xf32>
    %c0_74 = arith.constant 0 : index
    %c0_75 = arith.constant 0 : index
    %c0_76 = arith.constant 0 : index
    %94 = vector.load %arg8[%c0_74, %c0_75, %c0_76] : memref<9x8x4xf32, #tpu.memory_space<vmem>>, vector<1x8x4xf32>
    %95 = vector.shape_cast %94 : vector<1x8x4xf32> to vector<8x4xf32>
    %cst_77 = arith.constant dense<0.000000e+00> : vector<8x256xf32>
    %96 = tpu.matmul %95, %93, %cst_77 {dimension_numbers = #tpu.dot_dimension_numbers<[1], [0], [0], [1], [0, 0, 1, 1], [], []>} : vector<8x4xf32>, vector<4x256xf32>, vector<8x256xf32> -> vector<8x256xf32>
    %97 = arith.addf %90, %96 : vector<8x256xf32>
    %98 = vector.extract_strided_slice %89 {offsets = [0, 1], sizes = [4, 256], strides = [1, 1]} : vector<4x290xf32> to vector<4x256xf32>
    %c1_78 = arith.constant 1 : index
    %c0_79 = arith.constant 0 : index
    %c0_80 = arith.constant 0 : index
    %99 = vector.load %arg8[%c1_78, %c0_79, %c0_80] : memref<9x8x4xf32, #tpu.memory_space<vmem>>, vector<1x8x4xf32>
    %100 = vector.shape_cast %99 : vector<1x8x4xf32> to vector<8x4xf32>
    %cst_81 = arith.constant dense<0.000000e+00> : vector<8x256xf32>
    %101 = tpu.matmul %100, %98, %cst_81 {dimension_numbers = #tpu.dot_dimension_numbers<[1], [0], [0], [1], [0, 0, 1, 1], [], []>} : vector<8x4xf32>, vector<4x256xf32>, vector<8x256xf32> -> vector<8x256xf32>
    %102 = arith.addf %97, %101 : vector<8x256xf32>
    %103 = vector.extract_strided_slice %89 {offsets = [0, 2], sizes = [4, 256], strides = [1, 1]} : vector<4x290xf32> to vector<4x256xf32>
    %104 = vector.broadcast %37 : vector<1x256xf32> to vector<4x256xf32>
    %105 = arith.mulf %103, %104 : vector<4x256xf32>
    %c2_82 = arith.constant 2 : index
    %c0_83 = arith.constant 0 : index
    %c0_84 = arith.constant 0 : index
    %106 = vector.load %arg8[%c2_82, %c0_83, %c0_84] : memref<9x8x4xf32, #tpu.memory_space<vmem>>, vector<1x8x4xf32>
    %107 = vector.shape_cast %106 : vector<1x8x4xf32> to vector<8x4xf32>
    %cst_85 = arith.constant dense<0.000000e+00> : vector<8x256xf32>
    %108 = tpu.matmul %107, %105, %cst_85 {dimension_numbers = #tpu.dot_dimension_numbers<[1], [0], [0], [1], [0, 0, 1, 1], [], []>} : vector<8x4xf32>, vector<4x256xf32>, vector<8x256xf32> -> vector<8x256xf32>
    %109 = arith.addf %102, %108 : vector<8x256xf32>
    %110 = vector.extract_strided_slice %89 {offsets = [0, 16], sizes = [4, 256], strides = [1, 1]} : vector<4x290xf32> to vector<4x256xf32>
    %111 = vector.broadcast %35 : vector<1x256xf32> to vector<4x256xf32>
    %112 = arith.mulf %110, %111 : vector<4x256xf32>
    %c3_86 = arith.constant 3 : index
    %c0_87 = arith.constant 0 : index
    %c0_88 = arith.constant 0 : index
    %113 = vector.load %arg8[%c3_86, %c0_87, %c0_88] : memref<9x8x4xf32, #tpu.memory_space<vmem>>, vector<1x8x4xf32>
    %114 = vector.shape_cast %113 : vector<1x8x4xf32> to vector<8x4xf32>
    %cst_89 = arith.constant dense<0.000000e+00> : vector<8x256xf32>
    %115 = tpu.matmul %114, %112, %cst_89 {dimension_numbers = #tpu.dot_dimension_numbers<[1], [0], [0], [1], [0, 0, 1, 1], [], []>} : vector<8x4xf32>, vector<4x256xf32>, vector<8x256xf32> -> vector<8x256xf32>
    %116 = arith.addf %109, %115 : vector<8x256xf32>
    %117 = vector.extract_strided_slice %89 {offsets = [0, 17], sizes = [4, 256], strides = [1, 1]} : vector<4x290xf32> to vector<4x256xf32>
    %c4 = arith.constant 4 : index
    %c0_90 = arith.constant 0 : index
    %c0_91 = arith.constant 0 : index
    %118 = vector.load %arg8[%c4, %c0_90, %c0_91] : memref<9x8x4xf32, #tpu.memory_space<vmem>>, vector<1x8x4xf32>
    %119 = vector.shape_cast %118 : vector<1x8x4xf32> to vector<8x4xf32>
    %cst_92 = arith.constant dense<0.000000e+00> : vector<8x256xf32>
    %120 = tpu.matmul %119, %117, %cst_92 {dimension_numbers = #tpu.dot_dimension_numbers<[1], [0], [0], [1], [0, 0, 1, 1], [], []>} : vector<8x4xf32>, vector<4x256xf32>, vector<8x256xf32> -> vector<8x256xf32>
    %121 = arith.addf %116, %120 : vector<8x256xf32>
    %122 = vector.extract_strided_slice %89 {offsets = [0, 18], sizes = [4, 256], strides = [1, 1]} : vector<4x290xf32> to vector<4x256xf32>
    %123 = vector.broadcast %37 : vector<1x256xf32> to vector<4x256xf32>
    %124 = arith.mulf %122, %123 : vector<4x256xf32>
    %c5 = arith.constant 5 : index
    %c0_93 = arith.constant 0 : index
    %c0_94 = arith.constant 0 : index
    %125 = vector.load %arg8[%c5, %c0_93, %c0_94] : memref<9x8x4xf32, #tpu.memory_space<vmem>>, vector<1x8x4xf32>
    %126 = vector.shape_cast %125 : vector<1x8x4xf32> to vector<8x4xf32>
    %cst_95 = arith.constant dense<0.000000e+00> : vector<8x256xf32>
    %127 = tpu.matmul %126, %124, %cst_95 {dimension_numbers = #tpu.dot_dimension_numbers<[1], [0], [0], [1], [0, 0, 1, 1], [], []>} : vector<8x4xf32>, vector<4x256xf32>, vector<8x256xf32> -> vector<8x256xf32>
    %128 = arith.addf %121, %127 : vector<8x256xf32>
    %129 = vector.extract_strided_slice %89 {offsets = [0, 32], sizes = [4, 256], strides = [1, 1]} : vector<4x290xf32> to vector<4x256xf32>
    %130 = vector.broadcast %35 : vector<1x256xf32> to vector<4x256xf32>
    %131 = arith.mulf %129, %130 : vector<4x256xf32>
    %c6 = arith.constant 6 : index
    %c0_96 = arith.constant 0 : index
    %c0_97 = arith.constant 0 : index
    %132 = vector.load %arg8[%c6, %c0_96, %c0_97] : memref<9x8x4xf32, #tpu.memory_space<vmem>>, vector<1x8x4xf32>
    %133 = vector.shape_cast %132 : vector<1x8x4xf32> to vector<8x4xf32>
    %cst_98 = arith.constant dense<0.000000e+00> : vector<8x256xf32>
    %134 = tpu.matmul %133, %131, %cst_98 {dimension_numbers = #tpu.dot_dimension_numbers<[1], [0], [0], [1], [0, 0, 1, 1], [], []>} : vector<8x4xf32>, vector<4x256xf32>, vector<8x256xf32> -> vector<8x256xf32>
    %135 = arith.addf %128, %134 : vector<8x256xf32>
    %136 = vector.extract_strided_slice %89 {offsets = [0, 33], sizes = [4, 256], strides = [1, 1]} : vector<4x290xf32> to vector<4x256xf32>
    %c7 = arith.constant 7 : index
    %c0_99 = arith.constant 0 : index
    %c0_100 = arith.constant 0 : index
    %137 = vector.load %arg8[%c7, %c0_99, %c0_100] : memref<9x8x4xf32, #tpu.memory_space<vmem>>, vector<1x8x4xf32>
    %138 = vector.shape_cast %137 : vector<1x8x4xf32> to vector<8x4xf32>
    %cst_101 = arith.constant dense<0.000000e+00> : vector<8x256xf32>
    %139 = tpu.matmul %138, %136, %cst_101 {dimension_numbers = #tpu.dot_dimension_numbers<[1], [0], [0], [1], [0, 0, 1, 1], [], []>} : vector<8x4xf32>, vector<4x256xf32>, vector<8x256xf32> -> vector<8x256xf32>
    %140 = arith.addf %135, %139 : vector<8x256xf32>
    %141 = vector.extract_strided_slice %89 {offsets = [0, 34], sizes = [4, 256], strides = [1, 1]} : vector<4x290xf32> to vector<4x256xf32>
    %142 = vector.broadcast %37 : vector<1x256xf32> to vector<4x256xf32>
    %143 = arith.mulf %141, %142 : vector<4x256xf32>
    %c8 = arith.constant 8 : index
    %c0_102 = arith.constant 0 : index
    %c0_103 = arith.constant 0 : index
    %144 = vector.load %arg8[%c8, %c0_102, %c0_103] : memref<9x8x4xf32, #tpu.memory_space<vmem>>, vector<1x8x4xf32>
    %145 = vector.shape_cast %144 : vector<1x8x4xf32> to vector<8x4xf32>
    %cst_104 = arith.constant dense<0.000000e+00> : vector<8x256xf32>
    %146 = tpu.matmul %145, %143, %cst_104 {dimension_numbers = #tpu.dot_dimension_numbers<[1], [0], [0], [1], [0, 0, 1, 1], [], []>} : vector<8x4xf32>, vector<4x256xf32>, vector<8x256xf32> -> vector<8x256xf32>
    %147 = arith.addf %140, %146 : vector<8x256xf32>
    %c0_105 = arith.constant 0 : index
    %c0_106 = arith.constant 0 : index
    %c0_107 = arith.constant 0 : index
    %148 = vector.load %arg10[%c0_105, %c0_106, %c0_107] : memref<2x1x256xf32, #tpu.memory_space<vmem>>, vector<1x1x256xf32>
    %149 = vector.shape_cast %148 : vector<1x1x256xf32> to vector<1x256xf32>
    %150 = vector.broadcast %149 : vector<1x256xf32> to vector<8x256xf32>
    %151 = arith.addf %147, %150 : vector<8x256xf32>
    %c0_108 = arith.constant 0 : index
    %c0_109 = arith.constant 0 : index
    %152 = vector.load %arg9[%c0_108, %c0_109] : memref<8x1xf32, #tpu.memory_space<vmem>>, vector<8x1xf32>
    %153 = vector.broadcast %152 : vector<8x1xf32> to vector<8x256xf32>
    %154 = arith.addf %151, %153 : vector<8x256xf32>
    %cst_110 = arith.constant 2.000000e-01 : f32
    %155 = vector.broadcast %cst_110 : f32 to vector<8x256xf32>
    %156 = arith.mulf %155, %154 : vector<8x256xf32>
    %157 = arith.maximumf %154, %156 : vector<8x256xf32>
    %158 = vector.extract_strided_slice %20 {offsets = [0, 0], sizes = [8, 1], strides = [1, 1]} : vector<8x2xf32> to vector<8x1xf32>
    %159 = vector.broadcast %158 : vector<8x1xf32> to vector<8x256xf32>
    %160 = arith.mulf %157, %159 : vector<8x256xf32>
    %c0_111 = arith.constant 0 : index
    %c0_112 = arith.constant 0 : index
    %c17_113 = arith.constant 17 : index
    %161 = vector.load %arg23[%c0_111, %c0_112, %c17_113] : memref<2x8x290xf32, #tpu.memory_space<vmem>>, vector<1x8x256xf32>
    %162 = vector.shape_cast %161 : vector<1x8x256xf32> to vector<8x256xf32>
    %163 = vector.shape_cast %160 : vector<8x256xf32> to vector<1x8x256xf32>
    tpu.vector_store %arg23[%c0_111, %c0_112, %c17_113], %163 {strides = array<i32>} : memref<2x8x290xf32, #tpu.memory_space<vmem>>, vector<1x8x256xf32>,
    %c0_114 = arith.constant 0 : index
    %c0_115 = arith.constant 0 : index
    %c0_116 = arith.constant 0 : index
    %164 = vector.load %arg23[%c0_114, %c0_115, %c0_116] : memref<2x8x290xf32, #tpu.memory_space<vmem>>, vector<1x8x290xf32>
    %165 = vector.shape_cast %164 : vector<1x8x290xf32> to vector<8x290xf32>
    %cst_117 = arith.constant 0.000000e+00 : f32
    %166 = vector.broadcast %cst_117 : f32 to vector<8x256xf32>
    %167 = vector.extract_strided_slice %165 {offsets = [0, 0], sizes = [8, 256], strides = [1, 1]} : vector<8x290xf32> to vector<8x256xf32>
    %168 = vector.broadcast %35 : vector<1x256xf32> to vector<8x256xf32>
    %169 = arith.mulf %167, %168 : vector<8x256xf32>
    %c0_118 = arith.constant 0 : index
    %c0_119 = arith.constant 0 : index
    %c0_120 = arith.constant 0 : index
    %170 = vector.load %arg13[%c0_118, %c0_119, %c0_120] : memref<9x8x8xf32, #tpu.memory_space<vmem>>, vector<1x8x8xf32>
    %171 = vector.shape_cast %170 : vector<1x8x8xf32> to vector<8x8xf32>
    %cst_121 = arith.constant dense<0.000000e+00> : vector<8x256xf32>
    %172 = tpu.matmul %171, %169, %cst_121 {dimension_numbers = #tpu.dot_dimension_numbers<[1], [0], [0], [1], [0, 0, 1, 1], [], []>} : vector<8x8xf32>, vector<8x256xf32>, vector<8x256xf32> -> vector<8x256xf32>
    %173 = arith.addf %166, %172 : vector<8x256xf32>
    %174 = vector.extract_strided_slice %165 {offsets = [0, 1], sizes = [8, 256], strides = [1, 1]} : vector<8x290xf32> to vector<8x256xf32>
    %c1_122 = arith.constant 1 : index
    %c0_123 = arith.constant 0 : index
    %c0_124 = arith.constant 0 : index
    %175 = vector.load %arg13[%c1_122, %c0_123, %c0_124] : memref<9x8x8xf32, #tpu.memory_space<vmem>>, vector<1x8x8xf32>
    %176 = vector.shape_cast %175 : vector<1x8x8xf32> to vector<8x8xf32>
    %cst_125 = arith.constant dense<0.000000e+00> : vector<8x256xf32>
    %177 = tpu.matmul %176, %174, %cst_125 {dimension_numbers = #tpu.dot_dimension_numbers<[1], [0], [0], [1], [0, 0, 1, 1], [], []>} : vector<8x8xf32>, vector<8x256xf32>, vector<8x256xf32> -> vector<8x256xf32>
    %178 = arith.addf %173, %177 : vector<8x256xf32>
    %179 = vector.extract_strided_slice %165 {offsets = [0, 2], sizes = [8, 256], strides = [1, 1]} : vector<8x290xf32> to vector<8x256xf32>
    %180 = vector.broadcast %37 : vector<1x256xf32> to vector<8x256xf32>
    %181 = arith.mulf %179, %180 : vector<8x256xf32>
    %c2_126 = arith.constant 2 : index
    %c0_127 = arith.constant 0 : index
    %c0_128 = arith.constant 0 : index
    %182 = vector.load %arg13[%c2_126, %c0_127, %c0_128] : memref<9x8x8xf32, #tpu.memory_space<vmem>>, vector<1x8x8xf32>
    %183 = vector.shape_cast %182 : vector<1x8x8xf32> to vector<8x8xf32>
    %cst_129 = arith.constant dense<0.000000e+00> : vector<8x256xf32>
    %184 = tpu.matmul %183, %181, %cst_129 {dimension_numbers = #tpu.dot_dimension_numbers<[1], [0], [0], [1], [0, 0, 1, 1], [], []>} : vector<8x8xf32>, vector<8x256xf32>, vector<8x256xf32> -> vector<8x256xf32>
    %185 = arith.addf %178, %184 : vector<8x256xf32>
    %186 = vector.extract_strided_slice %165 {offsets = [0, 16], sizes = [8, 256], strides = [1, 1]} : vector<8x290xf32> to vector<8x256xf32>
    %187 = vector.broadcast %35 : vector<1x256xf32> to vector<8x256xf32>
    %188 = arith.mulf %186, %187 : vector<8x256xf32>
    %c3_130 = arith.constant 3 : index
    %c0_131 = arith.constant 0 : index
    %c0_132 = arith.constant 0 : index
    %189 = vector.load %arg13[%c3_130, %c0_131, %c0_132] : memref<9x8x8xf32, #tpu.memory_space<vmem>>, vector<1x8x8xf32>
    %190 = vector.shape_cast %189 : vector<1x8x8xf32> to vector<8x8xf32>
    %cst_133 = arith.constant dense<0.000000e+00> : vector<8x256xf32>
    %191 = tpu.matmul %190, %188, %cst_133 {dimension_numbers = #tpu.dot_dimension_numbers<[1], [0], [0], [1], [0, 0, 1, 1], [], []>} : vector<8x8xf32>, vector<8x256xf32>, vector<8x256xf32> -> vector<8x256xf32>
    %192 = arith.addf %185, %191 : vector<8x256xf32>
    %193 = vector.extract_strided_slice %165 {offsets = [0, 17], sizes = [8, 256], strides = [1, 1]} : vector<8x290xf32> to vector<8x256xf32>
    %c4_134 = arith.constant 4 : index
    %c0_135 = arith.constant 0 : index
    %c0_136 = arith.constant 0 : index
    %194 = vector.load %arg13[%c4_134, %c0_135, %c0_136] : memref<9x8x8xf32, #tpu.memory_space<vmem>>, vector<1x8x8xf32>
    %195 = vector.shape_cast %194 : vector<1x8x8xf32> to vector<8x8xf32>
    %cst_137 = arith.constant dense<0.000000e+00> : vector<8x256xf32>
    %196 = tpu.matmul %195, %193, %cst_137 {dimension_numbers = #tpu.dot_dimension_numbers<[1], [0], [0], [1], [0, 0, 1, 1], [], []>} : vector<8x8xf32>, vector<8x256xf32>, vector<8x256xf32> -> vector<8x256xf32>
    %197 = arith.addf %192, %196 : vector<8x256xf32>
    %198 = vector.extract_strided_slice %165 {offsets = [0, 18], sizes = [8, 256], strides = [1, 1]} : vector<8x290xf32> to vector<8x256xf32>
    %199 = vector.broadcast %37 : vector<1x256xf32> to vector<8x256xf32>
    %200 = arith.mulf %198, %199 : vector<8x256xf32>
    %c5_138 = arith.constant 5 : index
    %c0_139 = arith.constant 0 : index
    %c0_140 = arith.constant 0 : index
    %201 = vector.load %arg13[%c5_138, %c0_139, %c0_140] : memref<9x8x8xf32, #tpu.memory_space<vmem>>, vector<1x8x8xf32>
    %202 = vector.shape_cast %201 : vector<1x8x8xf32> to vector<8x8xf32>
    %cst_141 = arith.constant dense<0.000000e+00> : vector<8x256xf32>
    %203 = tpu.matmul %202, %200, %cst_141 {dimension_numbers = #tpu.dot_dimension_numbers<[1], [0], [0], [1], [0, 0, 1, 1], [], []>} : vector<8x8xf32>, vector<8x256xf32>, vector<8x256xf32> -> vector<8x256xf32>
    %204 = arith.addf %197, %203 : vector<8x256xf32>
    %205 = vector.extract_strided_slice %165 {offsets = [0, 32], sizes = [8, 256], strides = [1, 1]} : vector<8x290xf32> to vector<8x256xf32>
    %206 = vector.broadcast %35 : vector<1x256xf32> to vector<8x256xf32>
    %207 = arith.mulf %205, %206 : vector<8x256xf32>
    %c6_142 = arith.constant 6 : index
    %c0_143 = arith.constant 0 : index
    %c0_144 = arith.constant 0 : index
    %208 = vector.load %arg13[%c6_142, %c0_143, %c0_144] : memref<9x8x8xf32, #tpu.memory_space<vmem>>, vector<1x8x8xf32>
    %209 = vector.shape_cast %208 : vector<1x8x8xf32> to vector<8x8xf32>
    %cst_145 = arith.constant dense<0.000000e+00> : vector<8x256xf32>
    %210 = tpu.matmul %209, %207, %cst_145 {dimension_numbers = #tpu.dot_dimension_numbers<[1], [0], [0], [1], [0, 0, 1, 1], [], []>} : vector<8x8xf32>, vector<8x256xf32>, vector<8x256xf32> -> vector<8x256xf32>
    %211 = arith.addf %204, %210 : vector<8x256xf32>
    %212 = vector.extract_strided_slice %165 {offsets = [0, 33], sizes = [8, 256], strides = [1, 1]} : vector<8x290xf32> to vector<8x256xf32>
    %c7_146 = arith.constant 7 : index
    %c0_147 = arith.constant 0 : index
    %c0_148 = arith.constant 0 : index
    %213 = vector.load %arg13[%c7_146, %c0_147, %c0_148] : memref<9x8x8xf32, #tpu.memory_space<vmem>>, vector<1x8x8xf32>
    %214 = vector.shape_cast %213 : vector<1x8x8xf32> to vector<8x8xf32>
    %cst_149 = arith.constant dense<0.000000e+00> : vector<8x256xf32>
    %215 = tpu.matmul %214, %212, %cst_149 {dimension_numbers = #tpu.dot_dimension_numbers<[1], [0], [0], [1], [0, 0, 1, 1], [], []>} : vector<8x8xf32>, vector<8x256xf32>, vector<8x256xf32> -> vector<8x256xf32>
    %216 = arith.addf %211, %215 : vector<8x256xf32>
    %217 = vector.extract_strided_slice %165 {offsets = [0, 34], sizes = [8, 256], strides = [1, 1]} : vector<8x290xf32> to vector<8x256xf32>
    %218 = vector.broadcast %37 : vector<1x256xf32> to vector<8x256xf32>
    %219 = arith.mulf %217, %218 : vector<8x256xf32>
    %c8_150 = arith.constant 8 : index
    %c0_151 = arith.constant 0 : index
    %c0_152 = arith.constant 0 : index
    %220 = vector.load %arg13[%c8_150, %c0_151, %c0_152] : memref<9x8x8xf32, #tpu.memory_space<vmem>>, vector<1x8x8xf32>
    %221 = vector.shape_cast %220 : vector<1x8x8xf32> to vector<8x8xf32>
    %cst_153 = arith.constant dense<0.000000e+00> : vector<8x256xf32>
    %222 = tpu.matmul %221, %219, %cst_153 {dimension_numbers = #tpu.dot_dimension_numbers<[1], [0], [0], [1], [0, 0, 1, 1], [], []>} : vector<8x8xf32>, vector<8x256xf32>, vector<8x256xf32> -> vector<8x256xf32>
    %223 = arith.addf %216, %222 : vector<8x256xf32>
    %c0_154 = arith.constant 0 : index
    %c0_155 = arith.constant 0 : index
    %c0_156 = arith.constant 0 : index
    %224 = vector.load %arg15[%c0_154, %c0_155, %c0_156] : memref<2x1x256xf32, #tpu.memory_space<vmem>>, vector<1x1x256xf32>
    %225 = vector.shape_cast %224 : vector<1x1x256xf32> to vector<1x256xf32>
    %226 = vector.broadcast %225 : vector<1x256xf32> to vector<8x256xf32>
    %227 = arith.addf %223, %226 : vector<8x256xf32>
    %c0_157 = arith.constant 0 : index
    %c0_158 = arith.constant 0 : index
    %228 = vector.load %arg14[%c0_157, %c0_158] : memref<8x1xf32, #tpu.memory_space<vmem>>, vector<8x1xf32>
    %229 = vector.broadcast %228 : vector<8x1xf32> to vector<8x256xf32>
    %230 = arith.addf %227, %229 : vector<8x256xf32>
    %cst_159 = arith.constant 2.000000e-01 : f32
    %231 = vector.broadcast %cst_159 : f32 to vector<8x256xf32>
    %232 = arith.mulf %231, %230 : vector<8x256xf32>
    %233 = arith.maximumf %230, %232 : vector<8x256xf32>
    %c0_160 = arith.constant 0 : index
    %c0_161 = arith.constant 0 : index
    %c0_162 = arith.constant 0 : index
    %234 = vector.load %arg20[%c0_160, %c0_161, %c0_162] : memref<2x8x256xf32, #tpu.memory_space<vmem>>, vector<1x8x256xf32>
    %235 = vector.shape_cast %234 : vector<1x8x256xf32> to vector<8x256xf32>
    %236 = vector.shape_cast %233 : vector<8x256xf32> to vector<1x8x256xf32>
    tpu.vector_store %arg20[%c0_160, %c0_161, %c0_162], %236 {strides = array<i32>} : memref<2x8x256xf32, #tpu.memory_space<vmem>>, vector<1x8x256xf32>,
    %237 = vector.extract_strided_slice %25 {offsets = [0, 0], sizes = [8, 1], strides = [1, 1]} : vector<8x2xf32> to vector<8x1xf32>
    %238 = vector.broadcast %237 : vector<8x1xf32> to vector<8x256xf32>
    %239 = arith.mulf %233, %238 : vector<8x256xf32>
    %c0_163 = arith.constant 0 : index
    %c0_164 = arith.constant 0 : index
    %240 = vector.load %arg18[%c0_163, %c0_164] : memref<12x8xf32, #tpu.memory_space<vmem>>, vector<12x8xf32>
    %cst_165 = arith.constant dense<0.000000e+00> : vector<12x256xf32>
    %241 = tpu.matmul %240, %239, %cst_165 {dimension_numbers = #tpu.dot_dimension_numbers<[1], [0], [0], [1], [0, 0, 1, 1], [], []>} : vector<12x8xf32>, vector<8x256xf32>, vector<12x256xf32> -> vector<12x256xf32>
    %c0_166 = arith.constant 0 : index
    %c0_167 = arith.constant 0 : index
    %242 = vector.load %arg19[%c0_166, %c0_167] : memref<12x1xf32, #tpu.memory_space<vmem>>, vector<12x1xf32>
    %243 = vector.broadcast %242 : vector<12x1xf32> to vector<12x256xf32>
    %244 = arith.addf %241, %243 : vector<12x256xf32>
    %c0_168 = arith.constant 0 : index
    %c0_169 = arith.constant 0 : index
    %c0_170 = arith.constant 0 : index
    %245 = vector.load %arg21[%c0_168, %c0_169, %c0_170] : memref<2x12x256xf32, #tpu.memory_space<vmem>>, vector<1x12x256xf32>
    %246 = vector.shape_cast %245 : vector<1x12x256xf32> to vector<12x256xf32>
    %247 = vector.shape_cast %244 : vector<12x256xf32> to vector<1x12x256xf32>
    tpu.vector_store %arg21[%c0_168, %c0_169, %c0_170], %247 {strides = array<i32>} : memref<2x12x256xf32, #tpu.memory_space<vmem>>, vector<1x12x256xf32>,
    %c1_171 = arith.constant 1 : index
    %c0_172 = arith.constant 0 : index
    %c0_173 = arith.constant 0 : index
    %248 = vector.load %arg0[%c1_171, %c0_172, %c0_173] : memref<2x16x64xf32, #tpu.memory_space<vmem>>, vector<1x16x64xf32>
    %249 = vector.shape_cast %248 : vector<1x16x64xf32> to vector<16x64xf32>
    %250 = vector.extract_strided_slice %10 {offsets = [0, 1], sizes = [16, 1], strides = [1, 1]} : vector<16x2xf32> to vector<16x1xf32>
    %251 = vector.broadcast %250 : vector<16x1xf32> to vector<16x64xf32>
    %252 = arith.mulf %249, %251 : vector<16x64xf32>
    %253 = vector.extract_strided_slice %252 {offsets = [0, 0], sizes = [4, 64], strides = [1, 1]} : vector<16x64xf32> to vector<4x64xf32>
    %254 = vector.extract_strided_slice %252 {offsets = [4, 0], sizes = [4, 64], strides = [1, 1]} : vector<16x64xf32> to vector<4x64xf32>
    %255 = vector.extract_strided_slice %252 {offsets = [8, 0], sizes = [4, 64], strides = [1, 1]} : vector<16x64xf32> to vector<4x64xf32>
    %256 = vector.extract_strided_slice %252 {offsets = [12, 0], sizes = [4, 64], strides = [1, 1]} : vector<16x64xf32> to vector<4x64xf32>
    %257 = arith.addf %253, %254 : vector<4x64xf32>
    %258 = arith.addf %257, %255 : vector<4x64xf32>
    %259 = arith.addf %258, %256 : vector<4x64xf32>
    %cst_174 = arith.constant 5.000000e-01 : f32
    %260 = vector.broadcast %cst_174 : f32 to vector<4x64xf32>
    %261 = arith.mulf %259, %260 : vector<4x64xf32>
    %262 = arith.addf %253, %254 : vector<4x64xf32>
    %263 = arith.subf %262, %255 : vector<4x64xf32>
    %264 = arith.subf %263, %256 : vector<4x64xf32>
    %cst_175 = arith.constant 5.000000e-01 : f32
    %265 = vector.broadcast %cst_175 : f32 to vector<4x64xf32>
    %266 = arith.mulf %264, %265 : vector<4x64xf32>
    %267 = arith.subf %253, %254 : vector<4x64xf32>
    %268 = arith.addf %267, %255 : vector<4x64xf32>
    %269 = arith.subf %268, %256 : vector<4x64xf32>
    %cst_176 = arith.constant 5.000000e-01 : f32
    %270 = vector.broadcast %cst_176 : f32 to vector<4x64xf32>
    %271 = arith.mulf %269, %270 : vector<4x64xf32>
    %272 = arith.subf %253, %254 : vector<4x64xf32>
    %273 = arith.subf %272, %255 : vector<4x64xf32>
    %274 = arith.addf %273, %256 : vector<4x64xf32>
    %cst_177 = arith.constant 5.000000e-01 : f32
    %275 = vector.broadcast %cst_177 : f32 to vector<4x64xf32>
    %276 = arith.mulf %274, %275 : vector<4x64xf32>
    %c0_178 = arith.constant 0 : index
    %c0_179 = arith.constant 0 : index
    %c0_180 = arith.constant 0 : index
    %277 = vector.load %arg2[%c0_178, %c0_179, %c0_180] : memref<4x64x256xf32, #tpu.memory_space<vmem>>, vector<1x64x256xf32>
    %278 = vector.shape_cast %277 : vector<1x64x256xf32> to vector<64x256xf32>
    %cst_181 = arith.constant dense<0.000000e+00> : vector<4x256xf32>
    %279 = tpu.matmul %261, %278, %cst_181 {dimension_numbers = #tpu.dot_dimension_numbers<[1], [0], [0], [1], [0, 0, 1, 1], [], []>} : vector<4x64xf32>, vector<64x256xf32>, vector<4x256xf32> -> vector<4x256xf32>
    %c1_182 = arith.constant 1 : index
    %c0_183 = arith.constant 0 : index
    %c0_184 = arith.constant 0 : index
    %280 = vector.load %arg2[%c1_182, %c0_183, %c0_184] : memref<4x64x256xf32, #tpu.memory_space<vmem>>, vector<1x64x256xf32>
    %281 = vector.shape_cast %280 : vector<1x64x256xf32> to vector<64x256xf32>
    %cst_185 = arith.constant dense<0.000000e+00> : vector<4x256xf32>
    %282 = tpu.matmul %266, %281, %cst_185 {dimension_numbers = #tpu.dot_dimension_numbers<[1], [0], [0], [1], [0, 0, 1, 1], [], []>} : vector<4x64xf32>, vector<64x256xf32>, vector<4x256xf32> -> vector<4x256xf32>
    %283 = arith.addf %279, %282 : vector<4x256xf32>
    %c2_186 = arith.constant 2 : index
    %c0_187 = arith.constant 0 : index
    %c0_188 = arith.constant 0 : index
    %284 = vector.load %arg2[%c2_186, %c0_187, %c0_188] : memref<4x64x256xf32, #tpu.memory_space<vmem>>, vector<1x64x256xf32>
    %285 = vector.shape_cast %284 : vector<1x64x256xf32> to vector<64x256xf32>
    %cst_189 = arith.constant dense<0.000000e+00> : vector<4x256xf32>
    %286 = tpu.matmul %271, %285, %cst_189 {dimension_numbers = #tpu.dot_dimension_numbers<[1], [0], [0], [1], [0, 0, 1, 1], [], []>} : vector<4x64xf32>, vector<64x256xf32>, vector<4x256xf32> -> vector<4x256xf32>
    %287 = arith.addf %283, %286 : vector<4x256xf32>
    %c3_190 = arith.constant 3 : index
    %c0_191 = arith.constant 0 : index
    %c0_192 = arith.constant 0 : index
    %288 = vector.load %arg2[%c3_190, %c0_191, %c0_192] : memref<4x64x256xf32, #tpu.memory_space<vmem>>, vector<1x64x256xf32>
    %289 = vector.shape_cast %288 : vector<1x64x256xf32> to vector<64x256xf32>
    %cst_193 = arith.constant dense<0.000000e+00> : vector<4x256xf32>
    %290 = tpu.matmul %276, %289, %cst_193 {dimension_numbers = #tpu.dot_dimension_numbers<[1], [0], [0], [1], [0, 0, 1, 1], [], []>} : vector<4x64xf32>, vector<64x256xf32>, vector<4x256xf32> -> vector<4x256xf32>
    %291 = arith.addf %287, %290 : vector<4x256xf32>
    %292 = vector.extract_strided_slice %15 {offsets = [0, 1], sizes = [4, 1], strides = [1, 1]} : vector<4x2xf32> to vector<4x1xf32>
    %293 = vector.broadcast %292 : vector<4x1xf32> to vector<4x256xf32>
    %294 = arith.mulf %291, %293 : vector<4x256xf32>
    %c1_194 = arith.constant 1 : index
    %c0_195 = arith.constant 0 : index
    %c17_196 = arith.constant 17 : index
    %295 = vector.load %arg22[%c1_194, %c0_195, %c17_196] : memref<2x4x290xf32, #tpu.memory_space<vmem>>, vector<1x4x256xf32>
    %296 = vector.shape_cast %295 : vector<1x4x256xf32> to vector<4x256xf32>
    %297 = vector.shape_cast %294 : vector<4x256xf32> to vector<1x4x256xf32>
    tpu.vector_store %arg22[%c1_194, %c0_195, %c17_196], %297 {strides = array<i32>} : memref<2x4x290xf32, #tpu.memory_space<vmem>>, vector<1x4x256xf32>,
    %c1_197 = arith.constant 1 : index
    %c0_198 = arith.constant 0 : index
    %c0_199 = arith.constant 0 : index
    %298 = vector.load %arg22[%c1_197, %c0_198, %c0_199] : memref<2x4x290xf32, #tpu.memory_space<vmem>>, vector<1x4x290xf32>
    %299 = vector.shape_cast %298 : vector<1x4x290xf32> to vector<4x290xf32>
    %cst_200 = arith.constant 0.000000e+00 : f32
    %300 = vector.broadcast %cst_200 : f32 to vector<8x256xf32>
    %301 = vector.extract_strided_slice %299 {offsets = [0, 0], sizes = [4, 256], strides = [1, 1]} : vector<4x290xf32> to vector<4x256xf32>
    %302 = vector.broadcast %35 : vector<1x256xf32> to vector<4x256xf32>
    %303 = arith.mulf %301, %302 : vector<4x256xf32>
    %c0_201 = arith.constant 0 : index
    %c0_202 = arith.constant 0 : index
    %c0_203 = arith.constant 0 : index
    %304 = vector.load %arg8[%c0_201, %c0_202, %c0_203] : memref<9x8x4xf32, #tpu.memory_space<vmem>>, vector<1x8x4xf32>
    %305 = vector.shape_cast %304 : vector<1x8x4xf32> to vector<8x4xf32>
    %cst_204 = arith.constant dense<0.000000e+00> : vector<8x256xf32>
    %306 = tpu.matmul %305, %303, %cst_204 {dimension_numbers = #tpu.dot_dimension_numbers<[1], [0], [0], [1], [0, 0, 1, 1], [], []>} : vector<8x4xf32>, vector<4x256xf32>, vector<8x256xf32> -> vector<8x256xf32>
    %307 = arith.addf %300, %306 : vector<8x256xf32>
    %308 = vector.extract_strided_slice %299 {offsets = [0, 1], sizes = [4, 256], strides = [1, 1]} : vector<4x290xf32> to vector<4x256xf32>
    %c1_205 = arith.constant 1 : index
    %c0_206 = arith.constant 0 : index
    %c0_207 = arith.constant 0 : index
    %309 = vector.load %arg8[%c1_205, %c0_206, %c0_207] : memref<9x8x4xf32, #tpu.memory_space<vmem>>, vector<1x8x4xf32>
    %310 = vector.shape_cast %309 : vector<1x8x4xf32> to vector<8x4xf32>
    %cst_208 = arith.constant dense<0.000000e+00> : vector<8x256xf32>
    %311 = tpu.matmul %310, %308, %cst_208 {dimension_numbers = #tpu.dot_dimension_numbers<[1], [0], [0], [1], [0, 0, 1, 1], [], []>} : vector<8x4xf32>, vector<4x256xf32>, vector<8x256xf32> -> vector<8x256xf32>
    %312 = arith.addf %307, %311 : vector<8x256xf32>
    %313 = vector.extract_strided_slice %299 {offsets = [0, 2], sizes = [4, 256], strides = [1, 1]} : vector<4x290xf32> to vector<4x256xf32>
    %314 = vector.broadcast %37 : vector<1x256xf32> to vector<4x256xf32>
    %315 = arith.mulf %313, %314 : vector<4x256xf32>
    %c2_209 = arith.constant 2 : index
    %c0_210 = arith.constant 0 : index
    %c0_211 = arith.constant 0 : index
    %316 = vector.load %arg8[%c2_209, %c0_210, %c0_211] : memref<9x8x4xf32, #tpu.memory_space<vmem>>, vector<1x8x4xf32>
    %317 = vector.shape_cast %316 : vector<1x8x4xf32> to vector<8x4xf32>
    %cst_212 = arith.constant dense<0.000000e+00> : vector<8x256xf32>
    %318 = tpu.matmul %317, %315, %cst_212 {dimension_numbers = #tpu.dot_dimension_numbers<[1], [0], [0], [1], [0, 0, 1, 1], [], []>} : vector<8x4xf32>, vector<4x256xf32>, vector<8x256xf32> -> vector<8x256xf32>
    %319 = arith.addf %312, %318 : vector<8x256xf32>
    %320 = vector.extract_strided_slice %299 {offsets = [0, 16], sizes = [4, 256], strides = [1, 1]} : vector<4x290xf32> to vector<4x256xf32>
    %321 = vector.broadcast %35 : vector<1x256xf32> to vector<4x256xf32>
    %322 = arith.mulf %320, %321 : vector<4x256xf32>
    %c3_213 = arith.constant 3 : index
    %c0_214 = arith.constant 0 : index
    %c0_215 = arith.constant 0 : index
    %323 = vector.load %arg8[%c3_213, %c0_214, %c0_215] : memref<9x8x4xf32, #tpu.memory_space<vmem>>, vector<1x8x4xf32>
    %324 = vector.shape_cast %323 : vector<1x8x4xf32> to vector<8x4xf32>
    %cst_216 = arith.constant dense<0.000000e+00> : vector<8x256xf32>
    %325 = tpu.matmul %324, %322, %cst_216 {dimension_numbers = #tpu.dot_dimension_numbers<[1], [0], [0], [1], [0, 0, 1, 1], [], []>} : vector<8x4xf32>, vector<4x256xf32>, vector<8x256xf32> -> vector<8x256xf32>
    %326 = arith.addf %319, %325 : vector<8x256xf32>
    %327 = vector.extract_strided_slice %299 {offsets = [0, 17], sizes = [4, 256], strides = [1, 1]} : vector<4x290xf32> to vector<4x256xf32>
    %c4_217 = arith.constant 4 : index
    %c0_218 = arith.constant 0 : index
    %c0_219 = arith.constant 0 : index
    %328 = vector.load %arg8[%c4_217, %c0_218, %c0_219] : memref<9x8x4xf32, #tpu.memory_space<vmem>>, vector<1x8x4xf32>
    %329 = vector.shape_cast %328 : vector<1x8x4xf32> to vector<8x4xf32>
    %cst_220 = arith.constant dense<0.000000e+00> : vector<8x256xf32>
    %330 = tpu.matmul %329, %327, %cst_220 {dimension_numbers = #tpu.dot_dimension_numbers<[1], [0], [0], [1], [0, 0, 1, 1], [], []>} : vector<8x4xf32>, vector<4x256xf32>, vector<8x256xf32> -> vector<8x256xf32>
    %331 = arith.addf %326, %330 : vector<8x256xf32>
    %332 = vector.extract_strided_slice %299 {offsets = [0, 18], sizes = [4, 256], strides = [1, 1]} : vector<4x290xf32> to vector<4x256xf32>
    %333 = vector.broadcast %37 : vector<1x256xf32> to vector<4x256xf32>
    %334 = arith.mulf %332, %333 : vector<4x256xf32>
    %c5_221 = arith.constant 5 : index
    %c0_222 = arith.constant 0 : index
    %c0_223 = arith.constant 0 : index
    %335 = vector.load %arg8[%c5_221, %c0_222, %c0_223] : memref<9x8x4xf32, #tpu.memory_space<vmem>>, vector<1x8x4xf32>
    %336 = vector.shape_cast %335 : vector<1x8x4xf32> to vector<8x4xf32>
    %cst_224 = arith.constant dense<0.000000e+00> : vector<8x256xf32>
    %337 = tpu.matmul %336, %334, %cst_224 {dimension_numbers = #tpu.dot_dimension_numbers<[1], [0], [0], [1], [0, 0, 1, 1], [], []>} : vector<8x4xf32>, vector<4x256xf32>, vector<8x256xf32> -> vector<8x256xf32>
    %338 = arith.addf %331, %337 : vector<8x256xf32>
    %339 = vector.extract_strided_slice %299 {offsets = [0, 32], sizes = [4, 256], strides = [1, 1]} : vector<4x290xf32> to vector<4x256xf32>
    %340 = vector.broadcast %35 : vector<1x256xf32> to vector<4x256xf32>
    %341 = arith.mulf %339, %340 : vector<4x256xf32>
    %c6_225 = arith.constant 6 : index
    %c0_226 = arith.constant 0 : index
    %c0_227 = arith.constant 0 : index
    %342 = vector.load %arg8[%c6_225, %c0_226, %c0_227] : memref<9x8x4xf32, #tpu.memory_space<vmem>>, vector<1x8x4xf32>
    %343 = vector.shape_cast %342 : vector<1x8x4xf32> to vector<8x4xf32>
    %cst_228 = arith.constant dense<0.000000e+00> : vector<8x256xf32>
    %344 = tpu.matmul %343, %341, %cst_228 {dimension_numbers = #tpu.dot_dimension_numbers<[1], [0], [0], [1], [0, 0, 1, 1], [], []>} : vector<8x4xf32>, vector<4x256xf32>, vector<8x256xf32> -> vector<8x256xf32>
    %345 = arith.addf %338, %344 : vector<8x256xf32>
    %346 = vector.extract_strided_slice %299 {offsets = [0, 33], sizes = [4, 256], strides = [1, 1]} : vector<4x290xf32> to vector<4x256xf32>
    %c7_229 = arith.constant 7 : index
    %c0_230 = arith.constant 0 : index
    %c0_231 = arith.constant 0 : index
    %347 = vector.load %arg8[%c7_229, %c0_230, %c0_231] : memref<9x8x4xf32, #tpu.memory_space<vmem>>, vector<1x8x4xf32>
    %348 = vector.shape_cast %347 : vector<1x8x4xf32> to vector<8x4xf32>
    %cst_232 = arith.constant dense<0.000000e+00> : vector<8x256xf32>
    %349 = tpu.matmul %348, %346, %cst_232 {dimension_numbers = #tpu.dot_dimension_numbers<[1], [0], [0], [1], [0, 0, 1, 1], [], []>} : vector<8x4xf32>, vector<4x256xf32>, vector<8x256xf32> -> vector<8x256xf32>
    %350 = arith.addf %345, %349 : vector<8x256xf32>
    %351 = vector.extract_strided_slice %299 {offsets = [0, 34], sizes = [4, 256], strides = [1, 1]} : vector<4x290xf32> to vector<4x256xf32>
    %352 = vector.broadcast %37 : vector<1x256xf32> to vector<4x256xf32>
    %353 = arith.mulf %351, %352 : vector<4x256xf32>
    %c8_233 = arith.constant 8 : index
    %c0_234 = arith.constant 0 : index
    %c0_235 = arith.constant 0 : index
    %354 = vector.load %arg8[%c8_233, %c0_234, %c0_235] : memref<9x8x4xf32, #tpu.memory_space<vmem>>, vector<1x8x4xf32>
    %355 = vector.shape_cast %354 : vector<1x8x4xf32> to vector<8x4xf32>
    %cst_236 = arith.constant dense<0.000000e+00> : vector<8x256xf32>
    %356 = tpu.matmul %355, %353, %cst_236 {dimension_numbers = #tpu.dot_dimension_numbers<[1], [0], [0], [1], [0, 0, 1, 1], [], []>} : vector<8x4xf32>, vector<4x256xf32>, vector<8x256xf32> -> vector<8x256xf32>
    %357 = arith.addf %350, %356 : vector<8x256xf32>
    %c1_237 = arith.constant 1 : index
    %c0_238 = arith.constant 0 : index
    %c0_239 = arith.constant 0 : index
    %358 = vector.load %arg10[%c1_237, %c0_238, %c0_239] : memref<2x1x256xf32, #tpu.memory_space<vmem>>, vector<1x1x256xf32>
    %359 = vector.shape_cast %358 : vector<1x1x256xf32> to vector<1x256xf32>
    %360 = vector.broadcast %359 : vector<1x256xf32> to vector<8x256xf32>
    %361 = arith.addf %357, %360 : vector<8x256xf32>
    %c0_240 = arith.constant 0 : index
    %c0_241 = arith.constant 0 : index
    %362 = vector.load %arg9[%c0_240, %c0_241] : memref<8x1xf32, #tpu.memory_space<vmem>>, vector<8x1xf32>
    %363 = vector.broadcast %362 : vector<8x1xf32> to vector<8x256xf32>
    %364 = arith.addf %361, %363 : vector<8x256xf32>
    %cst_242 = arith.constant 2.000000e-01 : f32
    %365 = vector.broadcast %cst_242 : f32 to vector<8x256xf32>
    %366 = arith.mulf %365, %364 : vector<8x256xf32>
    %367 = arith.maximumf %364, %366 : vector<8x256xf32>
    %368 = vector.extract_strided_slice %20 {offsets = [0, 1], sizes = [8, 1], strides = [1, 1]} : vector<8x2xf32> to vector<8x1xf32>
    %369 = vector.broadcast %368 : vector<8x1xf32> to vector<8x256xf32>
    %370 = arith.mulf %367, %369 : vector<8x256xf32>
    %c1_243 = arith.constant 1 : index
    %c0_244 = arith.constant 0 : index
    %c17_245 = arith.constant 17 : index
    %371 = vector.load %arg23[%c1_243, %c0_244, %c17_245] : memref<2x8x290xf32, #tpu.memory_space<vmem>>, vector<1x8x256xf32>
    %372 = vector.shape_cast %371 : vector<1x8x256xf32> to vector<8x256xf32>
    %373 = vector.shape_cast %370 : vector<8x256xf32> to vector<1x8x256xf32>
    tpu.vector_store %arg23[%c1_243, %c0_244, %c17_245], %373 {strides = array<i32>} : memref<2x8x290xf32, #tpu.memory_space<vmem>>, vector<1x8x256xf32>,
    %c1_246 = arith.constant 1 : index
    %c0_247 = arith.constant 0 : index
    %c0_248 = arith.constant 0 : index
    %374 = vector.load %arg23[%c1_246, %c0_247, %c0_248] : memref<2x8x290xf32, #tpu.memory_space<vmem>>, vector<1x8x290xf32>
    %375 = vector.shape_cast %374 : vector<1x8x290xf32> to vector<8x290xf32>
    %cst_249 = arith.constant 0.000000e+00 : f32
    %376 = vector.broadcast %cst_249 : f32 to vector<8x256xf32>
    %377 = vector.extract_strided_slice %375 {offsets = [0, 0], sizes = [8, 256], strides = [1, 1]} : vector<8x290xf32> to vector<8x256xf32>
    %378 = vector.broadcast %35 : vector<1x256xf32> to vector<8x256xf32>
    %379 = arith.mulf %377, %378 : vector<8x256xf32>
    %c0_250 = arith.constant 0 : index
    %c0_251 = arith.constant 0 : index
    %c0_252 = arith.constant 0 : index
    %380 = vector.load %arg13[%c0_250, %c0_251, %c0_252] : memref<9x8x8xf32, #tpu.memory_space<vmem>>, vector<1x8x8xf32>
    %381 = vector.shape_cast %380 : vector<1x8x8xf32> to vector<8x8xf32>
    %cst_253 = arith.constant dense<0.000000e+00> : vector<8x256xf32>
    %382 = tpu.matmul %381, %379, %cst_253 {dimension_numbers = #tpu.dot_dimension_numbers<[1], [0], [0], [1], [0, 0, 1, 1], [], []>} : vector<8x8xf32>, vector<8x256xf32>, vector<8x256xf32> -> vector<8x256xf32>
    %383 = arith.addf %376, %382 : vector<8x256xf32>
    %384 = vector.extract_strided_slice %375 {offsets = [0, 1], sizes = [8, 256], strides = [1, 1]} : vector<8x290xf32> to vector<8x256xf32>
    %c1_254 = arith.constant 1 : index
    %c0_255 = arith.constant 0 : index
    %c0_256 = arith.constant 0 : index
    %385 = vector.load %arg13[%c1_254, %c0_255, %c0_256] : memref<9x8x8xf32, #tpu.memory_space<vmem>>, vector<1x8x8xf32>
    %386 = vector.shape_cast %385 : vector<1x8x8xf32> to vector<8x8xf32>
    %cst_257 = arith.constant dense<0.000000e+00> : vector<8x256xf32>
    %387 = tpu.matmul %386, %384, %cst_257 {dimension_numbers = #tpu.dot_dimension_numbers<[1], [0], [0], [1], [0, 0, 1, 1], [], []>} : vector<8x8xf32>, vector<8x256xf32>, vector<8x256xf32> -> vector<8x256xf32>
    %388 = arith.addf %383, %387 : vector<8x256xf32>
    %389 = vector.extract_strided_slice %375 {offsets = [0, 2], sizes = [8, 256], strides = [1, 1]} : vector<8x290xf32> to vector<8x256xf32>
    %390 = vector.broadcast %37 : vector<1x256xf32> to vector<8x256xf32>
    %391 = arith.mulf %389, %390 : vector<8x256xf32>
    %c2_258 = arith.constant 2 : index
    %c0_259 = arith.constant 0 : index
    %c0_260 = arith.constant 0 : index
    %392 = vector.load %arg13[%c2_258, %c0_259, %c0_260] : memref<9x8x8xf32, #tpu.memory_space<vmem>>, vector<1x8x8xf32>
    %393 = vector.shape_cast %392 : vector<1x8x8xf32> to vector<8x8xf32>
    %cst_261 = arith.constant dense<0.000000e+00> : vector<8x256xf32>
    %394 = tpu.matmul %393, %391, %cst_261 {dimension_numbers = #tpu.dot_dimension_numbers<[1], [0], [0], [1], [0, 0, 1, 1], [], []>} : vector<8x8xf32>, vector<8x256xf32>, vector<8x256xf32> -> vector<8x256xf32>
    %395 = arith.addf %388, %394 : vector<8x256xf32>
    %396 = vector.extract_strided_slice %375 {offsets = [0, 16], sizes = [8, 256], strides = [1, 1]} : vector<8x290xf32> to vector<8x256xf32>
    %397 = vector.broadcast %35 : vector<1x256xf32> to vector<8x256xf32>
    %398 = arith.mulf %396, %397 : vector<8x256xf32>
    %c3_262 = arith.constant 3 : index
    %c0_263 = arith.constant 0 : index
    %c0_264 = arith.constant 0 : index
    %399 = vector.load %arg13[%c3_262, %c0_263, %c0_264] : memref<9x8x8xf32, #tpu.memory_space<vmem>>, vector<1x8x8xf32>
    %400 = vector.shape_cast %399 : vector<1x8x8xf32> to vector<8x8xf32>
    %cst_265 = arith.constant dense<0.000000e+00> : vector<8x256xf32>
    %401 = tpu.matmul %400, %398, %cst_265 {dimension_numbers = #tpu.dot_dimension_numbers<[1], [0], [0], [1], [0, 0, 1, 1], [], []>} : vector<8x8xf32>, vector<8x256xf32>, vector<8x256xf32> -> vector<8x256xf32>
    %402 = arith.addf %395, %401 : vector<8x256xf32>
    %403 = vector.extract_strided_slice %375 {offsets = [0, 17], sizes = [8, 256], strides = [1, 1]} : vector<8x290xf32> to vector<8x256xf32>
    %c4_266 = arith.constant 4 : index
    %c0_267 = arith.constant 0 : index
    %c0_268 = arith.constant 0 : index
    %404 = vector.load %arg13[%c4_266, %c0_267, %c0_268] : memref<9x8x8xf32, #tpu.memory_space<vmem>>, vector<1x8x8xf32>
    %405 = vector.shape_cast %404 : vector<1x8x8xf32> to vector<8x8xf32>
    %cst_269 = arith.constant dense<0.000000e+00> : vector<8x256xf32>
    %406 = tpu.matmul %405, %403, %cst_269 {dimension_numbers = #tpu.dot_dimension_numbers<[1], [0], [0], [1], [0, 0, 1, 1], [], []>} : vector<8x8xf32>, vector<8x256xf32>, vector<8x256xf32> -> vector<8x256xf32>
    %407 = arith.addf %402, %406 : vector<8x256xf32>
    %408 = vector.extract_strided_slice %375 {offsets = [0, 18], sizes = [8, 256], strides = [1, 1]} : vector<8x290xf32> to vector<8x256xf32>
    %409 = vector.broadcast %37 : vector<1x256xf32> to vector<8x256xf32>
    %410 = arith.mulf %408, %409 : vector<8x256xf32>
    %c5_270 = arith.constant 5 : index
    %c0_271 = arith.constant 0 : index
    %c0_272 = arith.constant 0 : index
    %411 = vector.load %arg13[%c5_270, %c0_271, %c0_272] : memref<9x8x8xf32, #tpu.memory_space<vmem>>, vector<1x8x8xf32>
    %412 = vector.shape_cast %411 : vector<1x8x8xf32> to vector<8x8xf32>
    %cst_273 = arith.constant dense<0.000000e+00> : vector<8x256xf32>
    %413 = tpu.matmul %412, %410, %cst_273 {dimension_numbers = #tpu.dot_dimension_numbers<[1], [0], [0], [1], [0, 0, 1, 1], [], []>} : vector<8x8xf32>, vector<8x256xf32>, vector<8x256xf32> -> vector<8x256xf32>
    %414 = arith.addf %407, %413 : vector<8x256xf32>
    %415 = vector.extract_strided_slice %375 {offsets = [0, 32], sizes = [8, 256], strides = [1, 1]} : vector<8x290xf32> to vector<8x256xf32>
    %416 = vector.broadcast %35 : vector<1x256xf32> to vector<8x256xf32>
    %417 = arith.mulf %415, %416 : vector<8x256xf32>
    %c6_274 = arith.constant 6 : index
    %c0_275 = arith.constant 0 : index
    %c0_276 = arith.constant 0 : index
    %418 = vector.load %arg13[%c6_274, %c0_275, %c0_276] : memref<9x8x8xf32, #tpu.memory_space<vmem>>, vector<1x8x8xf32>
    %419 = vector.shape_cast %418 : vector<1x8x8xf32> to vector<8x8xf32>
    %cst_277 = arith.constant dense<0.000000e+00> : vector<8x256xf32>
    %420 = tpu.matmul %419, %417, %cst_277 {dimension_numbers = #tpu.dot_dimension_numbers<[1], [0], [0], [1], [0, 0, 1, 1], [], []>} : vector<8x8xf32>, vector<8x256xf32>, vector<8x256xf32> -> vector<8x256xf32>
    %421 = arith.addf %414, %420 : vector<8x256xf32>
    %422 = vector.extract_strided_slice %375 {offsets = [0, 33], sizes = [8, 256], strides = [1, 1]} : vector<8x290xf32> to vector<8x256xf32>
    %c7_278 = arith.constant 7 : index
    %c0_279 = arith.constant 0 : index
    %c0_280 = arith.constant 0 : index
    %423 = vector.load %arg13[%c7_278, %c0_279, %c0_280] : memref<9x8x8xf32, #tpu.memory_space<vmem>>, vector<1x8x8xf32>
    %424 = vector.shape_cast %423 : vector<1x8x8xf32> to vector<8x8xf32>
    %cst_281 = arith.constant dense<0.000000e+00> : vector<8x256xf32>
    %425 = tpu.matmul %424, %422, %cst_281 {dimension_numbers = #tpu.dot_dimension_numbers<[1], [0], [0], [1], [0, 0, 1, 1], [], []>} : vector<8x8xf32>, vector<8x256xf32>, vector<8x256xf32> -> vector<8x256xf32>
    %426 = arith.addf %421, %425 : vector<8x256xf32>
    %427 = vector.extract_strided_slice %375 {offsets = [0, 34], sizes = [8, 256], strides = [1, 1]} : vector<8x290xf32> to vector<8x256xf32>
    %428 = vector.broadcast %37 : vector<1x256xf32> to vector<8x256xf32>
    %429 = arith.mulf %427, %428 : vector<8x256xf32>
    %c8_282 = arith.constant 8 : index
    %c0_283 = arith.constant 0 : index
    %c0_284 = arith.constant 0 : index
    %430 = vector.load %arg13[%c8_282, %c0_283, %c0_284] : memref<9x8x8xf32, #tpu.memory_space<vmem>>, vector<1x8x8xf32>
    %431 = vector.shape_cast %430 : vector<1x8x8xf32> to vector<8x8xf32>
    %cst_285 = arith.constant dense<0.000000e+00> : vector<8x256xf32>
    %432 = tpu.matmul %431, %429, %cst_285 {dimension_numbers = #tpu.dot_dimension_numbers<[1], [0], [0], [1], [0, 0, 1, 1], [], []>} : vector<8x8xf32>, vector<8x256xf32>, vector<8x256xf32> -> vector<8x256xf32>
    %433 = arith.addf %426, %432 : vector<8x256xf32>
    %c1_286 = arith.constant 1 : index
    %c0_287 = arith.constant 0 : index
    %c0_288 = arith.constant 0 : index
    %434 = vector.load %arg15[%c1_286, %c0_287, %c0_288] : memref<2x1x256xf32, #tpu.memory_space<vmem>>, vector<1x1x256xf32>
    %435 = vector.shape_cast %434 : vector<1x1x256xf32> to vector<1x256xf32>
    %436 = vector.broadcast %435 : vector<1x256xf32> to vector<8x256xf32>
    %437 = arith.addf %433, %436 : vector<8x256xf32>
    %c0_289 = arith.constant 0 : index
    %c0_290 = arith.constant 0 : index
    %438 = vector.load %arg14[%c0_289, %c0_290] : memref<8x1xf32, #tpu.memory_space<vmem>>, vector<8x1xf32>
    %439 = vector.broadcast %438 : vector<8x1xf32> to vector<8x256xf32>
    %440 = arith.addf %437, %439 : vector<8x256xf32>
    %cst_291 = arith.constant 2.000000e-01 : f32
    %441 = vector.broadcast %cst_291 : f32 to vector<8x256xf32>
    %442 = arith.mulf %441, %440 : vector<8x256xf32>
    %443 = arith.maximumf %440, %442 : vector<8x256xf32>
    %c1_292 = arith.constant 1 : index
    %c0_293 = arith.constant 0 : index
    %c0_294 = arith.constant 0 : index
    %444 = vector.load %arg20[%c1_292, %c0_293, %c0_294] : memref<2x8x256xf32, #tpu.memory_space<vmem>>, vector<1x8x256xf32>
    %445 = vector.shape_cast %444 : vector<1x8x256xf32> to vector<8x256xf32>
    %446 = vector.shape_cast %443 : vector<8x256xf32> to vector<1x8x256xf32>
    tpu.vector_store %arg20[%c1_292, %c0_293, %c0_294], %446 {strides = array<i32>} : memref<2x8x256xf32, #tpu.memory_space<vmem>>, vector<1x8x256xf32>,
    %447 = vector.extract_strided_slice %25 {offsets = [0, 1], sizes = [8, 1], strides = [1, 1]} : vector<8x2xf32> to vector<8x1xf32>
    %448 = vector.broadcast %447 : vector<8x1xf32> to vector<8x256xf32>
    %449 = arith.mulf %443, %448 : vector<8x256xf32>
    %c0_295 = arith.constant 0 : index
    %c0_296 = arith.constant 0 : index
    %450 = vector.load %arg18[%c0_295, %c0_296] : memref<12x8xf32, #tpu.memory_space<vmem>>, vector<12x8xf32>
    %cst_297 = arith.constant dense<0.000000e+00> : vector<12x256xf32>
    %451 = tpu.matmul %450, %449, %cst_297 {dimension_numbers = #tpu.dot_dimension_numbers<[1], [0], [0], [1], [0, 0, 1, 1], [], []>} : vector<12x8xf32>, vector<8x256xf32>, vector<12x256xf32> -> vector<12x256xf32>
    %c0_298 = arith.constant 0 : index
    %c0_299 = arith.constant 0 : index
    %452 = vector.load %arg19[%c0_298, %c0_299] : memref<12x1xf32, #tpu.memory_space<vmem>>, vector<12x1xf32>
    %453 = vector.broadcast %452 : vector<12x1xf32> to vector<12x256xf32>
    %454 = arith.addf %451, %453 : vector<12x256xf32>
    %c1_300 = arith.constant 1 : index
    %c0_301 = arith.constant 0 : index
    %c0_302 = arith.constant 0 : index
    %455 = vector.load %arg21[%c1_300, %c0_301, %c0_302] : memref<2x12x256xf32, #tpu.memory_space<vmem>>, vector<1x12x256xf32>
    %456 = vector.shape_cast %455 : vector<1x12x256xf32> to vector<12x256xf32>
    %457 = vector.shape_cast %454 : vector<12x256xf32> to vector<1x12x256xf32>
    tpu.vector_store %arg21[%c1_300, %c0_301, %c0_302], %457 {strides = array<i32>} : memref<2x12x256xf32, #tpu.memory_space<vmem>>, vector<1x12x256xf32>,
    return
  }
}

</mosaic_0001>

<bundles_post_ra>
// kernel: mobile_synthesis_block_forward.1
= control target key start
LH: loop header
LB: loop body
LE: loop exit
PB: predicated region body
PF: predicated region fallthrough
CT: control target
= control target key end

     0   :  { %v3836_v2 = vmov 0   ;;  %vm89_vm0 = vcmask 130048   ;;  %vm5234_vm1 = vcmask 523264   ;;  %vm512_vm2 = vcmask 1043456   ;;  %s3841_s30 = smov 17   ;;  %s3847_s22 = smov 111   ;;  %s5201_s1 = inlined_call_operand.vmem [shape: f32[3,16,2], index: 1, kind: input, shape index: {}]   ;;  %s5202_s4 = inlined_call_operand.vmem [shape: f32[16,16], index: 4, kind: input, shape index: {}]   ;;  %s5203_s5 = inlined_call_operand.vmem [shape: f32[16,1], index: 5, kind: input, shape index: {}]   ;;  %s5204_s6 = inlined_call_operand.vmem [shape: f32[4,16], index: 6, kind: input, shape index: {}]   ;;  %s5205_s7 = inlined_call_operand.vmem [shape: f32[4,1], index: 7, kind: input, shape index: {}]   ;;  %s5206_s2 = inlined_call_operand.vmem [shape: f32[4,64,256], index: 2, kind: input, shape index: {}]   ;;  %s5207_s11 = inlined_call_operand.vmem [shape: f32[8,16], index: 11, kind: input, shape index: {}]   ;;  %s5208_s16 = inlined_call_operand.vmem [shape: f32[8,16], index: 16, kind: input, shape index: {}]   ;;  %s5209_s0 = inlined_call_operand.vmem [shape: f32[2,16,64], index: 0, kind: input, shape index: {}]   ;;  %s5210_s3 = inlined_call_operand.vmem [shape: f32[2,1,256], index: 3, kind: input, shape index: {}]   ;;  %s5211_s9 = inlined_call_operand.vmem [shape: f32[8,1], index: 9, kind: input, shape index: {}]   ;;  %s5212_s12 = inlined_call_operand.vmem [shape: f32[8,1], index: 12, kind: input, shape index: {}]   ;;  %s5213_s8 = inlined_call_operand.vmem [shape: f32[9,8,4], index: 8, kind: input, shape index: {}]   ;;  %s5214_s10 = inlined_call_operand.vmem [shape: f32[2,1,256], index: 10, kind: input, shape index: {}]   ;;  %s5215_s17 = inlined_call_operand.vmem [shape: f32[8,1], index: 17, kind: input, shape index: {}]   ;;  %s5216_s14 = inlined_call_operand.vmem [shape: f32[8,1], index: 14, kind: input, shape index: {}]   ;;  %s5217_s13 = inlined_call_operand.vmem [shape: f32[9,8,8], index: 13, kind: input, shape index: {}]   ;;  %s5218_s15 = inlined_call_operand.vmem [shape: f32[2,1,256], index: 15, kind: input, shape index: {}]   ;;  %s5219_s20 = inlined_call_operand.vmem [shape: f32[2,8,256], index: 20, kind: output, shape index: {0}]   ;;  %s5220_s18 = inlined_call_operand.vmem [shape: f32[12,8], index: 18, kind: input, shape index: {}]   ;;  %s5221_s19 = inlined_call_operand.vmem [shape: f32[12,1], index: 19, kind: input, shape index: {}]   ;;  %s5222_s21 = inlined_call_operand.vmem [shape: f32[2,12,256], index: 21, kind: output, shape index: {1}]  }
   0x1   :  { %5237 = sst [smem:[#allocation4_spill]] %s5201_s1  ;;  %3747 = vset.pattern.permute.xlu0 %v3836_v2  ;;  %3749 = vset.pattern.permute.xlu2 %v3836_v2  ;;  %v149_v50 = vld [vmem:[%s5207_s11] sm:$0xff]  ;;  %vm5233_vm3 = vcmask 134144   ;;  %vm212_vm4 = vcmask 273544   ;;  %vm215_vm5 = vcmask 138240   ;;  %vm520_vm6 = vcmask 1043592  }
   0x2   :  { %5238 = sst [smem:[#allocation5_spill]] %s5202_s4  ;;  %3748 = vset.pattern.permute.xlu1 %v3836_v2  ;;  %v179_v51 = vld [vmem:[%s5208_s16] sm:$0xff]  ;;  %vm521_vm7 = vcmask 1047556   ;;  %vm661_vm9 = vcmask 15360   ;;  %s3845_s11 = smov 126   ;;  %vm880_vm10 = vcmask 146432  }
   0x3   :  { %5239 = sst [smem:[#allocation6_spill]] %s5203_s5  ;;  %vm4273_vm8 = vmor %vm521_vm7, %vm520_vm6  ;;  %s3846_s16 = smov 112   ;;  %vm957_vm11 = vcmask 261120   ;;  %vm1100_vm12 = vcmask 277504   ;;  %vm5236_vm13 = vcmask 31744   ;;  %vm551_vm14 = vcmask 1039360  }
   0x4   :  { %5240 = sst [smem:[#allocation7_spill]] %s5204_s6  ;;  %s5227_s23 = smov 110   ;;  %vm683_vm15 = vcmask 1031168   ;;  %vm825_vm6 = vcmask 908288   ;;  %vm5235_vm7 = vcmask 900096  }
   0x5   :  { %5241 = sst [smem:[#allocation8_spill]] %s5205_s7  ;;  %s3840_s7 = smov 34  }
   0x6   :  { %5242 = sst [smem:[#allocation9_spill]] %s5206_s2  ;;  %s5229_s24 = smov 95  }
   0x7   :  { %s5243_s26 = sld [smem:[#allocation4_spill]]  ;;  %s3851_s5 = smov 94  }
   0x8   :  { %s5244_s1 = sld [smem:[#allocation5_spill]] }
   0x9   :  { %s5245_s2 = sld [smem:[#allocation6_spill]] }
   0xa   :  { %s5246_s4 = sld [smem:[#allocation7_spill]] }
   0xb   :  { %s5247_s29 = sld [smem:[#allocation8_spill]] }
   0xc   :  { %s5248_s27 = sld [smem:[#allocation9_spill]] }
   0xd   :  { %v68_v0 = vld [vmem:[%s5243_s26 + $0x8] sm:$0xff]  ;;  %v67_v1 = vld [vmem:[%s5243_s26] sm:$0xff]  ;;  %v3451_v15 = vld [vmem:[%s5243_s26 + $0x18] sm:$0xff] }
   0xe   :  { %110 = vmatpush.msra.mxu0 %v68_v0  ;;  %v75_v3 = vld [vmem:[%s5244_s1] sm:$0xff]  ;;  %143 = vmatpush.msra.mxu1 %v68_v0  ;;  %v76_v7 = vld [vmem:[%s5244_s1 + $0x8] sm:$0xff]  ;;  %v3450_v17 = vld [vmem:[%s5243_s26 + $0x10] sm:$0xff]  ;;  %s3839_s1 = smov 32  }
   0xf   :  { %v77_v4 = vld [vmem:[%s5245_s2] sm:$0xff]  ;;  %v78_v6 = vld [vmem:[%s5245_s2 + $0x8] sm:$0xff]  ;;  %173 = vmatpush.msra.mxu2 %v3451_v15  ;;  %s3842_s2 = smov 18  }
  0x10   :  { %81 = vperm.xlu0 %3747, %v77_v4   ;;  %v119_v5 = vld [vmem:[%s5246_s4] sm:$0xf]  ;;  %111 = vmatpush.msra.mxu0 %v67_v1  ;;  %v3453_v16 = vld [vmem:[%s5243_s26 + $0x28] sm:$0xff]  ;;  %s5231_s4 = smov 96  }
  0x11   :  { %144 = vmatpush.msra.mxu1 %v67_v1  ;;  %3454 = vmatmul.msk.f32.vlgmr.msra.gmra.mxu0 %vm89_vm0, %v75_v3  ;;  %v120_v8 = vld [vmem:[%s5247_s29] sm:$0xf]  ;;  %s3837_s29 = smov 2  }
  0x12   :  { %3456 = vmatmul.msk.f32.vlgmr.msra.gmra.mxu1 %vm89_vm0, %v119_v5  ;;  %123 = vperm.xlu2 %3749, %v120_v8   ;;  %v3452_v18 = vld [vmem:[%s5243_s26 + $0x20] sm:$0xff]  ;;  %v3474_v19 = vld [vmem:[%s5248_s27 + $0xf0] sm:$0xff]  ;;  %v3475_v20 = vld [vmem:[%s5248_s27 + $0xf8] sm:$0xff]  ;;  %s3844_s26 = smov 127  }
  0x13   :  { %203 = vmatpush.msra.mxu3 %v3453_v16  ;;  %303 = vmatpush.msrb.mxu0 %v3474_v19  ;;  %v272_v21 = vld [vmem:[%s5248_s27 + $0x70] sm:$0xff]  ;;  %v273_v22 = vld [vmem:[%s5248_s27 + $0x78] sm:$0xff]  ;;  %v3472_v23 = vld [vmem:[%s5248_s27 + $0xe0] sm:$0xff] }
  0x14   :  { %323 = vmatpush.msrb.mxu1 %v3475_v20  ;;  %174 = vmatpush.msra.mxu2 %v3450_v17  ;;  %v3473_v24 = vld [vmem:[%s5248_s27 + $0xe8] sm:$0xff]  ;;  %v270_v25 = vld [vmem:[%s5248_s27 + $0x60] sm:$0xff]  ;;  %v3470_v27 = vld [vmem:[%s5248_s27 + $0xd0] sm:$0xff] }
  0x15   :  { %204 = vmatpush.msra.mxu3 %v3452_v18  ;;  %v271_v26 = vld [vmem:[%s5248_s27 + $0x68] sm:$0xff]  ;;  %v3471_v28 = vld [vmem:[%s5248_s27 + $0xd8] sm:$0xff]  ;;  %304 = vmatpush.msrb.mxu0 %v3472_v23  ;;  %v268_v29 = vld [vmem:[%s5248_s27 + $0x50] sm:$0xff] }
  0x16   :  { %346 = vmatpush.msrb.mxu2 %v272_v21  ;;  %324 = vmatpush.msrb.mxu1 %v3473_v24  ;;  %v269_v30 = vld [vmem:[%s5248_s27 + $0x58] sm:$0xff]  ;;  %v3468_v34 = vld [vmem:[%s5248_s27 + $0xc0] sm:$0xff]  ;;  %v3469_v35 = vld [vmem:[%s5248_s27 + $0xc8] sm:$0xff] }
  0x17   :  { %366 = vmatpush.msrb.mxu3 %v273_v22  ;;  %305 = vmatpush.msrb.mxu0 %v3470_v27  ;;  %v266_v36 = vld [vmem:[%s5248_s27 + $0x40] sm:$0xff]  ;;  %v267_v37 = vld [vmem:[%s5248_s27 + $0x48] sm:$0xff]  ;;  %v3466_v38 = vld [vmem:[%s5248_s27 + $0xb0] sm:$0xff] }
  0x18   :  { %86 = vperm.xlu0 %3747, %v78_v6   ;;  %347 = vmatpush.msrb.mxu2 %v270_v25  ;;  %v3467_v39 = vld [vmem:[%s5248_s27 + $0xb8] sm:$0xff]  ;;  %v264_v40 = vld [vmem:[%s5248_s27 + $0x30] sm:$0xff]  ;;  %v3464_v42 = vld [vmem:[%s5248_s27 + $0xa0] sm:$0xff] }
  0x19   :  { %3455 = vmatmul.msk.f32.gmra.mxu0 %vm89_vm0, %v76_v7  ;;  %367 = vmatpush.msrb.mxu3 %v271_v26  ;;  %v265_v41 = vld [vmem:[%s5248_s27 + $0x38] sm:$0xff]  ;;  %v3465_v43 = vld [vmem:[%s5248_s27 + $0xa8] sm:$0xff]  ;;  %v262_v44 = vld [vmem:[%s5248_s27 + $0x20] sm:$0xff] }
  0x1a   :  { %325 = vmatpush.msrb.mxu1 %v3471_v28  ;;  %348 = vmatpush.msrb.mxu2 %v268_v29  ;;  %v263_v45 = vld [vmem:[%s5248_s27 + $0x28] sm:$0xff]  ;;  %v3462_v46 = vld [vmem:[%s5248_s27 + $0x90] sm:$0xff]  ;;  %v3463_v47 = vld [vmem:[%s5248_s27 + $0x98] sm:$0xff] }
  0x1b   :  { %368 = vmatpush.msrb.mxu3 %v269_v30  ;;  %306 = vmatpush.msrb.mxu0 %v3468_v34  ;;  %v260_v48 = vld [vmem:[%s5248_s27 + $0x10] sm:$0xff]  ;;  %v261_v49 = vld [vmem:[%s5248_s27 + $0x18] sm:$0xff]  ;;  %v3460_v52 = vld [vmem:[%s5248_s27 + $0x80] sm:$0xff] }
  0x1c   :  { %326 = vmatpush.msrb.mxu1 %v3469_v35  ;;  %349 = vmatpush.msrb.mxu2 %v266_v36  ;;  %v3461_v53 = vld [vmem:[%s5248_s27 + $0x88] sm:$0xff]  ;;  %v258_v54 = vld [vmem:[%s5248_s27] sm:$0xff]  ;;  %v3494_v56 = vld [vmem:[%s5248_s27 + $0x170] sm:$0xff] }
  0x1d   :  { %369 = vmatpush.msrb.mxu3 %v267_v37  ;;  %307 = vmatpush.msrb.mxu0 %v3466_v38  ;;  %v259_v55 = vld [vmem:[%s5248_s27 + $0x8] sm:$0xff]  ;;  %v3495_v57 = vld [vmem:[%s5248_s27 + $0x178] sm:$0xff]  ;;  %v3512_v58 = vld [vmem:[%s5248_s27 + $0x1f0] sm:$0xff] }
  0x1e   :  { %327 = vmatpush.msrb.mxu1 %v3467_v39  ;;  %350 = vmatpush.msrb.mxu2 %v264_v40  ;;  %v3513_v59 = vld [vmem:[%s5248_s27 + $0x1f8] sm:$0xff]  ;;  %v3492_v60 = vld [vmem:[%s5248_s27 + $0x160] sm:$0xff]  ;;  %v3493_v61 = vld [vmem:[%s5248_s27 + $0x168] sm:$0xff] }
  0x1f   :  { %370 = vmatpush.msrb.mxu3 %v265_v41  ;;  %308 = vmatpush.msrb.mxu0 %v3464_v42  ;;  %v3510_v62 = vld [vmem:[%s5248_s27 + $0x1e0] sm:$0xff]  ;;  %v3511_v63 = vld [vmem:[%s5248_s27 + $0x1e8] sm:$0xff]  ;;  %v3490_v0 = vld [vmem:[%s5248_s27 + $0x150] sm:$0xff] }
  0x20   :  { %328 = vmatpush.msrb.mxu1 %v3465_v43  ;;  %351 = vmatpush.msrb.mxu2 %v262_v44  ;;  %v3491_v1 = vld [vmem:[%s5248_s27 + $0x158] sm:$0xff]  ;;  %v3508_v3 = vld [vmem:[%s5248_s27 + $0x1d0] sm:$0xff]  ;;  %v3488_v5 = vld [vmem:[%s5248_s27 + $0x140] sm:$0xff] }
  0x21   :  { %371 = vmatpush.msrb.mxu3 %v263_v45  ;;  %309 = vmatpush.msrb.mxu0 %v3462_v46  ;;  %v3509_v4 = vld [vmem:[%s5248_s27 + $0x1d8] sm:$0xff]  ;;  %v3489_v6 = vld [vmem:[%s5248_s27 + $0x148] sm:$0xff]  ;;  %v3506_v7 = vld [vmem:[%s5248_s27 + $0x1c0] sm:$0xff] }
  0x22   :  { %329 = vmatpush.msrb.mxu1 %v3463_v47  ;;  %352 = vmatpush.msrb.mxu2 %v260_v48  ;;  %v3507_v8 = vld [vmem:[%s5248_s27 + $0x1c8] sm:$0xff]  ;;  %v3484_v15 = vld [vmem:[%s5248_s27 + $0x120] sm:$0xff]  ;;  %v3482_v19 = vld [vmem:[%s5248_s27 + $0x110] sm:$0xff] }
  0x23   :  { %372 = vmatpush.msrb.mxu3 %v261_v49  ;;  %3457 = vmatmul.msk.f32.vlgmr.msra.gmra.mxu2 %vm89_vm0, %v149_v50  ;;  %v3485_v16 = vld [vmem:[%s5248_s27 + $0x128] sm:$0xff]  ;;  %v3502_v17 = vld [vmem:[%s5248_s27 + $0x1a0] sm:$0xff]  ;;  %v3483_v20 = vld [vmem:[%s5248_s27 + $0x118] sm:$0xff] }
  0x24   :  { %3458 = vmatmul.msk.f32.vlgmr.msra.gmra.mxu3 %vm89_vm0, %v179_v51  ;;  %310 = vmatpush.msrb.mxu0 %v3460_v52  ;;  %v3503_v18 = vld [vmem:[%s5248_s27 + $0x1a8] sm:$0xff]  ;;  %v3500_v21 = vld [vmem:[%s5248_s27 + $0x190] sm:$0xff]  ;;  %v3501_v22 = vld [vmem:[%s5248_s27 + $0x198] sm:$0xff] }
  0x25   :  { %330 = vmatpush.msrb.mxu1 %v3461_v53  ;;  %353 = vmatpush.msrb.mxu2 %v258_v54  ;;  %v3480_v23 = vld [vmem:[%s5248_s27 + $0x100] sm:$0xff]  ;;  %v3481_v24 = vld [vmem:[%s5248_s27 + $0x108] sm:$0xff] }
  0x26   :  { %373 = vmatpush.msrb.mxu3 %v259_v55  ;;  %406 = vmatpush.msra.mxu0 %v3494_v56  ;;  %v3498_v25 = vld [vmem:[%s5248_s27 + $0x180] sm:$0xff]  ;;  %v3499_v26 = vld [vmem:[%s5248_s27 + $0x188] sm:$0xff] }
  0x27   :  { %426 = vmatpush.msra.mxu1 %v3495_v57  ;;  %468 = vmatpush.msra.mxu2 %v3512_v58  ;;  %v224_v27 = vld [vmem:[%s5209_s0] sm:$0xff] }
  0x28   :  { %488 = vmatpush.msra.mxu3 %v3513_v59  ;;  %407 = vmatpush.msra.mxu0 %v3492_v60  ;;  %v3459_v50 = vld [vmem:[%s5210_s3 + $0x2] sm:$0x3]  ;;  %v221_v52 = vld [vmem:[%s5210_s3] sm:$0x3]  ;;  %s3838_s3 = smov 16  }
  0x29   :  { %427 = vmatpush.msra.mxu1 %v3493_v61  ;;  %469 = vmatpush.msra.mxu2 %v3510_v62  ;;  %v4231_v51 = vperm.slane %v3459_v50, 1  ;;  %v4236_v53 = vperm.slane %v3459_v50, 0  ;;  %v4239_v55 = vperm.slane %v221_v52, 0  ;;  %v4241_v56 = vperm.slane %v221_v52, 1 }
  0x2a   :  { %489 = vmatpush.msra.mxu3 %v3511_v63  ;;  %408 = vmatpush.msra.mxu0 %v3490_v0 }
  0x2b   :  { %428 = vmatpush.msra.mxu1 %v3491_v1  ;;  %470 = vmatpush.msra.mxu2 %v3508_v3  ;;  %v656_v54 = vrot.slane %v4231_v51, 4  ;;  %v530_v58 = vrot.slane %v4241_v56, 4 }
  0x2c   :  { %490 = vmatpush.msra.mxu3 %v3509_v4  ;;  %409 = vmatpush.msra.mxu0 %v3488_v5 }
  0x2d   :  { %429 = vmatpush.msra.mxu1 %v3489_v6  ;;  %471 = vmatpush.msra.mxu2 %v3506_v7  ;;  %v657_v57 = vsel %vm512_vm2, %v4236_v53, %v656_v54  ;;  %v4249_v59 = vsel %vm512_vm2, %v4239_v55, %v530_v58 }
  0x2e   :  { %491 = vmatpush.msra.mxu3 %v3507_v8 }
  0x6c   :  { %v124_v32 = vpop.permute.xlu2 %123 }
  0x82   :  { %v82_v9 = vpop.permute.xlu0 %81 }
  0x8a   :  { %v87_v12 = vpop.permute.xlu0 %86 }
  0x8e   :  { %v113_v10 = vpop.f32.mrf.mxu0 }
  0x8f   :  { %v3993_v11 = vadd.f32 %v113_v10, %v82_v9  ;;  %v146_v31 = vpop.f32.mrf.mxu1  ;;  %v3486_v9 = vld [vmem:[%s5248_s27 + $0x130] sm:$0xff]  ;;  %v3487_v10 = vld [vmem:[%s5248_s27 + $0x138] sm:$0xff] }
  0x90   :  { %v4047_v33 = vadd.f32 %v146_v31, %v124_v32  ;;  %410 = vmatpush.msra.mxu0 %v3486_v9  ;;  %430 = vmatpush.msra.mxu1 %v3487_v10  ;;  %v225_v31 = vld [vmem:[%s5209_s0 + $0x8] sm:$0xff] }
  0x91   :  { %228 = vperm.xlu1 %3748, %v3993_v11  }
  0x92   :  { %504 = vperm.xlu2 %3749, %v4047_v33   ;;  %411 = vmatpush.msra.mxu0 %v3484_v15 }
  0x93   :  { %431 = vmatpush.msra.mxu1 %v3485_v16 }
  0x94   :  { %412 = vmatpush.msra.mxu0 %v3482_v19 }
  0x95   :  { %432 = vmatpush.msra.mxu1 %v3483_v20  ;;  %v3843_v20 = vmov 0.0  }
  0x96   :  { %v116_v13 = vpop.f32.mrf.mxu0  ;;  %413 = vmatpush.msra.mxu0 %v3480_v23  ;;  %210 = vst.msk [vmem:[#allocation2] sm:$0xf] %vm5233_vm3, %v3843_v20 }
  0x97   :  { %v3996_v14 = vadd.f32 %v116_v13, %v87_v12  ;;  %v3504_v12 = vld [vmem:[%s5248_s27 + $0x1b0] sm:$0xff]  ;;  %v3505_v13 = vld [vmem:[%s5248_s27 + $0x1b8] sm:$0xff]  ;;  %433 = vmatpush.msra.mxu1 %v3481_v24  ;;  %213 = vst.msk [vmem:[#allocation2 + $0x8] sm:$0xf] %vm212_vm4, %v3843_v20 }
  0x98   :  { %472 = vmatpush.msra.mxu2 %v3504_v12  ;;  %492 = vmatpush.msra.mxu3 %v3505_v13  ;;  %211 = vst.msk [vmem:[#allocation2 + $0xc] sm:$0xf] %vm5233_vm3, %v3843_v20 }
  0x99   :  { %233 = vperm.xlu1 %3748, %v3996_v14   ;;  %214 = vst.msk [vmem:[#allocation2 + $0x14] sm:$0xf] %vm212_vm4, %v3843_v20  ;;  %vm759_vm4 = vcmask 916480  }
  0x9a   :  { %473 = vmatpush.msra.mxu2 %v3502_v17  ;;  %493 = vmatpush.msra.mxu3 %v3503_v18  ;;  %216 = vst.msk [vmem:[#allocation3] sm:$0xff] %vm215_vm5, %v3843_v20 }
  0x9b   :  { %735 = vrot.lane.b32.xlu2 %v4249_v59, %s3838_s3  ;;  %217 = vst.msk [vmem:[#allocation3 + $0x18] sm:$0xff] %vm215_vm5, %v3843_v20 }
  0x9c   :  { %474 = vmatpush.msra.mxu2 %v3500_v21  ;;  %494 = vmatpush.msra.mxu3 %v3501_v22 }
  0x9e   :  { %475 = vmatpush.msra.mxu2 %v3498_v25  ;;  %495 = vmatpush.msra.mxu3 %v3499_v26 }
  0xa1   :  { %658 = vrot.lane.b32.xlu1 %v657_v57, %s3837_s29 }
  0xa3   :  { %1097 = vrot.lane.b32.xlu2 %v657_v57, %s3840_s7 }
  0xa6   :  { %v4253_v60 = vpop.f32.mrf.mxu2 }
  0xa7   :  { %v4255_v61 = vpop.f32.mrf.mxu3 }
  0xa9   :  { %954 = vrot.lane.b32.xlu1 %v4249_v59, %s3839_s1 }
  0xec   :  { %v505_v15 = vpop.permute.xlu2 %504 }
 0x103   :  { %v229_v28 = vpop.permute.xlu1 %228 }
 0x104   :  { %v236_v29 = vmul.f32 %v229_v28, %v224_v27 }
 0x106   :  { %v239_v30 = vrot.slane %v236_v29, 4 }
 0x108   :  { %v241_v34 = vadd.f32 %v239_v30, %v236_v29  ;;  %v251_v39 = vsub.f32 %v236_v29, %v239_v30 }
 0x10b   :  { %v234_v32 = vpop.permute.xlu1 %233 }
 0x10c   :  { %v237_v35 = vmul.f32 %v234_v32, %v225_v31 }
 0x10e   :  { %v244_v36 = vrot.slane %v237_v35, 4  ;;  %v248_v37 = vsub.f32 %v241_v34, %v237_v35  ;;  %v242_v38 = vadd.f32 %v241_v34, %v237_v35  ;;  %v252_v42 = vadd.f32 %v251_v39, %v237_v35 }
 0x10f   :  { %v255_v44 = vsub.f32 %v251_v39, %v237_v35  ;;  %v736_v35 = vpop.permute.xlu2 %735 }
 0x110   :  { %v249_v40 = vsub.f32 %v248_v37, %v244_v36  ;;  %v246_v41 = vadd.f32 %v244_v36, %v242_v38  ;;  %v253_v46 = vsub.f32 %v252_v42, %v244_v36 }
 0x111   :  { %v256_v47 = vadd.f32 %v255_v44, %v244_v36  ;;  %v4296_v36 = vrot.slane %v736_v35, 4 }
 0x112   :  { %v250_v43 = vmul.f32 0.5, %v249_v40  ;;  %v247_v45 = vmul.f32 0.5, %v246_v41  ;;  %v254_v48 = vmul.f32 0.5, %v253_v46 }
 0x113   :  { %v257_v49 = vmul.f32 0.5, %v256_v47  ;;  %v659_v27 = vpop.permute.xlu1 %658 }
 0x114   :  { %3476 = vmatmul.msk.f32.vlgmr.msrb.gmra.mxu0 %vm5234_vm1, %v250_v43  ;;  %3477 = vmatmul.msk.f32.vlgmr.msrb.gmra.mxu1 %vm5234_vm1, %v250_v43  ;;  %v4287_v28 = vrot.slane %v659_v27, 4  ;;  %v4311_v43 = vsel %vm89_vm0, %v4296_v36, %v736_v35 }
 0x115   :  { %3478 = vmatmul.msk.f32.vlgmr.msrb.gmra.mxu2 %vm5234_vm1, %v247_v45  ;;  %3479 = vmatmul.msk.f32.vlgmr.msrb.gmra.mxu3 %vm5234_vm1, %v247_v45 }
 0x116   :  { %v4300_v37 = vsel %vm661_vm9, %v4287_v28, %v659_v27 }
 0x11c   :  { %3496 = vmatmul.msk.f32.vlgmr.msra.gmra.mxu0 %vm5234_vm1, %v254_v48  ;;  %3497 = vmatmul.msk.f32.vlgmr.msra.gmra.mxu1 %vm5234_vm1, %v254_v48 }
 0x11d   :  { %3514 = vmatmul.msk.f32.vlgmr.msra.gmra.mxu2 %vm5234_vm1, %v257_v49  ;;  %3515 = vmatmul.msk.f32.vlgmr.msra.gmra.mxu3 %vm5234_vm1, %v257_v49  ;;  %vm1045_vm1 = vcmask 777216  }
 0x191   :  { %v312_v62 = vpop.f32.mrf.mxu0  ;;  %v332_v63 = vpop.f32.mrf.mxu1 }
 0x198   :  { %v355_v0 = vpop.f32.mrf.mxu2  ;;  %v375_v1 = vpop.f32.mrf.mxu3 }
 0x199   :  { %v356_v3 = vadd.f32 %v355_v0, %v312_v62  ;;  %v376_v4 = vadd.f32 %v375_v1, %v332_v63  ;;  %v415_v5 = vpop.f32.mrf.mxu0  ;;  %v435_v6 = vpop.f32.mrf.mxu1 }
 0x19b   :  { %v438_v7 = vadd.f32 %v415_v5, %v356_v3  ;;  %v439_v8 = vadd.f32 %v435_v6, %v376_v4 }
 0x1a0   :  { %v477_v9 = vpop.f32.mrf.mxu2  ;;  %v497_v10 = vpop.f32.mrf.mxu3 }
 0x1a1   :  { %v500_v12 = vadd.f32 %v477_v9, %v438_v7  ;;  %v501_v13 = vadd.f32 %v497_v10, %v439_v8  ;;  %v1098_v10 = vpop.permute.xlu2 %1097 }
 0x1a3   :  { %v508_v16 = vmul.f32 %v505_v15, %v501_v13  ;;  %v507_v17 = vmul.f32 %v505_v15, %v500_v12  ;;  %v4350_v13 = vrot.slane %v1098_v10, 4 }
 0x1a5   :  { %v511_v18 = vrot.slane %v508_v16, 4 }
 0x1a7   :  { %v513_v19 = vsel %vm512_vm2, %v507_v17, %v511_v18 }
 0x1a8   :  { %514 = vrot.lane.b32.xlu0 %v513_v19, %s3841_s30  ;;  %v4360_v19 = vsel %vm1100_vm12, %v4350_v13, %v1098_v10 }
 0x1b0   :  { %877 = vrot.lane.b32.xlu0 %v657_v57, %s3842_s2  ;;  %v955_v57 = vpop.permute.xlu1 %954 }
 0x1b1   :  { %v4327_v62 = vrot.slane %v955_v57, 4 }
 0x1b3   :  { %v4342_v6 = vsel %vm957_vm11, %v4327_v62, %v955_v57  ;;  %v3530_v57 = vld [vmem:[%s5213_s8 + $0x18] sm:$0xff] }
 0x21a   :  { %v515_v21 = vpop.permute.xlu0 %514 }
 0x21b   :  { %v516_v23 = vrot.slane %v515_v21, 4 }
 0x21d   :  { %v517_v24 = vsel %vm215_vm5, %v516_v23, %v515_v21  ;;  %524 = vst.msk [vmem:[#allocation2 + $0x8] sm:$0xf] %vm5233_vm3, %v516_v23  ;;  %vm979_vm3 = vcmask 785408  }
 0x21e   :  { %523 = vst.msk [vmem:[#allocation2] sm:$0xff] %vm4273_vm8, %v517_v24 }
 0x222   :  { %v878_v48 = vpop.permute.xlu0 %877 }
 0x223   :  { %v4319_v49 = vrot.slane %v878_v48, 4 }
 0x224   :  { %v4281_v25 = vld [vmem:[#allocation2 + $0x8] sm:$0xf] }
 0x225   :  { %v4283_v26 = vld [vmem:[#allocation2] sm:$0xff]  ;;  %541 = vst [vmem:[#allocation1 + $0x10] ss:$2 sm:$0xff] %v4281_v25  ;;  %v666_v34 = vmul.f32 %v4287_v28, %v4281_v25  ;;  %v742_v41 = vmul.f32 %v4296_v36, %v4281_v25  ;;  %v885_v54 = vmul.f32 %v4319_v49, %v4281_v25  ;;  %v4331_v63 = vsel %vm880_vm10, %v4319_v49, %v878_v48 }
 0x226   :  { %539 = vst [vmem:[#allocation1] ss:$2 sm:$0xff] %v4283_v26  ;;  %v533_v29 = vmul.f32 %v4249_v59, %v4283_v26  ;;  %v665_v38 = vmul.f32 %v4300_v37, %v4283_v26  ;;  %v741_v44 = vmul.f32 %v4311_v43, %v4283_v26  ;;  %v884_v0 = vmul.f32 %v4331_v63, %v4283_v26 }
 0x227   :  { %v962_v1 = vmul.f32 %v4327_v62, %v4281_v25  ;;  %v961_v7 = vmul.f32 %v4342_v6, %v4283_v26  ;;  %v1105_v15 = vmul.f32 %v4350_v13, %v4281_v25  ;;  %v1104_v21 = vmul.f32 %v4360_v19, %v4283_v26 }
 0x22c   :  { %v544_v30 = vld.sshfl [vmem:[#allocation1 + $0x10] sm:$0xff pattern:$0x75316420] }
 0x22d   :  { %v542_v31 = vld.sshfl [vmem:[#allocation1] sm:$0xff pattern:$0x75316420]  ;;  %v543_v32 = vld.sshfl [vmem:[#allocation1 + $0x8] sm:$0xff pattern:$0x75316420]  ;;  %549 = vrot.lane.b32.xlu2 %v544_v30, %s3844_s26 }
 0x22e   :  { %603 = vst [vmem:[#allocation1] ss:$2 sm:$0xff] %v533_v29  ;;  %547 = vrot.lane.b32.xlu1 %v543_v32, %s3844_s26  ;;  %545 = vrot.lane.b32.xlu0 %v542_v31, %s3844_s26  ;;  %v150_v30 = vld [vmem:[%s5212_s12] sm:$0xff] }
 0x22f   :  { %673 = vst [vmem:[#allocation1 + $0x10] ss:$2 sm:$0xff] %v666_v34  ;;  %v534_v32 = vld [vmem:[%s5213_s8] sm:$0xff] }
 0x235   :  { %v604_v39 = vld.sshfl [vmem:[#allocation1] sm:$0xff pattern:$0x75316420]  ;;  %v605_v40 = vld.sshfl [vmem:[#allocation1 + $0x8] sm:$0xff pattern:$0x75316420] }
 0x236   :  { %671 = vst [vmem:[#allocation1] ss:$2 sm:$0xff] %v665_v38  ;;  %v676_v42 = vld.sshfl [vmem:[#allocation1 + $0x10] sm:$0xff pattern:$0x75316420]  ;;  %3521 = vmatpush.msk.msrb.mxu2 %vm512_vm2, %v604_v39  ;;  %3523 = vmatpush.msk.msrb.mxu3 %vm512_vm2, %v605_v40  ;;  %v3516_v38 = vld [vmem:[%s5213_s8 + $0x8] sm:$0xff] }
 0x237   :  { %749 = vst [vmem:[#allocation1 + $0x10] ss:$2 sm:$0xff] %v742_v41  ;;  %681 = vrot.lane.b32.xlu2 %v676_v42, %s3845_s11  ;;  %3522 = vmatmul.msk.f32.vlgmr.msrb.gmra.mxu2 %vm5236_vm13, %v534_v32 }
 0x238   :  { %3524 = vmatmul.msk.f32.vlgmr.msrb.gmra.mxu3 %vm5236_vm13, %v534_v32 }
 0x23d   :  { %v674_v45 = vld.sshfl [vmem:[#allocation1] sm:$0xff pattern:$0x75316420]  ;;  %v675_v46 = vld.sshfl [vmem:[#allocation1 + $0x8] sm:$0xff pattern:$0x75316420] }
 0x23e   :  { %747 = vst [vmem:[#allocation1] ss:$2 sm:$0xff] %v741_v44  ;;  %v752_v47 = vld.sshfl [vmem:[#allocation1 + $0x10] sm:$0xff pattern:$0x75316420]  ;;  %679 = vrot.lane.b32.xlu1 %v675_v46, %s3845_s11  ;;  %677 = vrot.lane.b32.xlu0 %v674_v45, %s3845_s11 }
 0x23f   :  { %815 = vst [vmem:[#allocation1 + $0x10] ss:$2 sm:$0xff] %v4281_v25  ;;  %757 = vrot.lane.b32.xlu2 %v752_v47, %s3846_s16  ;;  %v3525_v46 = vld [vmem:[%s5213_s8 + $0x10] sm:$0xff] }
 0x245   :  { %v750_v50 = vld.sshfl [vmem:[#allocation1] sm:$0xff pattern:$0x75316420]  ;;  %v751_v52 = vld.sshfl [vmem:[#allocation1 + $0x8] sm:$0xff pattern:$0x75316420] }
 0x246   :  { %813 = vst [vmem:[#allocation1] ss:$2 sm:$0xff] %v4283_v26  ;;  %v818_v58 = vld.sshfl [vmem:[#allocation1 + $0x10] sm:$0xff pattern:$0x75316420]  ;;  %755 = vrot.lane.b32.xlu1 %v751_v52, %s3846_s16  ;;  %753 = vrot.lane.b32.xlu0 %v750_v50, %s3846_s16 }
 0x247   :  { %892 = vst [vmem:[#allocation1 + $0x10] ss:$2 sm:$0xff] %v885_v54  ;;  %823 = vrot.lane.b32.xlu2 %v818_v58, %s3847_s22 }
 0x24d   :  { %v817_v3 = vld.sshfl [vmem:[#allocation1 + $0x8] sm:$0xff pattern:$0x75316420]  ;;  %v816_v4 = vld.sshfl [vmem:[#allocation1] sm:$0xff pattern:$0x75316420] }
 0x24e   :  { %v895_v5 = vld.sshfl [vmem:[#allocation1 + $0x10] sm:$0xff pattern:$0x75316420]  ;;  %821 = vrot.lane.b32.xlu1 %v817_v3, %s3847_s22  ;;  %819 = vrot.lane.b32.xlu0 %v816_v4, %s3847_s22  ;;  %890 = vst [vmem:[#allocation1] ss:$2 sm:$0xff] %v884_v0  ;;  %v3535_v4 = vld [vmem:[%s5213_s8 + $0x20] sm:$0xff] }
 0x24f   :  { %900 = vrot.lane.b32.xlu2 %v895_v5, %s5227_s23  ;;  %969 = vst [vmem:[#allocation1 + $0x10] ss:$2 sm:$0xff] %v962_v1 }
 0x255   :  { %v894_v8 = vld.sshfl [vmem:[#allocation1 + $0x8] sm:$0xff pattern:$0x75316420]  ;;  %v893_v9 = vld.sshfl [vmem:[#allocation1] sm:$0xff pattern:$0x75316420] }
 0x256   :  { %v972_v12 = vld.sshfl [vmem:[#allocation1 + $0x10] sm:$0xff pattern:$0x75316420]  ;;  %898 = vrot.lane.b32.xlu1 %v894_v8, %s5227_s23  ;;  %896 = vrot.lane.b32.xlu0 %v893_v9, %s5227_s23  ;;  %967 = vst [vmem:[#allocation1] ss:$2 sm:$0xff] %v961_v7 }
 0x257   :  { %977 = vrot.lane.b32.xlu2 %v972_v12, %s5231_s4  ;;  %1035 = vst [vmem:[#allocation1 + $0x10] ss:$2 sm:$0xff] %v4281_v25  ;;  %v3540_v12 = vld [vmem:[%s5213_s8 + $0x28] sm:$0xff] }
 0x25d   :  { %v971_v16 = vld.sshfl [vmem:[#allocation1 + $0x8] sm:$0xff pattern:$0x75316420]  ;;  %v970_v17 = vld.sshfl [vmem:[#allocation1] sm:$0xff pattern:$0x75316420] }
 0x25e   :  { %v1038_v18 = vld.sshfl [vmem:[#allocation1 + $0x10] sm:$0xff pattern:$0x75316420]  ;;  %975 = vrot.lane.b32.xlu1 %v971_v16, %s5231_s4  ;;  %973 = vrot.lane.b32.xlu0 %v970_v17, %s5231_s4  ;;  %1033 = vst [vmem:[#allocation1] ss:$2 sm:$0xff] %v4283_v26  ;;  %v1182_v26 = vld [vmem:[%s5211_s9] sm:$0xff] }
 0x25f   :  { %1043 = vrot.lane.b32.xlu2 %v1038_v18, %s5229_s24  ;;  %1112 = vst [vmem:[#allocation1 + $0x10] ss:$2 sm:$0xff] %v1105_v15 }
 0x265   :  { %v1037_v23 = vld.sshfl [vmem:[#allocation1 + $0x8] sm:$0xff pattern:$0x75316420]  ;;  %v1036_v24 = vld.sshfl [vmem:[#allocation1] sm:$0xff pattern:$0x75316420] }
 0x266   :  { %v1115_v25 = vld.sshfl [vmem:[#allocation1 + $0x10] sm:$0xff pattern:$0x75316420]  ;;  %1041 = vrot.lane.b32.xlu1 %v1037_v23, %s5229_s24  ;;  %1039 = vrot.lane.b32.xlu0 %v1036_v24, %s5229_s24  ;;  %1110 = vst [vmem:[#allocation1] ss:$2 sm:$0xff] %v1104_v21 }
 0x267   :  { %1120 = vrot.lane.b32.xlu2 %v1115_v25, %s3851_s5  ;;  %v3545_v23 = vld [vmem:[%s5213_s8 + $0x30] sm:$0xff] }
 0x26d   :  { %v1114_v27 = vld.sshfl [vmem:[#allocation1 + $0x8] sm:$0xff pattern:$0x75316420]  ;;  %v1113_v29 = vld.sshfl [vmem:[#allocation1] sm:$0xff pattern:$0x75316420] }
 0x26e   :  { %1118 = vrot.lane.b32.xlu1 %v1114_v27, %s3851_s5  ;;  %1116 = vrot.lane.b32.xlu0 %v1113_v29, %s3851_s5 }
 0x276   :  { %1185 = vperm.xlu1 %3748, %v1182_v26   ;;  %153 = vperm.xlu0 %3747, %v150_v30   ;;  %v3550_v30 = vld [vmem:[%s5213_s8 + $0x38] sm:$0xff] }
 0x287   :  { %v550_v31 = vpop.permute.xlu2 %549 }
 0x291   :  { %v682_v41 = vpop.permute.xlu2 %681 }
 0x299   :  { %v758_v42 = vpop.permute.xlu2 %757 }
 0x2a0   :  { %v548_v34 = vpop.permute.xlu1 %547  ;;  %v546_v35 = vpop.permute.xlu0 %545 }
 0x2a1   :  { %v553_v39 = vsel %vm551_vm14, %v548_v34, %v550_v31  ;;  %v552_v40 = vsel %vm551_vm14, %v546_v35, %v548_v34  ;;  %v824_v50 = vpop.permute.xlu2 %823 }
 0x2a2   :  { %3517 = vmatpush.msk.msrb.mxu0 %vm512_vm2, %v552_v40  ;;  %3519 = vmatpush.msk.msrb.mxu1 %vm512_vm2, %v553_v39  ;;  %v3555_v39 = vld [vmem:[%s5213_s8 + $0x40] sm:$0xff] }
 0x2a3   :  { %3518 = vmatmul.msk.f32.vlgmr.msrb.gmra.mxu0 %vm5236_vm13, %v3516_v38  ;;  %3520 = vmatmul.msk.f32.vlgmr.msrb.gmra.mxu1 %vm5236_vm13, %v3516_v38 }
 0x2a9   :  { %v901_v5 = vpop.permute.xlu2 %900 }
 0x2b0   :  { %v680_v44 = vpop.permute.xlu1 %679  ;;  %v678_v45 = vpop.permute.xlu0 %677 }
 0x2b1   :  { %v685_v47 = vsel %vm683_vm15, %v680_v44, %v682_v41  ;;  %v684_v48 = vsel %vm683_vm15, %v678_v45, %v680_v44  ;;  %v978_v17 = vpop.permute.xlu2 %977 }
 0x2b2   :  { %3526 = vmatpush.msk.msra.mxu0 %vm512_vm2, %v684_v48  ;;  %3528 = vmatpush.msk.msra.mxu1 %vm512_vm2, %v685_v47 }
 0x2b3   :  { %3527 = vmatmul.msk.f32.vlgmr.msra.gmra.mxu0 %vm5236_vm13, %v3525_v46  ;;  %3529 = vmatmul.msk.f32.vlgmr.msra.gmra.mxu1 %vm5236_vm13, %v3525_v46 }
 0x2b8   :  { %v756_v52 = vpop.permute.xlu1 %755  ;;  %v754_v54 = vpop.permute.xlu0 %753 }
 0x2b9   :  { %v761_v58 = vsel %vm759_vm4, %v756_v52, %v758_v42  ;;  %v760_v0 = vsel %vm759_vm4, %v754_v54, %v756_v52  ;;  %v1044_v27 = vpop.permute.xlu2 %1043 }
 0x2ba   :  { %3531 = vmatpush.msk.msra.mxu2 %vm512_vm2, %v760_v0  ;;  %3533 = vmatpush.msk.msra.mxu3 %vm512_vm2, %v761_v58  ;;  %v630_v47 = vpop.f32.mrf.mxu2 }
 0x2bb   :  { %3532 = vmatmul.msk.f32.vlgmr.msra.gmra.mxu2 %vm5236_vm13, %v3530_v57  ;;  %3534 = vmatmul.msk.f32.vlgmr.msra.gmra.mxu3 %vm5236_vm13, %v3530_v57  ;;  %v650_v48 = vpop.f32.mrf.mxu3 }
 0x2c0   :  { %v822_v1 = vpop.permute.xlu1 %821  ;;  %v820_v3 = vpop.permute.xlu0 %819 }
 0x2c1   :  { %v827_v7 = vsel %vm825_vm6, %v822_v1, %v824_v50  ;;  %v826_v8 = vsel %vm825_vm6, %v820_v3, %v822_v1  ;;  %v1121_v34 = vpop.permute.xlu2 %1120 }
 0x2c2   :  { %3536 = vmatpush.msk.msrb.mxu0 %vm512_vm2, %v826_v8  ;;  %3538 = vmatpush.msk.msrb.mxu1 %vm512_vm2, %v827_v7 }
 0x2c3   :  { %3537 = vmatmul.msk.f32.vlgmr.msrb.gmra.mxu0 %vm5236_vm13, %v3535_v4  ;;  %3539 = vmatmul.msk.f32.vlgmr.msrb.gmra.mxu1 %vm5236_vm13, %v3535_v4 }
 0x2c8   :  { %v899_v9 = vpop.permute.xlu1 %898  ;;  %v897_v10 = vpop.permute.xlu0 %896 }
 0x2c9   :  { %v904_v15 = vsel %vm5235_vm7, %v899_v9, %v901_v5  ;;  %v903_v16 = vsel %vm5235_vm7, %v897_v10, %v899_v9  ;;  %vm1122_vm7 = vcmask 769024  }
 0x2ca   :  { %3541 = vmatpush.msk.msrb.mxu2 %vm512_vm2, %v903_v16  ;;  %3543 = vmatpush.msk.msrb.mxu3 %vm512_vm2, %v904_v15 }
 0x2cb   :  { %3542 = vmatmul.msk.f32.vlgmr.msrb.gmra.mxu2 %vm5236_vm13, %v3540_v12  ;;  %3544 = vmatmul.msk.f32.vlgmr.msrb.gmra.mxu3 %vm5236_vm13, %v3540_v12 }
 0x2d0   :  { %v976_v18 = vpop.permute.xlu1 %975  ;;  %v974_v21 = vpop.permute.xlu0 %973 }
 0x2d1   :  { %v981_v24 = vsel %vm979_vm3, %v976_v18, %v978_v17  ;;  %v980_v25 = vsel %vm979_vm3, %v974_v21, %v976_v18  ;;  %v1174_v21 = vld [vmem:[%s5214_s10] sm:$0x3] }
 0x2d2   :  { %3546 = vmatpush.msk.msra.mxu0 %vm512_vm2, %v980_v25  ;;  %3548 = vmatpush.msk.msra.mxu1 %vm512_vm2, %v981_v24 }
 0x2d3   :  { %3547 = vmatmul.msk.f32.vlgmr.msra.gmra.mxu0 %vm5236_vm13, %v3545_v23  ;;  %3549 = vmatmul.msk.f32.vlgmr.msra.gmra.mxu1 %vm5236_vm13, %v3545_v23 }
 0x2d8   :  { %v1042_v29 = vpop.permute.xlu1 %1041  ;;  %v1040_v26 = vpop.permute.xlu0 %1039 }
 0x2d9   :  { %v1047_v31 = vsel %vm1045_vm1, %v1042_v29, %v1044_v27  ;;  %v1046_v32 = vsel %vm1045_vm1, %v1040_v26, %v1042_v29 }
 0x2da   :  { %3551 = vmatpush.msk.msra.mxu2 %vm512_vm2, %v1046_v32  ;;  %3553 = vmatpush.msk.msra.mxu3 %vm512_vm2, %v1047_v31  ;;  %v1177_v31 = vperm.slane %v1174_v21, 1 }
 0x2db   :  { %3552 = vmatmul.msk.f32.vlgmr.msra.gmra.mxu2 %vm5236_vm13, %v3550_v30  ;;  %3554 = vmatmul.msk.f32.vlgmr.msra.gmra.mxu3 %vm5236_vm13, %v3550_v30  ;;  %v1176_v30 = vperm.slane %v1174_v21, 0 }
 0x2e0   :  { %v1119_v35 = vpop.permute.xlu1 %1118  ;;  %v1117_v38 = vpop.permute.xlu0 %1116 }
 0x2e1   :  { %v1124_v40 = vsel %vm1122_vm7, %v1119_v35, %v1121_v34  ;;  %v1123_v41 = vsel %vm1122_vm7, %v1117_v38, %v1119_v35 }
 0x2e2   :  { %3556 = vmatpush.msk.msrb.mxu0 %vm512_vm2, %v1123_v41  ;;  %3558 = vmatpush.msk.msrb.mxu1 %vm512_vm2, %v1124_v40 }
 0x2e3   :  { %3557 = vmatmul.msk.f32.vlgmr.msrb.gmra.mxu0 %vm5236_vm13, %v3555_v39  ;;  %3559 = vmatmul.msk.f32.vlgmr.msrb.gmra.mxu1 %vm5236_vm13, %v3555_v39  ;;  %vm218_vm13 = vcmask 277640  }
 0x2e4   :  { %219 = vst.msk [vmem:[#allocation3 + $0x10] sm:$0xff] %vm218_vm13, %v3843_v20 }
 0x2e5   :  { %220 = vst.msk [vmem:[#allocation3 + $0x28] sm:$0xff] %vm218_vm13, %v3843_v20  ;;  %vm1211_vm13 = vcmask 1047688  }
 0x2e8   :  { %v154_v42 = vpop.permute.xlu0 %153  ;;  %v1186_v41 = vpop.permute.xlu1 %1185 }
 0x2e9   :  { %v4453_v44 = vadd.f32 %v4253_v60, %v154_v42 }
 0x2eb   :  { %1196 = vperm.xlu2 %3749, %v4453_v44  }
 0x2f3   :  { %1325 = vrot.lane.b32.xlu2 %v4236_v53, %s3837_s29 }
 0x2fb   :  { %1398 = vrot.lane.b32.xlu2 %v4241_v56, %s3838_s3 }
 0x303   :  { %1524 = vrot.lane.b32.xlu2 %v4236_v53, %s3842_s2 }
 0x30b   :  { %1725 = vrot.lane.b32.xlu2 %v4231_v51, %s3840_s7 }
 0x320   :  { %v579_v45 = vpop.f32.mrf.mxu0  ;;  %v599_v46 = vpop.f32.mrf.mxu1 }
 0x321   :  { %v631_v52 = vadd.f32 %v630_v47, %v579_v45  ;;  %v651_v54 = vadd.f32 %v650_v48, %v599_v46 }
 0x330   :  { %v710_v60 = vpop.f32.mrf.mxu0  ;;  %v730_v50 = vpop.f32.mrf.mxu1 }
 0x331   :  { %v733_v58 = vadd.f32 %v710_v60, %v631_v52  ;;  %v734_v3 = vadd.f32 %v730_v50, %v651_v54 }
 0x33e   :  { %v786_v57 = vpop.f32.mrf.mxu2  ;;  %v806_v0 = vpop.f32.mrf.mxu3 }
 0x33f   :  { %v809_v5 = vadd.f32 %v786_v57, %v733_v58  ;;  %v810_v7 = vadd.f32 %v806_v0, %v734_v3 }
 0x340   :  { %v852_v1 = vpop.f32.mrf.mxu0  ;;  %v872_v4 = vpop.f32.mrf.mxu1 }
 0x341   :  { %v875_v8 = vadd.f32 %v852_v1, %v809_v5  ;;  %v876_v12 = vadd.f32 %v872_v4, %v810_v7 }
 0x345   :  { %v1197_v50 = vpop.permute.xlu2 %1196 }
 0x34d   :  { %v4487_v1 = vpop.permute.xlu2 %1325 }
 0x34e   :  { %v929_v9 = vpop.f32.mrf.mxu2  ;;  %v949_v10 = vpop.f32.mrf.mxu3 }
 0x34f   :  { %v952_v17 = vadd.f32 %v929_v9, %v875_v8  ;;  %v953_v18 = vadd.f32 %v949_v10, %v876_v12 }
 0x350   :  { %v1006_v15 = vpop.f32.mrf.mxu0  ;;  %v1026_v16 = vpop.f32.mrf.mxu1 }
 0x351   :  { %v1029_v23 = vadd.f32 %v1006_v15, %v952_v17  ;;  %v1030_v24 = vadd.f32 %v1026_v16, %v953_v18 }
 0x355   :  { %v4503_v15 = vpop.permute.xlu2 %1398 }
 0x35e   :  { %v1072_v25 = vpop.f32.mrf.mxu2  ;;  %v1092_v27 = vpop.f32.mrf.mxu3 }
 0x35f   :  { %v1095_v29 = vadd.f32 %v1072_v25, %v1029_v23  ;;  %v1096_v26 = vadd.f32 %v1092_v27, %v1030_v24  ;;  %v3852_v27 = vmov 1  }
 0x360   :  { %v1149_v32 = vpop.f32.mrf.mxu0  ;;  %v1169_v34 = vpop.f32.mrf.mxu1  ;;  %3790 = vset.pattern.permute.xlu0 %v3852_v27 }
 0x361   :  { %v1172_v35 = vadd.f32 %v1149_v32, %v1095_v29  ;;  %v1173_v38 = vadd.f32 %v1169_v34, %v1096_v26  ;;  %v4527_v29 = vpop.permute.xlu2 %1524 }
 0x363   :  { %v1180_v39 = vadd.f32 %v1176_v30, %v1172_v35  ;;  %v1181_v40 = vadd.f32 %v1177_v31, %v1173_v38 }
 0x365   :  { %v1188_v42 = vadd.f32 %v1186_v41, %v1180_v39  ;;  %v1189_v45 = vadd.f32 %v1186_v41, %v1181_v40 }
 0x367   :  { %v1190_v46 = vmul.f32 0.2, %v1188_v42  ;;  %v1191_v47 = vmul.f32 0.2, %v1189_v45 }
 0x369   :  { %v1193_v48 = vmax.f32 %v1189_v45, %v1191_v47  ;;  %v1192_v60 = vmax.f32 %v1188_v42, %v1190_v46  ;;  %v4547_v45 = vpop.permute.xlu2 %1725 }
 0x36b   :  { %v1200_v52 = vmul.f32 %v1197_v50, %v1193_v48  ;;  %v1199_v54 = vmul.f32 %v1197_v50, %v1192_v60 }
 0x36d   :  { %1205 = vrot.lane.b32.xlu1 %v1200_v52, %s3841_s30  ;;  %1203 = vrot.lane.b32.xlu0 %v1199_v54, %s3841_s30 }
 0x375   :  { %1396 = vrot.lane.b32.xlu1 %v4239_v55, %s3838_s3  ;;  %1327 = vrot.lane.b32.xlu0 %v4231_v51, %s3837_s29  ;;  %s5251_s29 = smov 96   ;;  %s5252_s3 = smov 110  }
 0x37d   :  { %1597 = vrot.lane.b32.xlu1 %v4241_v56, %s3839_s1  ;;  %1595 = vrot.lane.b32.xlu0 %v4239_v55, %s3839_s1  ;;  %s5253_s1 = smov 95  }
 0x385   :  { %1723 = vrot.lane.b32.xlu1 %v4236_v53, %s3840_s7  ;;  %1526 = vrot.lane.b32.xlu0 %v4231_v51, %s3842_s2 }
 0x3df   :  { %v1206_v20 = vpop.permute.xlu1 %1205  ;;  %v1204_v57 = vpop.permute.xlu0 %1203 }
 0x3e0   :  { %1214 = vst.msk [vmem:[#allocation3 + $0x10] sm:$0xff] %vm215_vm5, %v1206_v20  ;;  %v1207_v58 = vsel %vm215_vm5, %v1204_v57, %v1206_v20  ;;  %v180_v20 = vld [vmem:[%s5215_s17] sm:$0xff] }
 0x3e1   :  { %1212 = vst.msk [vmem:[#allocation3] sm:$0xff] %vm1211_vm13, %v1204_v57  ;;  %v1221_v0 = vmul.f32 %v1207_v58, %v4241_v56  ;;  %v1802_v57 = vld [vmem:[%s5216_s14] sm:$0xff] }
 0x3e3   :  { %1320 = vmatpush.msra.mxu1 %v1221_v0  ;;  %v1222_v0 = vld [vmem:[%s5217_s13] sm:$0xff] }
 0x3e7   :  { %v4489_v3 = vpop.permute.xlu1 %1396  ;;  %v1217_v53 = vld [vmem:[#allocation3 + $0x10] sm:$0xff]  ;;  %v4491_v4 = vpop.permute.xlu0 %1327 }
 0x3e8   :  { %v1215_v51 = vld [vmem:[#allocation3] sm:$0xff]  ;;  %v4496_v5 = vsel %vm661_vm9, %v4487_v1, %v4491_v4  ;;  %v1335_v7 = vmul.f32 %v4491_v4, %v1217_v53  ;;  %v3750_v10 = vpack.i.bf16 %v1217_v53, %v1207_v58  ;;  %v4515_v21 = vsel %vm89_vm0, %v4489_v3, %v4503_v15 }
 0x3e9   :  { %v1334_v8 = vmul.f32 %v4496_v5, %v1207_v58  ;;  %1228 = vrot.lane.b32.xlu1 %v1215_v51, %s3844_s26  ;;  %v1220_v9 = vmul.f32 %v1215_v51, %v4239_v55  ;;  %v1333_v18 = vmul.f32 %v4487_v1, %v1215_v51  ;;  %v1405_v24 = vmul.f32 %v4515_v21, %v1207_v58 }
 0x3ea   :  { %3751 = vrot.lane.b32.xlu0 %v3750_v10, %s3844_s26  ;;  %v1406_v25 = vmul.f32 %v4503_v15, %v1217_v53  ;;  %v1404_v26 = vmul.f32 %v4489_v3, %v1215_v51  ;;  %v1532_v47 = vmul.f32 %v4527_v29, %v1215_v51  ;;  %v1733_v52 = vmul.f32 %v4547_v45, %v1217_v53 }
 0x3eb   :  { %v3760_v12 = vpack.i.bf16 %v1335_v7, %v1334_v8  ;;  %1300 = vmatpush.msra.mxu0 %v1220_v9  ;;  %vm1238_vm0 = vcmask 64512   ;;  %vm5254_vm9 = vcmask 900096  }
 0x3ec   :  { %v3765_v35 = vpack.i.bf16 %v1406_v25, %v1405_v24  ;;  %3564 = vmatmul.msk.f32.vlgmr.msra.gmra.mxu1 %vm1238_vm0, %v1222_v0  ;;  %3563 = vmatmul.msk.f32.vlgmr.msra.gmra.mxu0 %vm1238_vm0, %v1222_v0  ;;  %v3568_v0 = vld [vmem:[%s5217_s13 + $0x18] sm:$0xff] }
 0x3ed   :  { %3761 = vrot.lane.b32.xlu2 %v3760_v12, %s3845_s11  ;;  %v3560_v12 = vld [vmem:[%s5217_s13 + $0x8] sm:$0xff] }
 0x3ef   :  { %v4506_v16 = vpop.permute.xlu0 %1595  ;;  %v4508_v17 = vpop.permute.xlu1 %1597 }
 0x3f0   :  { %v4520_v23 = vsel %vm957_vm11, %v4506_v16, %v4508_v17  ;;  %v1605_v30 = vmul.f32 %v4508_v17, %v1217_v53  ;;  %v1603_v46 = vmul.f32 %v4506_v16, %v1215_v51  ;;  %vm5256_vm11 = vcmask 523264  }
 0x3f1   :  { %3756 = vrot.lane.b32.xlu1 %v3750_v10, %s3847_s22  ;;  %v1604_v31 = vmul.f32 %v4520_v23, %v1207_v58 }
 0x3f2   :  { %1341 = vrot.lane.b32.xlu0 %v1333_v18, %s3845_s11 }
 0x3f3   :  { %v3770_v40 = vpack.i.bf16 %v1605_v30, %v1604_v31 }
 0x3f5   :  { %1469 = vrot.lane.b32.xlu2 %v1215_v51, %s3847_s22 }
 0x3f7   :  { %v4532_v32 = vpop.permute.xlu0 %1526  ;;  %v4544_v42 = vpop.permute.xlu1 %1723 }
 0x3f8   :  { %v4537_v34 = vsel %vm880_vm10, %v4527_v29, %v4532_v32  ;;  %v1534_v39 = vmul.f32 %v4532_v32, %v1217_v53  ;;  %v4554_v48 = vsel %vm1100_vm12, %v4544_v42, %v4547_v45  ;;  %v1731_v50 = vmul.f32 %v4544_v42, %v1215_v51  ;;  %vm5255_vm10 = vmmov %vm5254_vm9 }
 0x3f9   :  { %1412 = vrot.lane.b32.xlu1 %v1404_v26, %s3846_s16  ;;  %v1533_v38 = vmul.f32 %v4537_v34, %v1207_v58  ;;  %v1732_v60 = vmul.f32 %v4554_v48, %v1207_v58  ;;  %vm5257_vm12 = vmmov %vm5256_vm11 }
 0x3fa   :  { %3766 = vrot.lane.b32.xlu0 %v3765_v35, %s3846_s16 }
 0x3fb   :  { %v3775_v41 = vpack.i.bf16 %v1534_v39, %v1533_v38  ;;  %v3785_v54 = vpack.i.bf16 %v1733_v52, %v1732_v60  ;;  %v3565_v60 = vld [vmem:[%s5217_s13 + $0x10] sm:$0xff] }
 0x3fd   :  { %3771 = vrot.lane.b32.xlu2 %v3770_v40, %s5251_s29 }
 0x401   :  { %3776 = vrot.lane.b32.xlu1 %v3775_v41, %s5252_s3 }
 0x402   :  { %1611 = vrot.lane.b32.xlu0 %v1603_v46, %s5251_s29 }
 0x405   :  { %1540 = vrot.lane.b32.xlu2 %v1532_v47, %s5252_s3 }
 0x409   :  { %1739 = vrot.lane.b32.xlu1 %v1731_v50, %s3851_s5 }
 0x40a   :  { %3786 = vrot.lane.b32.xlu0 %v3785_v54, %s3851_s5 }
 0x40d   :  { %3781 = vrot.lane.b32.xlu2 %v3750_v10, %s5253_s1 }
 0x411   :  { %183 = vperm.xlu1 %3748, %v180_v20  }
 0x412   :  { %1668 = vrot.lane.b32.xlu0 %v1215_v51, %s5253_s1 }
 0x415   :  { %1805 = vperm.xlu2 %3749, %v1802_v57  }
 0x41a   :  { %1897 = vperm.xlu0 %3790, %v3993_v11  }
 0x41d   :  { %3791 = vset.pattern.permute.xlu2 %v3852_v27 }
 0x41e   :  { %1901 = vperm.xlu2 %3791, %v3996_v14  }
 0x422   :  { %3793 = vset.pattern.permute.xlu0 %v3836_v2 }
 0x426   :  { %3834 = vset.pattern.permute.xlu2 %v3836_v2 }
 0x447   :  { %v3762_v58 = vpop.permute.xlu2 %3761 }
 0x448   :  { %v3764_v8 = vunpack.i.h.bf16 %v3762_v58  ;;  %v3763_v14 = vunpack.i.l.bf16 %v3762_v58 }
 0x44a   :  { %v1348_v26 = vsel %vm683_vm15, %v3763_v14, %v3764_v8 }
 0x44f   :  { %v1470_v53 = vpop.permute.xlu2 %1469 }
 0x457   :  { %v3772_v51 = vpop.permute.xlu2 %3771 }
 0x458   :  { %v3774_v41 = vunpack.i.h.bf16 %v3772_v51  ;;  %v3773_v46 = vunpack.i.l.bf16 %v3772_v51  ;;  %v3571_v51 = vld [vmem:[%s5217_s13 + $0x20] sm:$0xff] }
 0x45a   :  { %v1618_v52 = vsel %vm979_vm3, %v3773_v46, %v3774_v41  ;;  %v3580_v41 = vld [vmem:[%s5217_s13 + $0x38] sm:$0xff] }
 0x45b   :  { %v1229_v11 = vpop.permute.xlu1 %1228 }
 0x45c   :  { %v3752_v7 = vpop.permute.xlu0 %3751 }
 0x45d   :  { %v3754_v9 = vunpack.i.h.bf16 %v3752_v7  ;;  %v3753_v10 = vunpack.i.l.bf16 %v3752_v7 }
 0x45f   :  { %v1234_v18 = vsel %vm551_vm14, %v1229_v11, %v3753_v10  ;;  %v1235_v24 = vsel %vm551_vm14, %v3753_v10, %v3754_v9  ;;  %v1541_v35 = vpop.permute.xlu2 %1540 }
 0x460   :  { %1257 = vmatpush.msrb.mxu2 %v1234_v18  ;;  %1277 = vmatpush.msrb.mxu3 %v1235_v24 }
 0x461   :  { %3561 = vmatmul.msk.f32.vlgmr.msrb.gmra.mxu2 %vm1238_vm0, %v3560_v12  ;;  %3562 = vmatmul.msk.f32.vlgmr.msrb.gmra.mxu3 %vm1238_vm0, %v3560_v12 }
 0x462   :  { %1389 = vmatpush.msra.mxu3 %v1348_v26 }
 0x463   :  { %v3757_v25 = vpop.permute.xlu1 %3756 }
 0x464   :  { %v3759_v30 = vunpack.i.h.bf16 %v3757_v25  ;;  %v3758_v31 = vunpack.i.l.bf16 %v3757_v25  ;;  %v1342_v38 = vpop.permute.xlu0 %1341 }
 0x465   :  { %v1347_v47 = vsel %vm683_vm15, %v1342_v38, %v3763_v14 }
 0x466   :  { %v1476_v39 = vsel %vm825_vm6, %v3758_v31, %v3759_v30  ;;  %v1475_v40 = vsel %vm825_vm6, %v1470_v53, %v3758_v31  ;;  %1369 = vmatpush.msra.mxu2 %v1347_v47  ;;  %v3574_v30 = vld [vmem:[%s5217_s13 + $0x28] sm:$0xff]  ;;  %v3577_v31 = vld [vmem:[%s5217_s13 + $0x30] sm:$0xff] }
 0x467   :  { %1517 = vmatpush.msrb.mxu3 %v1476_v39  ;;  %v3782_v58 = vpop.permute.xlu2 %3781 }
 0x468   :  { %1497 = vmatpush.msrb.mxu2 %v1475_v40  ;;  %v3784_v7 = vunpack.i.h.bf16 %v3782_v58  ;;  %v3783_v8 = vunpack.i.l.bf16 %v3782_v58 }
 0x469   :  { %3566 = vmatmul.msk.f32.vlgmr.msra.gmra.mxu2 %vm1238_vm0, %v3565_v60  ;;  %3567 = vmatmul.msk.f32.vlgmr.msra.gmra.mxu3 %vm1238_vm0, %v3565_v60 }
 0x46a   :  { %1659 = vmatpush.msra.mxu3 %v1618_v52  ;;  %v1675_v26 = vsel %vm1045_vm1, %v3783_v8, %v3784_v7  ;;  %v3607_v52 = vld [vmem:[%s5248_s27 + $0xf8] sm:$0xff]  ;;  %v3600_v7 = vld [vmem:[%s5248_s27 + $0xc0] sm:$0xff] }
 0x46b   :  { %v1413_v50 = vpop.permute.xlu1 %1412 }
 0x46c   :  { %v3767_v54 = vpop.permute.xlu0 %3766 }
 0x46d   :  { %v3769_v20 = vunpack.i.h.bf16 %v3767_v54  ;;  %v3768_v57 = vunpack.i.l.bf16 %v3767_v54  ;;  %v3604_v54 = vld [vmem:[%s5248_s27 + $0xe0] sm:$0xff] }
 0x46f   :  { %v1418_v53 = vsel %vm759_vm4, %v1413_v50, %v3768_v57  ;;  %v1419_v11 = vsel %vm759_vm4, %v3768_v57, %v3769_v20  ;;  %v3583_v50 = vld [vmem:[%s5217_s13 + $0x40] sm:$0xff]  ;;  %v4642_v57 = vpop.permute.xlu2 %1805 }
 0x470   :  { %1440 = vmatpush.msrb.mxu0 %v1418_v53  ;;  %1460 = vmatpush.msrb.mxu1 %v1419_v11  ;;  %v3602_v53 = vld [vmem:[%s5248_s27 + $0xd0] sm:$0xff] }
 0x471   :  { %3569 = vmatmul.msk.f32.vlgmr.msrb.gmra.mxu0 %vm1238_vm0, %v3568_v0  ;;  %3570 = vmatmul.msk.f32.vlgmr.msrb.gmra.mxu1 %vm1238_vm0, %v3568_v0  ;;  %v3605_v0 = vld [vmem:[%s5248_s27 + $0xe8] sm:$0xff] }
 0x472   :  { %3572 = vmatmul.msk.f32.vlgmr.msrb.gmra.mxu2 %vm1238_vm0, %v3571_v51  ;;  %3573 = vmatmul.msk.f32.vlgmr.msrb.gmra.mxu3 %vm1238_vm0, %v3571_v51 }
 0x473   :  { %v3777_v14 = vpop.permute.xlu1 %3776 }
 0x474   :  { %v3779_v9 = vunpack.i.h.bf16 %v3777_v14  ;;  %v3778_v10 = vunpack.i.l.bf16 %v3777_v14  ;;  %v1612_v12 = vpop.permute.xlu0 %1611  ;;  %v3601_v14 = vld [vmem:[%s5248_s27 + $0xc8] sm:$0xff] }
 0x475   :  { %v1617_v25 = vsel %vm979_vm3, %v1612_v12, %v3773_v46  ;;  %v3606_v46 = vld [vmem:[%s5248_s27 + $0xf0] sm:$0xff] }
 0x476   :  { %v1546_v18 = vsel %vm5254_vm9, %v1541_v35, %v3778_v10  ;;  %v1547_v24 = vsel %vm5255_vm10, %v3778_v10, %v3779_v9  ;;  %1639 = vmatpush.msra.mxu2 %v1617_v25  ;;  %v3598_v9 = vld [vmem:[%s5248_s27 + $0xb0] sm:$0xff]  ;;  %v3596_v10 = vld [vmem:[%s5248_s27 + $0xa0] sm:$0xff]  ;;  %v3591_v25 = vld [vmem:[%s5209_s0 + $0x18] sm:$0xff] }
 0x477   :  { %1568 = vmatpush.msra.mxu0 %v1546_v18  ;;  %1588 = vmatpush.msra.mxu1 %v1547_v24  ;;  %v3590_v12 = vld [vmem:[%s5209_s0 + $0x10] sm:$0xff]  ;;  %v3597_v18 = vld [vmem:[%s5248_s27 + $0xa8] sm:$0xff]  ;;  %vm5258_vm9 = vmmov %vm5256_vm11 }
 0x478   :  { %v3594_v24 = vld [vmem:[%s5248_s27 + $0x90] sm:$0xff]  ;;  %vm5259_vm10 = vmmov %vm5258_vm9 }
 0x479   :  { %1716 = vmatpush.msrb.mxu1 %v1675_v26  ;;  %3575 = vmatmul.msk.f32.vlgmr.msra.gmra.mxu0 %vm1238_vm0, %v3574_v30  ;;  %v1902_v26 = vpop.permute.xlu2 %1901 }
 0x47a   :  { %3576 = vmatmul.msk.f32.vlgmr.msra.gmra.mxu1 %vm1238_vm0, %v3574_v30  ;;  %3578 = vmatmul.msk.f32.vlgmr.msra.gmra.mxu2 %vm1238_vm0, %v3577_v31 }
 0x47b   :  { %v1740_v38 = vpop.permute.xlu1 %1739  ;;  %3579 = vmatmul.msk.f32.vlgmr.msra.gmra.mxu3 %vm1238_vm0, %v3577_v31  ;;  %v3595_v31 = vld [vmem:[%s5248_s27 + $0x98] sm:$0xff] }
 0x47c   :  { %v3787_v35 = vpop.permute.xlu0 %3786 }
 0x47d   :  { %v3789_v39 = vunpack.i.h.bf16 %v3787_v35  ;;  %v3788_v40 = vunpack.i.l.bf16 %v3787_v35  ;;  %v3592_v35 = vld [vmem:[%s5248_s27 + $0x80] sm:$0xff] }
 0x47f   :  { %v1745_v47 = vsel %vm1122_vm7, %v1740_v38, %v3788_v40  ;;  %v1746_v60 = vsel %vm1122_vm7, %v3788_v40, %v3789_v39  ;;  %v3593_v39 = vld [vmem:[%s5248_s27 + $0x88] sm:$0xff]  ;;  %v1905_v40 = vmul.f32 %v3591_v25, %v1902_v26 }
 0x480   :  { %1767 = vmatpush.msrb.mxu2 %v1745_v47  ;;  %1787 = vmatpush.msrb.mxu3 %v1746_v60  ;;  %v3617_v25 = vld [vmem:[%s5248_s27 + $0x128] sm:$0xff] }
 0x482   :  { %3582 = vmatmul.msk.f32.vlgmr.msrb.gmra.mxu1 %vm1238_vm0, %v3580_v41  ;;  %1969 = vmatpush.msra.mxu2 %v3606_v46  ;;  %v3624_v46 = vld [vmem:[%s5248_s27 + $0x160] sm:$0xff] }
 0x483   :  { %v184_v20 = vpop.permute.xlu1 %183  ;;  %3585 = vmatmul.msk.f32.vlgmr.msrb.gmra.mxu3 %vm1238_vm0, %v3583_v50  ;;  %3584 = vmatmul.msk.f32.vlgmr.msrb.gmra.mxu2 %vm1238_vm0, %v3583_v50  ;;  %v3625_v50 = vld [vmem:[%s5248_s27 + $0x168] sm:$0xff] }
 0x484   :  { %v4645_v58 = vadd.f32 %v4255_v61, %v184_v20  ;;  %1989 = vmatpush.msra.mxu3 %v3607_v52  ;;  %1970 = vmatpush.msra.mxu2 %v3604_v54  ;;  %v1669_v11 = vpop.permute.xlu0 %1668  ;;  %v3603_v61 = vld [vmem:[%s5248_s27 + $0xd8] sm:$0xff]  ;;  %v3622_v52 = vld [vmem:[%s5248_s27 + $0x150] sm:$0xff]  ;;  %v1912_v54 = vrot.slane %v1905_v40, 4 }
 0x485   :  { %v1674_v51 = vsel %vm1045_vm1, %v1669_v11, %v3783_v8  ;;  %v3599_v8 = vld [vmem:[%s5248_s27 + $0xb8] sm:$0xff] }
 0x486   :  { %1818 = vperm.xlu1 %3748, %v4645_v58   ;;  %1990 = vmatpush.msra.mxu3 %v3605_v0  ;;  %v3623_v11 = vld [vmem:[%s5248_s27 + $0x158] sm:$0xff] }
 0x487   :  { %1971 = vmatpush.msra.mxu2 %v3602_v53  ;;  %1696 = vmatpush.msrb.mxu0 %v1674_v51 }
 0x488   :  { %3581 = vmatmul.msk.f32.vlgmr.msrb.gmra.mxu0 %vm1238_vm0, %v3580_v41  ;;  %1991 = vmatpush.msra.mxu3 %v3603_v61  ;;  %v3620_v61 = vld [vmem:[%s5248_s27 + $0x140] sm:$0xff] }
 0x489   :  { %1972 = vmatpush.msra.mxu2 %v3600_v7 }
 0x48a   :  { %1992 = vmatpush.msra.mxu3 %v3601_v14 }
 0x48b   :  { %1973 = vmatpush.msra.mxu2 %v3598_v9  ;;  %v3621_v9 = vld [vmem:[%s5248_s27 + $0x148] sm:$0xff] }
 0x48c   :  { %1993 = vmatpush.msra.mxu3 %v3599_v8  ;;  %v1898_v30 = vpop.permute.xlu0 %1897 }
 0x48d   :  { %1974 = vmatpush.msra.mxu2 %v3596_v10  ;;  %v1904_v38 = vmul.f32 %v3590_v12, %v1898_v30  ;;  %v3618_v12 = vld [vmem:[%s5248_s27 + $0x130] sm:$0xff] }
 0x48e   :  { %3792 = vset.pattern.permute.xlu1 %v3852_v27  ;;  %1994 = vmatpush.msra.mxu3 %v3597_v18  ;;  %v3626_v27 = vld [vmem:[%s5248_s27 + $0x170] sm:$0xff]  ;;  %v3619_v18 = vld [vmem:[%s5248_s27 + $0x138] sm:$0xff] }
 0x48f   :  { %2167 = vperm.xlu1 %3792, %v4047_v33   ;;  %1975 = vmatpush.msra.mxu2 %v3594_v24  ;;  %v1907_v41 = vrot.slane %v1904_v38, 4  ;;  %v3627_v33 = vld [vmem:[%s5248_s27 + $0x178] sm:$0xff]  ;;  %v3616_v24 = vld [vmem:[%s5248_s27 + $0x120] sm:$0xff]  ;;  %v3614_v30 = vld [vmem:[%s5248_s27 + $0x110] sm:$0xff] }
 0x490   :  { %1995 = vmatpush.msra.mxu3 %v3595_v31  ;;  %v3615_v31 = vld [vmem:[%s5248_s27 + $0x118] sm:$0xff] }
 0x491   :  { %1976 = vmatpush.msra.mxu2 %v3592_v35  ;;  %v1909_v47 = vadd.f32 %v1907_v41, %v1904_v38  ;;  %v1919_v60 = vsub.f32 %v1904_v38, %v1907_v41  ;;  %v3612_v38 = vld [vmem:[%s5248_s27 + $0x100] sm:$0xff]  ;;  %v3613_v35 = vld [vmem:[%s5248_s27 + $0x108] sm:$0xff]  ;;  %v1322_v41 = vpop.f32.mrf.mxu1 }
 0x492   :  { %1996 = vmatpush.msra.mxu3 %v3593_v39 }
 0x493   :  { %2071 = vmatpush.msrb.mxu2 %v3626_v27  ;;  %v1910_v20 = vadd.f32 %v1909_v47, %v1905_v40  ;;  %v1916_v0 = vsub.f32 %v1909_v47, %v1905_v40  ;;  %v1923_v53 = vsub.f32 %v1919_v60, %v1905_v40  ;;  %v1920_v10 = vadd.f32 %v1919_v60, %v1905_v40 }
 0x494   :  { %2091 = vmatpush.msrb.mxu3 %v3627_v33  ;;  %v1302_v33 = vpop.f32.mrf.mxu0 }
 0x495   :  { %2072 = vmatpush.msrb.mxu2 %v3624_v46  ;;  %v4720_v51 = vadd.f32 %v1912_v54, %v1910_v20  ;;  %v1917_v7 = vsub.f32 %v1916_v0, %v1912_v54  ;;  %v4722_v14 = vadd.f32 %v1923_v53, %v1912_v54  ;;  %v1921_v26 = vsub.f32 %v1920_v10, %v1912_v54 }
 0x496   :  { %2092 = vmatpush.msrb.mxu3 %v3625_v50 }
 0x497   :  { %2073 = vmatpush.msrb.mxu2 %v3622_v52  ;;  %v1918_v8 = vmul.f32 0.5, %v1917_v7  ;;  %v1922_v39 = vmul.f32 0.5, %v1921_v26 }
 0x498   :  { %2093 = vmatpush.msrb.mxu3 %v3623_v11 }
 0x499   :  { %2074 = vmatpush.msrb.mxu2 %v3620_v61  ;;  %3609 = vmatmul.msk.f32.vlgmr.msra.gmra.mxu3 %vm5257_vm12, %v1918_v8  ;;  %vm5261_vm12 = vmmov %vm5258_vm9 }
 0x49a   :  { %2094 = vmatpush.msrb.mxu3 %v3621_v9  ;;  %3608 = vmatmul.msk.f32.vlgmr.msra.gmra.mxu2 %vm5256_vm11, %v1918_v8  ;;  %vm5260_vm11 = vmmov %vm5258_vm9 }
 0x49b   :  { %2075 = vmatpush.msrb.mxu2 %v3618_v12 }
 0x49c   :  { %2095 = vmatpush.msrb.mxu3 %v3619_v18 }
 0x49d   :  { %2076 = vmatpush.msrb.mxu2 %v3616_v24 }
 0x49e   :  { %2096 = vmatpush.msrb.mxu3 %v3617_v25 }
 0x49f   :  { %2077 = vmatpush.msrb.mxu2 %v3614_v30 }
 0x4a0   :  { %2097 = vmatpush.msrb.mxu3 %v3615_v31 }
 0x4a1   :  { %2078 = vmatpush.msrb.mxu2 %v3612_v38  ;;  %v1794_v38 = vld [vmem:[%s5218_s15] sm:$0x3] }
 0x4a2   :  { %2098 = vmatpush.msrb.mxu3 %v3613_v35  ;;  %3628 = vmatmul.msk.f32.vlgmr.msrb.gmra.mxu2 %vm5258_vm9, %v1922_v39 }
 0x4a3   :  { %3629 = vmatmul.msk.f32.vlgmr.msrb.gmra.mxu3 %vm5259_vm10, %v1922_v39  ;;  %vm5262_vm10 = vmmov %vm5258_vm9 }
 0x4e4   :  { %v1259_v27 = vpop.f32.mrf.mxu2  ;;  %v1279_v40 = vpop.f32.mrf.mxu3 }
 0x4e5   :  { %v1323_v50 = vadd.f32 %v1322_v41, %v1279_v40  ;;  %v1303_v20 = vadd.f32 %v1302_v33, %v1259_v27  ;;  %v1797_v40 = vperm.slane %v1794_v38, 1 }
 0x4ec   :  { %v1371_v46 = vpop.f32.mrf.mxu2  ;;  %v1391_v47 = vpop.f32.mrf.mxu3 }
 0x4ed   :  { %v1395_v54 = vadd.f32 %v1391_v47, %v1323_v50  ;;  %v1394_v11 = vadd.f32 %v1371_v46, %v1303_v20  ;;  %v1796_v47 = vperm.slane %v1794_v38, 0  ;;  %v1824_v38 = vld [vmem:[%s5220_s18 + $0x8] sm:$0xf] }
 0x4ee   :  { %v1462_v60 = vpop.f32.mrf.mxu1  ;;  %v1442_v52 = vpop.f32.mrf.mxu0 }
 0x4ef   :  { %v1466_v7 = vadd.f32 %v1462_v60, %v1395_v54  ;;  %v1465_v8 = vadd.f32 %v1442_v52, %v1394_v11 }
 0x4f5   :  { %v1499_v0 = vpop.f32.mrf.mxu2  ;;  %v1519_v53 = vpop.f32.mrf.mxu3 }
 0x4f6   :  { %v1523_v9 = vadd.f32 %v1519_v53, %v1466_v7  ;;  %v1570_v10 = vpop.f32.mrf.mxu0  ;;  %v1522_v12 = vadd.f32 %v1499_v0, %v1465_v8 }
 0x4f7   :  { %v1590_v61 = vpop.f32.mrf.mxu1 }
 0x4f8   :  { %v1594_v25 = vadd.f32 %v1590_v61, %v1523_v9  ;;  %v1593_v30 = vadd.f32 %v1570_v10, %v1522_v12  ;;  %v1819_v7 = vpop.permute.xlu1 %1818  ;;  %v1823_v10 = vld [vmem:[%s5220_s18] sm:$0xff] }
 0x4fd   :  { %v1641_v18 = vpop.f32.mrf.mxu2 }
 0x4fe   :  { %v1661_v24 = vpop.f32.mrf.mxu3  ;;  %v1664_v35 = vadd.f32 %v1641_v18, %v1593_v30  ;;  %v1940_v18 = vld [vmem:[%s5248_s27 + $0x70] sm:$0xff] }
 0x4ff   :  { %v1665_v26 = vadd.f32 %v1661_v24, %v1594_v25  ;;  %v1718_v31 = vpop.f32.mrf.mxu1  ;;  %v1939_v24 = vld [vmem:[%s5248_s27 + $0x68] sm:$0xff]  ;;  %v1938_v25 = vld [vmem:[%s5248_s27 + $0x60] sm:$0xff]  ;;  %v1936_v30 = vld [vmem:[%s5248_s27 + $0x50] sm:$0xff] }
 0x501   :  { %v1722_v39 = vadd.f32 %v1718_v31, %v1665_v26  ;;  %v1937_v26 = vld [vmem:[%s5248_s27 + $0x58] sm:$0xff]  ;;  %v1935_v31 = vld [vmem:[%s5248_s27 + $0x48] sm:$0xff] }
 0x505   :  { %v1698_v27 = vpop.f32.mrf.mxu0 }
 0x506   :  { %v1721_v41 = vadd.f32 %v1698_v27, %v1664_v35  ;;  %v1789_v33 = vpop.f32.mrf.mxu3  ;;  %v1769_v46 = vpop.f32.mrf.mxu2  ;;  %v1934_v35 = vld [vmem:[%s5248_s27 + $0x40] sm:$0xff]  ;;  %v1932_v27 = vld [vmem:[%s5248_s27 + $0x30] sm:$0xff] }
 0x507   :  { %v1793_v60 = vadd.f32 %v1789_v33, %v1722_v39  ;;  %v1933_v39 = vld [vmem:[%s5248_s27 + $0x38] sm:$0xff] }
 0x508   :  { %v1792_v50 = vadd.f32 %v1769_v46, %v1721_v41  ;;  %v1930_v41 = vld [vmem:[%s5248_s27 + $0x20] sm:$0xff]  ;;  %v1929_v33 = vld [vmem:[%s5248_s27 + $0x18] sm:$0xff]  ;;  %v1928_v46 = vld [vmem:[%s5248_s27 + $0x10] sm:$0xff] }
 0x509   :  { %v1801_v52 = vadd.f32 %v1797_v40, %v1793_v60  ;;  %v1931_v40 = vld [vmem:[%s5248_s27 + $0x28] sm:$0xff]  ;;  %v3645_v60 = vld [vmem:[%s5248_s27 + $0x1f8] sm:$0xff] }
 0x50a   :  { %v1800_v54 = vadd.f32 %v1796_v47, %v1792_v50  ;;  %v1927_v47 = vld [vmem:[%s5248_s27 + $0x8] sm:$0xff]  ;;  %v1926_v50 = vld [vmem:[%s5248_s27] sm:$0xff] }
 0x50b   :  { %v1809_v20 = vadd.f32 %v4642_v57, %v1801_v52  ;;  %v3644_v52 = vld [vmem:[%s5248_s27 + $0x1f0] sm:$0xff] }
 0x50c   :  { %v1808_v0 = vadd.f32 %v4642_v57, %v1800_v54  ;;  %v1941_v57 = vld [vmem:[%s5248_s27 + $0x78] sm:$0xff]  ;;  %v1915_v54 = vmul.f32 0.5, %v4720_v51  ;;  %v3640_v51 = vld [vmem:[%s5248_s27 + $0x1d0] sm:$0xff] }
 0x50d   :  { %v1811_v53 = vmul.f32 0.2, %v1809_v20 }
 0x50e   :  { %v1810_v11 = vmul.f32 0.2, %v1808_v0 }
 0x50f   :  { %v1813_v61 = vmax.f32 %v1809_v20, %v1811_v53  ;;  %v3643_v20 = vld [vmem:[%s5248_s27 + $0x1e8] sm:$0xff]  ;;  %v3641_v53 = vld [vmem:[%s5248_s27 + $0x1d8] sm:$0xff] }
 0x510   :  { %v1812_v9 = vmax.f32 %v1808_v0, %v1810_v11  ;;  %v3642_v0 = vld [vmem:[%s5248_s27 + $0x1e0] sm:$0xff]  ;;  %v3639_v11 = vld [vmem:[%s5248_s27 + $0x1c8] sm:$0xff] }
 0x511   :  { %1815 = vst [vmem:[%s5219_s20 + $0x8] sm:$0xff] %v1813_v61  ;;  %v1822_v8 = vmul.f32 %v1819_v7, %v1813_v61  ;;  %v3638_v61 = vld [vmem:[%s5248_s27 + $0x1c0] sm:$0xff] }
 0x512   :  { %1814 = vst [vmem:[%s5219_s20] sm:$0xff] %v1812_v9  ;;  %v1821_v12 = vmul.f32 %v1819_v7, %v1812_v9  ;;  %v3637_v7 = vld [vmem:[%s5248_s27 + $0x1b8] sm:$0xff]  ;;  %v3636_v9 = vld [vmem:[%s5248_s27 + $0x1b0] sm:$0xff] }
 0x513   :  { %1881 = vmatpush.msra.mxu1 %v1822_v8  ;;  %v3635_v8 = vld [vmem:[%s5248_s27 + $0x1a8] sm:$0xff] }
 0x514   :  { %3588 = vmatmul.msk.f32.vlgmr.msra.gmra.mxu1 %vm1238_vm0, %v1823_v10  ;;  %1858 = vmatpush.msra.mxu0 %v1821_v12  ;;  %v3632_v12 = vld [vmem:[%s5248_s27 + $0x190] sm:$0xff] }
 0x515   :  { %2032 = vmatpush.msrb.mxu1 %v1941_v57  ;;  %3586 = vmatmul.msk.f32.vlgmr.msra.gmra.mxu0 %vm1238_vm0, %v1823_v10  ;;  %v3634_v10 = vld [vmem:[%s5248_s27 + $0x1a0] sm:$0xff]  ;;  %v3633_v57 = vld [vmem:[%s5248_s27 + $0x198] sm:$0xff] }
 0x516   :  { %2012 = vmatpush.msrb.mxu0 %v1940_v18  ;;  %v3631_v18 = vld [vmem:[%s5248_s27 + $0x188] sm:$0xff] }
 0x517   :  { %2033 = vmatpush.msrb.mxu1 %v1939_v24  ;;  %v3630_v24 = vld [vmem:[%s5248_s27 + $0x180] sm:$0xff] }
 0x518   :  { %2013 = vmatpush.msrb.mxu0 %v1938_v25  ;;  %v1925_v25 = vmul.f32 0.5, %v4722_v14 }
 0x519   :  { %2034 = vmatpush.msrb.mxu1 %v1937_v26 }
 0x51a   :  { %2014 = vmatpush.msrb.mxu0 %v1936_v30 }
 0x51b   :  { %2035 = vmatpush.msrb.mxu1 %v1935_v31 }
 0x51c   :  { %3589 = vmatmul.msk.f32.gmra.mxu1 %vm1238_vm0, %v1824_v38  ;;  %2015 = vmatpush.msrb.mxu0 %v1934_v35  ;;  %v1998_v35 = vpop.f32.mrf.mxu3 }
 0x51d   :  { %2036 = vmatpush.msrb.mxu1 %v1933_v39  ;;  %3587 = vmatmul.msk.f32.gmra.mxu0 %vm1238_vm0, %v1824_v38  ;;  %v1978_v39 = vpop.f32.mrf.mxu2 }
 0x51e   :  { %2016 = vmatpush.msrb.mxu0 %v1932_v27 }
 0x51f   :  { %2037 = vmatpush.msrb.mxu1 %v1931_v40 }
 0x520   :  { %2017 = vmatpush.msrb.mxu0 %v1930_v41 }
 0x521   :  { %2038 = vmatpush.msrb.mxu1 %v1929_v33 }
 0x522   :  { %2018 = vmatpush.msrb.mxu0 %v1928_v46 }
 0x523   :  { %2039 = vmatpush.msrb.mxu1 %v1927_v47 }
 0x524   :  { %2019 = vmatpush.msrb.mxu0 %v1926_v50  ;;  %3611 = vmatmul.msk.f32.vlgmr.msrb.gmra.mxu1 %vm5260_vm11, %v1915_v54  ;;  %vm5263_vm11 = vcmask 134144  }
 0x525   :  { %2152 = vmatpush.msra.mxu1 %v3645_v60  ;;  %3610 = vmatmul.msk.f32.vlgmr.msrb.gmra.mxu0 %vm5261_vm12, %v1915_v54  ;;  %v2080_v46 = vpop.f32.mrf.mxu2 }
 0x526   :  { %2132 = vmatpush.msra.mxu0 %v3644_v52  ;;  %v2100_v33 = vpop.f32.mrf.mxu3 }
 0x527   :  { %2153 = vmatpush.msra.mxu1 %v3643_v20  ;;  %v2168_v20 = vpop.permute.xlu1 %2167 }
 0x528   :  { %2133 = vmatpush.msra.mxu0 %v3642_v0 }
 0x529   :  { %2154 = vmatpush.msra.mxu1 %v3641_v53 }
 0x52a   :  { %2134 = vmatpush.msra.mxu0 %v3640_v51 }
 0x52b   :  { %2155 = vmatpush.msra.mxu1 %v3639_v11 }
 0x52c   :  { %2135 = vmatpush.msra.mxu0 %v3638_v61 }
 0x52d   :  { %2156 = vmatpush.msra.mxu1 %v3637_v7 }
 0x52e   :  { %2136 = vmatpush.msra.mxu0 %v3636_v9 }
 0x52f   :  { %2157 = vmatpush.msra.mxu1 %v3635_v8 }
 0x530   :  { %2137 = vmatpush.msra.mxu0 %v3634_v10 }
 0x531   :  { %2158 = vmatpush.msra.mxu1 %v3633_v57 }
 0x532   :  { %2138 = vmatpush.msra.mxu0 %v3632_v12 }
 0x533   :  { %2159 = vmatpush.msra.mxu1 %v3631_v18 }
 0x534   :  { %3647 = vmatmul.msk.f32.vlgmr.msra.gmra.mxu1 %vm5258_vm9, %v1925_v25  ;;  %2139 = vmatpush.msra.mxu0 %v3630_v24 }
 0x535   :  { %3646 = vmatmul.msk.f32.vlgmr.msra.gmra.mxu0 %vm5262_vm10, %v1925_v25 }
 0x591   :  { %v4878_v26 = vpop.f32.mrf.mxu1 }
 0x592   :  { %v4880_v30 = vpop.f32.mrf.mxu0 }
 0x599   :  { %v4882_v31 = vpop.f32.mrf.mxu1 }
 0x59a   :  { %v4884_v38 = vpop.f32.mrf.mxu0 }
 0x5a1   :  { %v2041_v27 = vpop.f32.mrf.mxu1 }
 0x5a2   :  { %v2021_v40 = vpop.f32.mrf.mxu0  ;;  %v2042_v14 = vadd.f32 %v2041_v27, %v1998_v35 }
 0x5a3   :  { %v2022_v41 = vadd.f32 %v2021_v40, %v1978_v39 }
 0x5a4   :  { %v2104_v47 = vadd.f32 %v2100_v33, %v2042_v14 }
 0x5a5   :  { %v2103_v50 = vadd.f32 %v2080_v46, %v2022_v41 }
 0x5b1   :  { %v2161_v60 = vpop.f32.mrf.mxu1 }
 0x5b2   :  { %v2165_v52 = vadd.f32 %v2161_v60, %v2104_v47  ;;  %v2141_v54 = vpop.f32.mrf.mxu0 }
 0x5b3   :  { %v2164_v0 = vadd.f32 %v2141_v54, %v2103_v50 }
 0x5b4   :  { %v2171_v53 = vmul.f32 %v2168_v20, %v2165_v52 }
 0x5b5   :  { %v2170_v51 = vmul.f32 %v2168_v20, %v2164_v0 }
 0x5b6   :  { %v2174_v11 = vrot.slane %v2171_v53, 4 }
 0x5b8   :  { %v2175_v61 = vsel %vm512_vm2, %v2170_v51, %v2174_v11 }
 0x5b9   :  { %2176 = vrot.lane.b32.xlu2 %v2175_v61, %s3841_s30 }
 0x613   :  { %v2177_v7 = vpop.permute.xlu2 %2176 }
 0x614   :  { %v2178_v9 = vrot.slane %v2177_v7, 4 }
 0x616   :  { %v2179_v8 = vsel %vm215_vm5, %v2178_v9, %v2177_v7  ;;  %2184 = vst.msk [vmem:[#allocation2 + $0x14] sm:$0xf] %vm5263_vm11, %v2178_v9 }
 0x617   :  { %2183 = vst.msk [vmem:[#allocation2 + $0xc] sm:$0xff] %vm4273_vm8, %v2179_v8  ;;  %vm5264_vm8 = vcmask 31744  }
 0x618   :  { %vm5265_vm12 = vmmov %vm5264_vm8 }
 0x619   :  { %vm5266_vm9 = vmmov %vm5264_vm8 }
 0x61a   :  { %vm5267_vm10 = vmmov %vm5264_vm8 }
 0x61b   :  { %vm5268_vm11 = vmmov %vm5264_vm8 }
 0x61d   :  { %v4892_v10 = vld [vmem:[#allocation2 + $0x14] sm:$0xf] }
 0x61e   :  { %v4894_v57 = vld [vmem:[#allocation2 + $0xc] sm:$0xff]  ;;  %2194 = vst [vmem:[#allocation1 + $0x10] ss:$2 sm:$0xff] %v4892_v10  ;;  %v2305_v35 = vmul.f32 %v4892_v10, %v4287_v28  ;;  %v2505_v46 = vmul.f32 %v4892_v10, %v4319_v49  ;;  %v2573_v52 = vmul.f32 %v4892_v10, %v4327_v62  ;;  %v2705_v51 = vmul.f32 %v4892_v10, %v4350_v13 }
 0x61f   :  { %2192 = vst [vmem:[#allocation1] ss:$2 sm:$0xff] %v4894_v57  ;;  %v2187_v12 = vmul.f32 %v4894_v57, %v4249_v59  ;;  %v2304_v22 = vmul.f32 %v4894_v57, %v4300_v37  ;;  %v2373_v59 = vmul.f32 %v4892_v10, %v4296_v36  ;;  %v2372_v28 = vmul.f32 %v4894_v57, %v4311_v43 }
 0x620   :  { %v2504_v47 = vmul.f32 %v4894_v57, %v4331_v63  ;;  %v2572_v54 = vmul.f32 %v4894_v57, %v4342_v6  ;;  %v2704_v11 = vmul.f32 %v4894_v57, %v4360_v19 }
 0x625   :  { %v2197_v18 = vld.sshfl [vmem:[#allocation1 + $0x10] sm:$0xff pattern:$0x75316420] }
 0x626   :  { %v2195_v24 = vld.sshfl [vmem:[#allocation1] sm:$0xff pattern:$0x75316420]  ;;  %v2196_v25 = vld.sshfl [vmem:[#allocation1 + $0x8] sm:$0xff pattern:$0x75316420]  ;;  %2202 = vrot.lane.b32.xlu2 %v2197_v18, %s3844_s26 }
 0x627   :  { %2254 = vst [vmem:[#allocation1] ss:$2 sm:$0xff] %v2187_v12  ;;  %2200 = vrot.lane.b32.xlu1 %v2196_v25, %s3844_s26  ;;  %2198 = vrot.lane.b32.xlu0 %v2195_v24, %s3844_s26  ;;  %v2188_v25 = vld [vmem:[%s5213_s8] sm:$0xff] }
 0x628   :  { %2311 = vst [vmem:[#allocation1 + $0x10] ss:$2 sm:$0xff] %v2305_v35 }
 0x62e   :  { %v2255_v39 = vld.sshfl [vmem:[#allocation1] sm:$0xff pattern:$0x75316420]  ;;  %v2256_v27 = vld.sshfl [vmem:[#allocation1 + $0x8] sm:$0xff pattern:$0x75316420] }
 0x62f   :  { %2309 = vst [vmem:[#allocation1] ss:$2 sm:$0xff] %v2304_v22  ;;  %v2314_v40 = vld.sshfl [vmem:[#allocation1 + $0x10] sm:$0xff pattern:$0x75316420]  ;;  %3653 = vmatpush.msk.msrb.mxu0 %vm512_vm2, %v2255_v39  ;;  %3655 = vmatpush.msk.msrb.mxu1 %vm512_vm2, %v2256_v27 }
 0x630   :  { %2319 = vrot.lane.b32.xlu2 %v2314_v40, %s3845_s11  ;;  %2379 = vst [vmem:[#allocation1 + $0x10] ss:$2 sm:$0xff] %v2373_v59  ;;  %3656 = vmatmul.msk.f32.vlgmr.msrb.gmra.mxu1 %vm5266_vm9, %v2188_v25  ;;  %v3657_v39 = vld [vmem:[%s5213_s8 + $0x10] sm:$0xff]  ;;  %vm5270_vm9 = vmmov %vm5264_vm8 }
 0x631   :  { %3654 = vmatmul.msk.f32.vlgmr.msrb.gmra.mxu0 %vm5267_vm10, %v2188_v25  ;;  %vm5271_vm10 = vmmov %vm5264_vm8  ;;  %v3682_v25 = vld [vmem:[%s5213_s8 + $0x38] sm:$0xff] }
 0x636   :  { %v2312_v14 = vld.sshfl [vmem:[#allocation1] sm:$0xff pattern:$0x75316420]  ;;  %v2313_v41 = vld.sshfl [vmem:[#allocation1 + $0x8] sm:$0xff pattern:$0x75316420] }
 0x637   :  { %2377 = vst [vmem:[#allocation1] ss:$2 sm:$0xff] %v2372_v28  ;;  %v2382_v37 = vld.sshfl [vmem:[#allocation1 + $0x10] sm:$0xff pattern:$0x75316420]  ;;  %2317 = vrot.lane.b32.xlu1 %v2313_v41, %s3845_s11  ;;  %2315 = vrot.lane.b32.xlu0 %v2312_v14, %s3845_s11  ;;  %v3662_v41 = vld [vmem:[%s5213_s8 + $0x18] sm:$0xff] }
 0x638   :  { %2387 = vrot.lane.b32.xlu2 %v2382_v37, %s3846_s16  ;;  %2443 = vst [vmem:[#allocation1 + $0x10] ss:$2 sm:$0xff] %v4892_v10 }
 0x63e   :  { %v2380_v36 = vld.sshfl [vmem:[#allocation1] sm:$0xff pattern:$0x75316420]  ;;  %v2381_v33 = vld.sshfl [vmem:[#allocation1 + $0x8] sm:$0xff pattern:$0x75316420] }
 0x63f   :  { %2441 = vst [vmem:[#allocation1] ss:$2 sm:$0xff] %v4894_v57  ;;  %v2446_v43 = vld.sshfl [vmem:[#allocation1 + $0x10] sm:$0xff pattern:$0x75316420]  ;;  %2385 = vrot.lane.b32.xlu1 %v2381_v33, %s3846_s16  ;;  %2383 = vrot.lane.b32.xlu0 %v2380_v36, %s3846_s16 }
 0x640   :  { %2451 = vrot.lane.b32.xlu2 %v2446_v43, %s3847_s22  ;;  %2511 = vst [vmem:[#allocation1 + $0x10] ss:$2 sm:$0xff] %v2505_v46 }
 0x646   :  { %v2444_v60 = vld.sshfl [vmem:[#allocation1] sm:$0xff pattern:$0x75316420]  ;;  %v2445_v50 = vld.sshfl [vmem:[#allocation1 + $0x8] sm:$0xff pattern:$0x75316420] }
 0x647   :  { %2509 = vst [vmem:[#allocation1] ss:$2 sm:$0xff] %v2504_v47  ;;  %v2514_v49 = vld.sshfl [vmem:[#allocation1 + $0x10] sm:$0xff pattern:$0x75316420]  ;;  %2449 = vrot.lane.b32.xlu1 %v2445_v50, %s3847_s22  ;;  %2447 = vrot.lane.b32.xlu0 %v2444_v60, %s3847_s22  ;;  %v3667_v47 = vld [vmem:[%s5213_s8 + $0x20] sm:$0xff] }
 0x648   :  { %2519 = vrot.lane.b32.xlu2 %v2514_v49, %s5252_s3  ;;  %2579 = vst [vmem:[#allocation1 + $0x10] ss:$2 sm:$0xff] %v2573_v52 }
 0x64e   :  { %v2512_v20 = vld.sshfl [vmem:[#allocation1] sm:$0xff pattern:$0x75316420]  ;;  %v2513_v0 = vld.sshfl [vmem:[#allocation1 + $0x8] sm:$0xff pattern:$0x75316420] }
 0x64f   :  { %2577 = vst [vmem:[#allocation1] ss:$2 sm:$0xff] %v2572_v54  ;;  %v2582_v63 = vld.sshfl [vmem:[#allocation1 + $0x10] sm:$0xff pattern:$0x75316420]  ;;  %2517 = vrot.lane.b32.xlu1 %v2513_v0, %s5252_s3  ;;  %2515 = vrot.lane.b32.xlu0 %v2512_v20, %s5252_s3  ;;  %v3672_v20 = vld [vmem:[%s5213_s8 + $0x28] sm:$0xff] }
 0x650   :  { %2587 = vrot.lane.b32.xlu2 %v2582_v63, %s5251_s29  ;;  %2643 = vst [vmem:[#allocation1 + $0x10] ss:$2 sm:$0xff] %v4892_v10 }
 0x656   :  { %v2580_v62 = vld.sshfl [vmem:[#allocation1] sm:$0xff pattern:$0x75316420]  ;;  %v2581_v53 = vld.sshfl [vmem:[#allocation1 + $0x8] sm:$0xff pattern:$0x75316420] }
 0x657   :  { %2641 = vst [vmem:[#allocation1] ss:$2 sm:$0xff] %v4894_v57  ;;  %v2646_v6 = vld.sshfl [vmem:[#allocation1 + $0x10] sm:$0xff pattern:$0x75316420]  ;;  %2585 = vrot.lane.b32.xlu1 %v2581_v53, %s5251_s29  ;;  %2583 = vrot.lane.b32.xlu0 %v2580_v62, %s5251_s29  ;;  %v3648_v57 = vld [vmem:[%s5213_s8 + $0x8] sm:$0xff] }
 0x658   :  { %2711 = vst [vmem:[#allocation1 + $0x10] ss:$2 sm:$0xff] %v2705_v51 }
 0x65e   :  { %v2644_v61 = vld.sshfl [vmem:[#allocation1] sm:$0xff pattern:$0x75316420]  ;;  %v2645_v7 = vld.sshfl [vmem:[#allocation1 + $0x8] sm:$0xff pattern:$0x75316420] }
 0x65f   :  { %2709 = vst [vmem:[#allocation1] ss:$2 sm:$0xff] %v2704_v11  ;;  %v2714_v9 = vld.sshfl [vmem:[#allocation1 + $0x10] sm:$0xff pattern:$0x75316420]  ;;  %v2781_v11 = vld [vmem:[%s5211_s9] sm:$0xff] }
 0x660   :  { %2719 = vrot.lane.b32.xlu2 %v2714_v9, %s3851_s5 }
 0x666   :  { %v2713_v8 = vld.sshfl [vmem:[#allocation1 + $0x8] sm:$0xff pattern:$0x75316420]  ;;  %v2712_v12 = vld.sshfl [vmem:[#allocation1] sm:$0xff pattern:$0x75316420] }
 0x667   :  { %2717 = vrot.lane.b32.xlu1 %v2713_v8, %s3851_s5  ;;  %2715 = vrot.lane.b32.xlu0 %v2712_v12, %s3851_s5 }
 0x668   :  { %2651 = vrot.lane.b32.xlu2 %v2646_v6, %s5253_s1  ;;  %v3677_v6 = vld [vmem:[%s5213_s8 + $0x30] sm:$0xff] }
 0x66f   :  { %2649 = vrot.lane.b32.xlu1 %v2645_v7, %s5253_s1  ;;  %2647 = vrot.lane.b32.xlu0 %v2644_v61, %s5253_s1 }
 0x677   :  { %2794 = vperm.xlu1 %3792, %v4453_v44   ;;  %2784 = vperm.xlu0 %3793, %v2781_v11  }
 0x680   :  { %v2203_v13 = vpop.permute.xlu2 %2202 }
 0x68a   :  { %v2320_v44 = vpop.permute.xlu2 %2319 }
 0x692   :  { %v2388_v27 = vpop.permute.xlu2 %2387 }
 0x699   :  { %v2201_v19 = vpop.permute.xlu1 %2200  ;;  %v2199_v10 = vpop.permute.xlu0 %2198 }
 0x69a   :  { %v2205_v18 = vsel %vm551_vm14, %v2201_v19, %v2203_v13  ;;  %v2204_v24 = vsel %vm551_vm14, %v2199_v10, %v2201_v19  ;;  %v2452_v33 = vpop.permute.xlu2 %2451  ;;  %v3687_v13 = vld [vmem:[%s5213_s8 + $0x40] sm:$0xff] }
 0x69b   :  { %3649 = vmatpush.msk.msra.mxu2 %vm512_vm2, %v2204_v24  ;;  %3651 = vmatpush.msk.msra.mxu3 %vm512_vm2, %v2205_v18 }
 0x69c   :  { %3652 = vmatmul.msk.f32.vlgmr.msra.gmra.mxu3 %vm5264_vm8, %v3648_v57  ;;  %3650 = vmatmul.msk.f32.vlgmr.msra.gmra.mxu2 %vm5265_vm12, %v3648_v57  ;;  %vm5269_vm12 = vmmov %vm5264_vm8 }
 0x6a2   :  { %v2520_v52 = vpop.permute.xlu2 %2519 }
 0x6a9   :  { %v2318_v35 = vpop.permute.xlu1 %2317  ;;  %v2316_v22 = vpop.permute.xlu0 %2315 }
 0x6aa   :  { %v2322_v59 = vsel %vm683_vm15, %v2318_v35, %v2320_v44  ;;  %v2321_v40 = vsel %vm683_vm15, %v2316_v22, %v2318_v35  ;;  %v2588_v62 = vpop.permute.xlu2 %2587 }
 0x6ab   :  { %3658 = vmatpush.msk.msrb.mxu2 %vm512_vm2, %v2321_v40  ;;  %3660 = vmatpush.msk.msrb.mxu3 %vm512_vm2, %v2322_v59 }
 0x6ac   :  { %3661 = vmatmul.msk.f32.vlgmr.msrb.gmra.mxu3 %vm5268_vm11, %v3657_v39  ;;  %3659 = vmatmul.msk.f32.vlgmr.msrb.gmra.mxu2 %vm5264_vm8, %v3657_v39  ;;  %vm5272_vm11 = vmmov %vm5264_vm8  ;;  %vm5273_vm8 = vcmask 900096  }
 0x6ae   :  { %v2281_v59 = vpop.f32.mrf.mxu0 }
 0x6b1   :  { %v2386_v28 = vpop.permute.xlu1 %2385  ;;  %v2384_v14 = vpop.permute.xlu0 %2383 }
 0x6b2   :  { %v2390_v37 = vsel %vm759_vm4, %v2386_v28, %v2388_v27  ;;  %v2389_v36 = vsel %vm759_vm4, %v2384_v14, %v2386_v28  ;;  %v2301_v28 = vpop.f32.mrf.mxu1 }
 0x6b3   :  { %3663 = vmatpush.msk.msra.mxu0 %vm512_vm2, %v2389_v36  ;;  %3665 = vmatpush.msk.msra.mxu1 %vm512_vm2, %v2390_v37 }
 0x6b4   :  { %3666 = vmatmul.msk.f32.vlgmr.msra.gmra.mxu1 %vm5269_vm12, %v3662_v41  ;;  %3664 = vmatmul.msk.f32.vlgmr.msra.gmra.mxu0 %vm5270_vm9, %v3662_v41  ;;  %vm5274_vm12 = vmmov %vm5273_vm8 }
 0x6b9   :  { %v2450_v46 = vpop.permute.xlu1 %2449  ;;  %v2448_v43 = vpop.permute.xlu0 %2447 }
 0x6ba   :  { %v2454_v60 = vsel %vm825_vm6, %v2450_v46, %v2452_v33  ;;  %v2453_v50 = vsel %vm825_vm6, %v2448_v43, %v2450_v46  ;;  %v2720_v9 = vpop.permute.xlu2 %2719 }
 0x6bb   :  { %3668 = vmatpush.msk.msra.mxu2 %vm512_vm2, %v2453_v50  ;;  %3670 = vmatpush.msk.msra.mxu3 %vm512_vm2, %v2454_v60 }
 0x6bc   :  { %3671 = vmatmul.msk.f32.vlgmr.msra.gmra.mxu3 %vm5271_vm10, %v3667_v47  ;;  %3669 = vmatmul.msk.f32.vlgmr.msra.gmra.mxu2 %vm5272_vm11, %v3667_v47  ;;  %vm5275_vm10 = vmmov %vm5270_vm9 }
 0x6bd   :  { %vm5276_vm11 = vmmov %vm5270_vm9 }
 0x6c1   :  { %v2518_v49 = vpop.permute.xlu1 %2517  ;;  %v2516_v54 = vpop.permute.xlu0 %2515 }
 0x6c2   :  { %v2522_v0 = vsel %vm5273_vm8, %v2518_v49, %v2520_v52  ;;  %v2521_v63 = vsel %vm5274_vm12, %v2516_v54, %v2518_v49  ;;  %vm5277_vm8 = vmmov %vm5270_vm9  ;;  %v2652_v57 = vpop.permute.xlu2 %2651 }
 0x6c3   :  { %3673 = vmatpush.msk.msrb.mxu0 %vm512_vm2, %v2521_v63  ;;  %3675 = vmatpush.msk.msrb.mxu1 %vm512_vm2, %v2522_v0  ;;  %vm5278_vm12 = vmmov %vm5277_vm8 }
 0x6c4   :  { %3676 = vmatmul.msk.f32.vlgmr.msrb.gmra.mxu1 %vm5270_vm9, %v3672_v20  ;;  %3674 = vmatmul.msk.f32.vlgmr.msrb.gmra.mxu0 %vm5275_vm10, %v3672_v20  ;;  %vm5279_vm9 = vmmov %vm5277_vm8 }
 0x6c5   :  { %vm5280_vm10 = vmmov %vm5277_vm8 }
 0x6c9   :  { %v2586_v53 = vpop.permute.xlu1 %2585  ;;  %v2584_v51 = vpop.permute.xlu0 %2583 }
 0x6ca   :  { %v2590_v61 = vsel %vm979_vm3, %v2586_v53, %v2588_v62  ;;  %v2589_v7 = vsel %vm979_vm3, %v2584_v51, %v2586_v53 }
 0x6cb   :  { %3678 = vmatpush.msk.msrb.mxu2 %vm512_vm2, %v2589_v7  ;;  %3680 = vmatpush.msk.msrb.mxu3 %vm512_vm2, %v2590_v61 }
 0x6cc   :  { %3681 = vmatmul.msk.f32.vlgmr.msrb.gmra.mxu3 %vm5276_vm11, %v3677_v6  ;;  %3679 = vmatmul.msk.f32.vlgmr.msrb.gmra.mxu2 %vm5277_vm8, %v3677_v6  ;;  %vm5281_vm11 = vmmov %vm5277_vm8  ;;  %v3692_v6 = vld [vmem:[%s5214_s10 + $0x2] sm:$0x3] }
 0x6d9   :  { %v2718_v8 = vpop.permute.xlu1 %2717  ;;  %v2716_v12 = vpop.permute.xlu0 %2715 }
 0x6da   :  { %v2722_v19 = vsel %vm1122_vm7, %v2718_v8, %v2720_v9  ;;  %v2721_v10 = vsel %vm1122_vm7, %v2716_v12, %v2718_v8 }
 0x6db   :  { %3688 = vmatpush.msk.msra.mxu2 %vm512_vm2, %v2721_v10  ;;  %3690 = vmatpush.msk.msra.mxu3 %vm512_vm2, %v2722_v19  ;;  %v2775_v19 = vperm.slane %v3692_v6, 0  ;;  %v2776_v10 = vperm.slane %v3692_v6, 1 }
 0x6dc   :  { %3689 = vmatmul.msk.f32.vlgmr.msra.gmra.mxu2 %vm5278_vm12, %v3687_v13  ;;  %3691 = vmatmul.msk.f32.vlgmr.msra.gmra.mxu3 %vm5279_vm9, %v3687_v13 }
 0x6e1   :  { %v2650_v18 = vpop.permute.xlu1 %2649  ;;  %v2648_v24 = vpop.permute.xlu0 %2647 }
 0x6e2   :  { %v2654_v44 = vsel %vm1045_vm1, %v2650_v18, %v2652_v57  ;;  %v2653_v35 = vsel %vm1045_vm1, %v2648_v24, %v2650_v18 }
 0x6e3   :  { %3683 = vmatpush.msk.msra.mxu0 %vm512_vm2, %v2653_v35  ;;  %3685 = vmatpush.msk.msra.mxu1 %vm512_vm2, %v2654_v44  ;;  %vm5282_vm2 = vcmask 900096  }
 0x6e4   :  { %3684 = vmatmul.msk.f32.vlgmr.msra.gmra.mxu0 %vm5280_vm10, %v3682_v25  ;;  %3686 = vmatmul.msk.f32.vlgmr.msra.gmra.mxu1 %vm5281_vm11, %v3682_v25 }
 0x6e9   :  { %v2785_v24 = vpop.permute.xlu0 %2784 }
 0x71f   :  { %v2230_v22 = vpop.f32.mrf.mxu2  ;;  %v2250_v39 = vpop.f32.mrf.mxu3 }
 0x720   :  { %v2282_v14 = vadd.f32 %v2281_v59, %v2230_v22  ;;  %v2302_v36 = vadd.f32 %v2301_v28, %v2250_v39  ;;  %v2795_v28 = vpop.permute.xlu1 %2794 }
 0x72f   :  { %v2347_v27 = vpop.f32.mrf.mxu2  ;;  %v2367_v40 = vpop.f32.mrf.mxu3 }
 0x730   :  { %v2370_v46 = vadd.f32 %v2347_v27, %v2282_v14  ;;  %v2371_v47 = vadd.f32 %v2367_v40, %v2302_v36 }
 0x731   :  { %v2415_v37 = vpop.f32.mrf.mxu0  ;;  %v2435_v43 = vpop.f32.mrf.mxu1 }
 0x732   :  { %v2438_v60 = vadd.f32 %v2415_v37, %v2370_v46  ;;  %v2439_v50 = vadd.f32 %v2435_v43, %v2371_v47 }
 0x73f   :  { %v2479_v41 = vpop.f32.mrf.mxu2  ;;  %v2499_v33 = vpop.f32.mrf.mxu3 }
 0x740   :  { %v2502_v52 = vadd.f32 %v2479_v41, %v2438_v60  ;;  %v2503_v63 = vadd.f32 %v2499_v33, %v2439_v50 }
 0x741   :  { %v2547_v54 = vpop.f32.mrf.mxu0  ;;  %v2567_v0 = vpop.f32.mrf.mxu1 }
 0x742   :  { %v2570_v62 = vadd.f32 %v2547_v54, %v2502_v52  ;;  %v2571_v53 = vadd.f32 %v2567_v0, %v2503_v63 }
 0x74f   :  { %v2615_v49 = vpop.f32.mrf.mxu2  ;;  %v2635_v20 = vpop.f32.mrf.mxu3 }
 0x750   :  { %v2638_v51 = vadd.f32 %v2615_v49, %v2570_v62  ;;  %v2639_v11 = vadd.f32 %v2635_v20, %v2571_v53 }
 0x75f   :  { %v2747_v61 = vpop.f32.mrf.mxu2  ;;  %v2767_v7 = vpop.f32.mrf.mxu3 }
 0x761   :  { %v2679_v9 = vpop.f32.mrf.mxu0  ;;  %v2699_v8 = vpop.f32.mrf.mxu1 }
 0x762   :  { %v2702_v12 = vadd.f32 %v2679_v9, %v2638_v51  ;;  %v2703_v13 = vadd.f32 %v2699_v8, %v2639_v11 }
 0x764   :  { %v2770_v57 = vadd.f32 %v2747_v61, %v2702_v12  ;;  %v2771_v18 = vadd.f32 %v2767_v7, %v2703_v13 }
 0x766   :  { %v2779_v25 = vadd.f32 %v2775_v19, %v2770_v57  ;;  %v2780_v44 = vadd.f32 %v2776_v10, %v2771_v18 }
 0x768   :  { %v2787_v35 = vadd.f32 %v2785_v24, %v2779_v25  ;;  %v2788_v22 = vadd.f32 %v2785_v24, %v2780_v44 }
 0x76a   :  { %v2789_v39 = vmul.f32 0.2, %v2787_v35  ;;  %v2790_v27 = vmul.f32 0.2, %v2788_v22 }
 0x76c   :  { %v2791_v59 = vmax.f32 %v2787_v35, %v2789_v39  ;;  %v2792_v40 = vmax.f32 %v2788_v22, %v2790_v27  ;;  %v3698_v35 = vld [vmem:[%s5217_s13 + $0x10] sm:$0xff] }
 0x76e   :  { %v2798_v14 = vmul.f32 %v2795_v28, %v2792_v40  ;;  %v2797_v41 = vmul.f32 %v2795_v28, %v2791_v59 }
 0x770   :  { %2803 = vrot.lane.b32.xlu1 %v2798_v14, %s3841_s30  ;;  %2801 = vrot.lane.b32.xlu2 %v2797_v41, %s3841_s30 }
 0x7ca   :  { %v2802_v37 = vpop.permute.xlu2 %2801 }
 0x7cb   :  { %2810 = vst.msk [vmem:[#allocation3 + $0x18] sm:$0xff] %vm1211_vm13, %v2802_v37 }
 0x7d2   :  { %v2813_v36 = vld [vmem:[#allocation3 + $0x18] sm:$0xff] }
 0x7d3   :  { %v2816_v33 = vmul.f32 %v2813_v36, %v4239_v55  ;;  %v2919_v49 = vmul.f32 %v2813_v36, %v4487_v1 }
 0x7d5   :  { %2894 = vmatpush.msrb.mxu2 %v2816_v33  ;;  %v3701_v33 = vld [vmem:[%s5217_s13 + $0x18] sm:$0xff] }
 0x7e2   :  { %v2804_v46 = vpop.permute.xlu1 %2803 }
 0x7e3   :  { %v2805_v43 = vsel %vm215_vm5, %v2802_v37, %v2804_v46  ;;  %2812 = vst.msk [vmem:[#allocation3 + $0x28] sm:$0xff] %vm215_vm5, %v2804_v46  ;;  %vm5283_vm5 = vmmov %vm5282_vm2 }
 0x7e4   :  { %v3794_v47 = vpack.i.bf16 %v2805_v43, %v2813_v36  ;;  %v2817_v60 = vmul.f32 %v2805_v43, %v4241_v56  ;;  %v2920_v55 = vmul.f32 %v2805_v43, %v4496_v5  ;;  %v2982_v20 = vmul.f32 %v2805_v43, %v4515_v21 }
 0x7e5   :  { %v3100_v0 = vmul.f32 %v2805_v43, %v4537_v34  ;;  %v3099_v5 = vmul.f32 %v2813_v36, %v4527_v29  ;;  %v3161_v21 = vmul.f32 %v2813_v36, %v4506_v16  ;;  %v3280_v29 = vmul.f32 %v2805_v43, %v4554_v48  ;;  %v3350_v16 = vld [vmem:[%s5216_s14] sm:$0xff] }
 0x7e6   :  { %3795 = vrot.lane.b32.xlu2 %v3794_v47, %s3844_s26  ;;  %2914 = vmatpush.msrb.mxu3 %v2817_v60  ;;  %v3804_v54 = vpack.i.bf16 %v2920_v55, %v2919_v49  ;;  %v2818_v48 = vld [vmem:[%s5217_s13] sm:$0xff] }
 0x7e7   :  { %v3814_v1 = vpack.i.bf16 %v3100_v0, %v3099_v5  ;;  %3696 = vmatmul.msk.f32.vlgmr.msrb.gmra.mxu2 %vm1238_vm0, %v2818_v48  ;;  %3697 = vmatmul.msk.f32.vlgmr.msrb.gmra.mxu3 %vm1238_vm0, %v2818_v48  ;;  %v3704_v49 = vld [vmem:[%s5217_s13 + $0x20] sm:$0xff] }
 0x7ea   :  { %v2815_v50 = vld [vmem:[#allocation3 + $0x28] sm:$0xff] }
 0x7eb   :  { %2827 = vrot.lane.b32.xlu0 %v2815_v50, %s3844_s26  ;;  %v2983_v52 = vmul.f32 %v2815_v50, %v4503_v15  ;;  %v2921_v56 = vmul.f32 %v2815_v50, %v4491_v4  ;;  %v2981_v15 = vmul.f32 %v2813_v36, %v4489_v3  ;;  %v3101_v62 = vmul.f32 %v2815_v50, %v4532_v32 }
 0x7ec   :  { %v3162_v4 = vmul.f32 %v2805_v43, %v4520_v23  ;;  %v3163_v3 = vmul.f32 %v2815_v50, %v4508_v17  ;;  %v3279_v32 = vmul.f32 %v2813_v36, %v4544_v42  ;;  %v3281_v34 = vmul.f32 %v2815_v50, %v4547_v45  ;;  %v1825_v17 = vld [vmem:[%s5221_s19] sm:$0xff]  ;;  %v1826_v42 = vld [vmem:[%s5221_s19 + $0x8] sm:$0xf] }
 0x7ed   :  { %2992 = vrot.lane.b32.xlu1 %v2983_v52, %s3846_s16  ;;  %v3809_v63 = vpack.i.bf16 %v2982_v20, %v2981_v15 }
 0x7ee   :  { %3800 = vrot.lane.b32.xlu2 %v3794_v47, %s3847_s22  ;;  %v3824_v53 = vpack.i.bf16 %v3162_v4, %v3161_v21  ;;  %v3829_v23 = vpack.i.bf16 %v3280_v29, %v3279_v32 }
 0x7f3   :  { %3048 = vrot.lane.b32.xlu0 %v2815_v50, %s3847_s22 }
 0x7f5   :  { %3805 = vrot.lane.b32.xlu1 %v3804_v54, %s3845_s11 }
 0x7f6   :  { %2930 = vrot.lane.b32.xlu2 %v2921_v56, %s3845_s11 }
 0x7fb   :  { %3810 = vrot.lane.b32.xlu0 %v3809_v63, %s3846_s16  ;;  %v3707_v63 = vld [vmem:[%s5217_s13 + $0x28] sm:$0xff] }
 0x7fd   :  { %3815 = vrot.lane.b32.xlu1 %v3814_v1, %s5252_s3 }
 0x7fe   :  { %3110 = vrot.lane.b32.xlu2 %v3101_v62, %s5252_s3  ;;  %v3710_v62 = vld [vmem:[%s5217_s13 + $0x30] sm:$0xff] }
 0x803   :  { %3825 = vrot.lane.b32.xlu0 %v3824_v53, %s5251_s29 }
 0x805   :  { %3172 = vrot.lane.b32.xlu1 %v3163_v3, %s5251_s29  ;;  %v3713_v3 = vld [vmem:[%s5217_s13 + $0x38] sm:$0xff] }
 0x806   :  { %3820 = vrot.lane.b32.xlu2 %v3794_v47, %s5253_s1 }
 0x80b   :  { %3228 = vrot.lane.b32.xlu0 %v2815_v50, %s5253_s1 }
 0x80d   :  { %3830 = vrot.lane.b32.xlu1 %v3829_v23, %s3851_s5  ;;  %v3716_v23 = vld [vmem:[%s5217_s13 + $0x40] sm:$0xff] }
 0x80e   :  { %3290 = vrot.lane.b32.xlu2 %v3281_v34, %s3851_s5 }
 0x813   :  { %3353 = vperm.xlu0 %3793, %v3350_v16  }
 0x815   :  { %3366 = vperm.xlu1 %3792, %v4645_v58   ;;  %v3693_v58 = vld [vmem:[%s5217_s13 + $0x8] sm:$0xff] }
 0x816   :  { %1829 = vperm.xlu2 %3834, %v1825_v17  }
 0x81b   :  { %1834 = vperm.xlu0 %3793, %v1826_v42  }
 0x81d   :  { %3835 = vset.pattern.permute.xlu1 %v3836_v2 }
 0x81e   :  { %3377 = vperm.xlu1 %3835, %v1825_v17  }
 0x840   :  { %v3796_v45 = vpop.permute.xlu2 %3795 }
 0x841   :  { %v3798_v51 = vunpack.i.h.bf16 %v3796_v45  ;;  %v3797_v6 = vunpack.i.l.bf16 %v3796_v45 }
 0x843   :  { %v2829_v11 = vsel %vm551_vm14, %v3797_v6, %v3798_v51 }
 0x844   :  { %2851 = vmatpush.msrb.mxu0 %v2829_v11 }
 0x845   :  { %3694 = vmatmul.msk.f32.vlgmr.msrb.gmra.mxu0 %vm1238_vm0, %v3693_v58 }
 0x848   :  { %v3801_v2 = vpop.permute.xlu2 %3800 }
 0x849   :  { %v3803_v57 = vunpack.i.h.bf16 %v3801_v2  ;;  %v3802_v18 = vunpack.i.l.bf16 %v3801_v2 }
 0x84b   :  { %v3050_v59 = vsel %vm825_vm6, %v3802_v18, %v3803_v57 }
 0x850   :  { %v2931_v61 = vpop.permute.xlu2 %2930 }
 0x858   :  { %v3111_v7 = vpop.permute.xlu2 %3110 }
 0x85d   :  { %v2828_v9 = vpop.permute.xlu0 %2827 }
 0x85e   :  { %v2830_v8 = vsel %vm551_vm14, %v3798_v51, %v2828_v9 }
 0x85f   :  { %v2993_v12 = vpop.permute.xlu1 %2992  ;;  %2871 = vmatpush.msrb.mxu1 %v2830_v8 }
 0x860   :  { %3695 = vmatmul.msk.f32.vlgmr.msrb.gmra.mxu1 %vm1238_vm0, %v3693_v58  ;;  %v5095_v13 = vpop.permute.xlu2 %3820 }
 0x861   :  { %v3823_v41 = vunpack.i.h.bf16 %v5095_v13  ;;  %v3822_v37 = vunpack.i.l.bf16 %v5095_v13 }
 0x863   :  { %v3230_v20 = vsel %vm1045_vm1, %v3822_v37, %v3823_v41 }
 0x865   :  { %v3049_v19 = vpop.permute.xlu0 %3048 }
 0x866   :  { %v3051_v27 = vsel %vm825_vm6, %v3803_v57, %v3049_v19 }
 0x867   :  { %v3806_v10 = vpop.permute.xlu1 %3805 }
 0x868   :  { %v3808_v24 = vunpack.i.h.bf16 %v3806_v10  ;;  %v3807_v25 = vunpack.i.l.bf16 %v3806_v10  ;;  %v5097_v44 = vpop.permute.xlu2 %3290 }
 0x86a   :  { %v2932_v22 = vsel %vm683_vm15, %v3807_v25, %v3808_v24  ;;  %v2933_v39 = vsel %vm683_vm15, %v3808_v24, %v2931_v61  ;;  %v2896_v2 = vpop.f32.mrf.mxu2  ;;  %v2916_v61 = vpop.f32.mrf.mxu3 }
 0x86b   :  { %2954 = vmatpush.msra.mxu0 %v2932_v22  ;;  %2974 = vmatpush.msra.mxu1 %v2933_v39 }
 0x86c   :  { %3699 = vmatmul.msk.f32.vlgmr.msra.gmra.mxu0 %vm1238_vm0, %v3698_v35  ;;  %3700 = vmatmul.msk.f32.vlgmr.msra.gmra.mxu1 %vm1238_vm0, %v3698_v35  ;;  %v3374_v35 = vld [vmem:[%s5221_s19 + $0x8] sm:$0xf] }
 0x86d   :  { %3072 = vmatpush.msrb.mxu0 %v3050_v59  ;;  %3092 = vmatpush.msrb.mxu1 %v3051_v27  ;;  %v3811_v40 = vpop.permute.xlu0 %3810 }
 0x86e   :  { %v3813_v28 = vunpack.i.h.bf16 %v3811_v40  ;;  %v3812_v14 = vunpack.i.l.bf16 %v3811_v40  ;;  %3382 = vperm.xlu2 %3834, %v3374_v35   ;;  %v3719_v40 = vld [vmem:[%s5218_s15 + $0x2] sm:$0x3] }
 0x86f   :  { %v3816_v36 = vpop.permute.xlu1 %3815 }
 0x870   :  { %v3818_v46 = vunpack.i.h.bf16 %v3816_v36  ;;  %v3817_v43 = vunpack.i.l.bf16 %v3816_v36  ;;  %v2994_v47 = vsel %vm759_vm4, %v3812_v14, %v3813_v28  ;;  %v2995_v60 = vsel %vm759_vm4, %v3813_v28, %v2993_v12  ;;  %v1830_v50 = vpop.permute.xlu2 %1829 }
 0x871   :  { %3016 = vmatpush.msra.mxu2 %v2994_v47  ;;  %3036 = vmatpush.msra.mxu3 %v2995_v60  ;;  %v1861_v52 = vadd.f32 %v4880_v30, %v1830_v50  ;;  %v1884_v55 = vadd.f32 %v4878_v26, %v1830_v50  ;;  %v3344_v47 = vperm.slane %v3719_v40, 0  ;;  %v3345_v60 = vperm.slane %v3719_v40, 1 }
 0x872   :  { %3702 = vmatmul.msk.f32.vlgmr.msra.gmra.mxu2 %vm1238_vm0, %v3701_v33  ;;  %3703 = vmatmul.msk.f32.vlgmr.msra.gmra.mxu3 %vm1238_vm0, %v3701_v33  ;;  %v3112_v54 = vsel %vm5282_vm2, %v3817_v43, %v3818_v46  ;;  %v3113_v56 = vsel %vm5283_vm5, %v3818_v46, %v3111_v7 }
 0x873   :  { %3134 = vmatpush.msrb.mxu2 %v3112_v54  ;;  %3154 = vmatpush.msrb.mxu3 %v3113_v56  ;;  %1889 = vst [vmem:[%s5222_s21] sm:$0xff] %v1861_v52 }
 0x874   :  { %1890 = vst [vmem:[%s5222_s21 + $0x8] sm:$0xff] %v1884_v55  ;;  %3705 = vmatmul.msk.f32.vlgmr.msrb.gmra.mxu0 %vm1238_vm0, %v3704_v49  ;;  %3706 = vmatmul.msk.f32.vlgmr.msrb.gmra.mxu1 %vm1238_vm0, %v3704_v49 }
 0x875   :  { %3252 = vmatpush.msra.mxu2 %v3230_v20  ;;  %v3826_v26 = vpop.permute.xlu0 %3825 }
 0x876   :  { %v3828_v30 = vunpack.i.h.bf16 %v3826_v26  ;;  %v3827_v15 = vunpack.i.l.bf16 %v3826_v26 }
 0x877   :  { %v3173_v0 = vpop.permute.xlu1 %3172 }
 0x878   :  { %v3175_v5 = vsel %vm979_vm3, %v3828_v30, %v3173_v0  ;;  %v3174_v1 = vsel %vm979_vm3, %v3827_v15, %v3828_v30 }
 0x879   :  { %3196 = vmatpush.msra.mxu0 %v3174_v1  ;;  %3216 = vmatpush.msra.mxu1 %v3175_v5  ;;  %v3371_v1 = vld [vmem:[%s5220_s18] sm:$0xff] }
 0x87a   :  { %3708 = vmatmul.msk.f32.vlgmr.msrb.gmra.mxu2 %vm1238_vm0, %v3707_v63  ;;  %3709 = vmatmul.msk.f32.vlgmr.msrb.gmra.mxu3 %vm1238_vm0, %v3707_v63 }
 0x87c   :  { %3711 = vmatmul.msk.f32.vlgmr.msra.gmra.mxu0 %vm1238_vm0, %v3710_v62  ;;  %3712 = vmatmul.msk.f32.vlgmr.msra.gmra.mxu1 %vm1238_vm0, %v3710_v62  ;;  %v3372_v62 = vld [vmem:[%s5220_s18 + $0x8] sm:$0xf] }
 0x87d   :  { %v3229_v4 = vpop.permute.xlu0 %3228 }
 0x87e   :  { %v3231_v21 = vsel %vm1045_vm1, %v3823_v41, %v3229_v4 }
 0x87f   :  { %v3831_v53 = vpop.permute.xlu1 %3830  ;;  %3272 = vmatpush.msra.mxu3 %v3231_v21 }
 0x880   :  { %v3833_v29 = vunpack.i.h.bf16 %v3831_v53  ;;  %v3832_v32 = vunpack.i.l.bf16 %v3831_v53 }
 0x882   :  { %3714 = vmatmul.msk.f32.vlgmr.msra.gmra.mxu2 %vm1238_vm0, %v3713_v3  ;;  %3715 = vmatmul.msk.f32.vlgmr.msra.gmra.mxu3 %vm1238_vm0, %v3713_v3  ;;  %v3292_v34 = vsel %vm1122_vm7, %v3832_v32, %v3833_v29  ;;  %v3293_v16 = vsel %vm1122_vm7, %v3833_v29, %v5097_v44 }
 0x883   :  { %3314 = vmatpush.msrb.mxu0 %v3292_v34  ;;  %3334 = vmatpush.msrb.mxu1 %v3293_v16 }
 0x884   :  { %3717 = vmatmul.msk.f32.vlgmr.msrb.gmra.mxu0 %vm1238_vm0, %v3716_v23  ;;  %3718 = vmatmul.msk.f32.vlgmr.msrb.gmra.mxu1 %vm1238_vm0, %v3716_v23 }
 0x885   :  { %v3354_v17 = vpop.permute.xlu0 %3353 }
 0x887   :  { %v3367_v0 = vpop.permute.xlu1 %3366 }
 0x88d   :  { %v1835_v42 = vpop.permute.xlu0 %1834 }
 0x88e   :  { %v1864_v45 = vadd.f32 %v4884_v38, %v1835_v42  ;;  %v1887_v48 = vadd.f32 %v4882_v31, %v1835_v42 }
 0x890   :  { %1891 = vst [vmem:[%s5222_s21 + $0x10] sm:$0xf] %v1864_v45  ;;  %v3378_v4 = vpop.permute.xlu1 %3377 }
 0x891   :  { %1892 = vst [vmem:[%s5222_s21 + $0x18] sm:$0xf] %v1887_v48 }
 0x8c2   :  { %v2853_v51 = vpop.f32.mrf.mxu0 }
 0x8c3   :  { %v2897_v8 = vadd.f32 %v2896_v2, %v2853_v51 }
 0x8c8   :  { %v3383_v32 = vpop.permute.xlu2 %3382 }
 0x8dd   :  { %v2873_v6 = vpop.f32.mrf.mxu1 }
 0x8de   :  { %v2917_v38 = vadd.f32 %v2916_v61, %v2873_v6 }
 0x8e9   :  { %v2956_v58 = vpop.f32.mrf.mxu0  ;;  %v2976_v11 = vpop.f32.mrf.mxu1 }
 0x8ea   :  { %v2979_v13 = vadd.f32 %v2956_v58, %v2897_v8  ;;  %v2980_v19 = vadd.f32 %v2976_v11, %v2917_v38 }
 0x8f1   :  { %v3074_v7 = vpop.f32.mrf.mxu0  ;;  %v3094_v9 = vpop.f32.mrf.mxu1 }
 0x8f5   :  { %v3018_v12 = vpop.f32.mrf.mxu2  ;;  %v3038_v31 = vpop.f32.mrf.mxu3 }
 0x8f6   :  { %v3041_v10 = vadd.f32 %v3018_v12, %v2979_v13  ;;  %v3042_v57 = vadd.f32 %v3038_v31, %v2980_v19 }
 0x8f8   :  { %v3097_v22 = vadd.f32 %v3074_v7, %v3041_v10  ;;  %v3098_v39 = vadd.f32 %v3094_v9, %v3042_v57 }
 0x8f9   :  { %v3198_v18 = vpop.f32.mrf.mxu0  ;;  %v3218_v24 = vpop.f32.mrf.mxu1 }
 0x8fd   :  { %v3136_v25 = vpop.f32.mrf.mxu2  ;;  %v3156_v44 = vpop.f32.mrf.mxu3 }
 0x8fe   :  { %v3159_v27 = vadd.f32 %v3136_v25, %v3097_v22  ;;  %v3160_v59 = vadd.f32 %v3156_v44, %v3098_v39 }
 0x900   :  { %v3221_v28 = vadd.f32 %v3198_v18, %v3159_v27  ;;  %v3222_v14 = vadd.f32 %v3218_v24, %v3160_v59 }
 0x901   :  { %v3316_v41 = vpop.f32.mrf.mxu0  ;;  %v3336_v37 = vpop.f32.mrf.mxu1 }
 0x905   :  { %v3254_v36 = vpop.f32.mrf.mxu2  ;;  %v3274_v33 = vpop.f32.mrf.mxu3 }
 0x906   :  { %v3277_v46 = vadd.f32 %v3254_v36, %v3221_v28  ;;  %v3278_v43 = vadd.f32 %v3274_v33, %v3222_v14 }
 0x908   :  { %v3339_v50 = vadd.f32 %v3316_v41, %v3277_v46  ;;  %v3340_v52 = vadd.f32 %v3336_v37, %v3278_v43 }
 0x90a   :  { %v3348_v55 = vadd.f32 %v3344_v47, %v3339_v50  ;;  %v3349_v49 = vadd.f32 %v3345_v60, %v3340_v52 }
 0x90c   :  { %v3356_v54 = vadd.f32 %v3354_v17, %v3348_v55  ;;  %v3357_v56 = vadd.f32 %v3354_v17, %v3349_v49 }
 0x90e   :  { %v3358_v20 = vmul.f32 0.2, %v3356_v54  ;;  %v3359_v26 = vmul.f32 0.2, %v3357_v56 }
 0x910   :  { %v3360_v30 = vmax.f32 %v3356_v54, %v3358_v20  ;;  %v3361_v15 = vmax.f32 %v3357_v56, %v3359_v26 }
 0x912   :  { %3720 = vst [vmem:[%s5219_s20 + $0x10] sm:$0xff] %v3360_v30  ;;  %v3369_v63 = vmul.f32 %v3367_v0, %v3360_v30  ;;  %v3370_v5 = vmul.f32 %v3367_v0, %v3361_v15 }
 0x913   :  { %3721 = vst [vmem:[%s5219_s20 + $0x18] sm:$0xff] %v3361_v15 }
 0x914   :  { %3406 = vmatpush.msrb.mxu2 %v3369_v63  ;;  %3429 = vmatpush.msrb.mxu3 %v3370_v5 }
 0x915   :  { %3722 = vmatmul.msk.f32.vlgmr.msrb.gmra.mxu2 %vm1238_vm0, %v3371_v1  ;;  %3724 = vmatmul.msk.f32.vlgmr.msrb.gmra.mxu3 %vm1238_vm0, %v3371_v1 }
 0x91d   :  { %3723 = vmatmul.msk.f32.gmra.mxu2 %vm1238_vm0, %v3372_v62  ;;  %3725 = vmatmul.msk.f32.gmra.mxu3 %vm1238_vm0, %v3372_v62 }
 0x998   :  { %v3408_v21 = vpop.f32.mrf.mxu2  ;;  %v3431_v53 = vpop.f32.mrf.mxu3 }
 0x999   :  { %v3409_v3 = vadd.f32 %v3408_v21, %v3378_v4  ;;  %v3432_v29 = vadd.f32 %v3431_v53, %v3378_v4 }
 0x99b   :  { %3726 = vst [vmem:[%s5222_s21 + $0x20] sm:$0xff] %v3409_v3 }
 0x99c   :  { %3727 = vst [vmem:[%s5222_s21 + $0x28] sm:$0xff] %v3432_v29 }
 0x9a0   :  { %v3411_v23 = vpop.f32.mrf.mxu2  ;;  %v3434_v34 = vpop.f32.mrf.mxu3 }
 0x9a1   :  { %v3412_v16 = vadd.f32 %v3411_v23, %v3383_v32  ;;  %v3435_v17 = vadd.f32 %v3434_v34, %v3383_v32 }
 0x9a3   :  { %3728 = vst [vmem:[%s5222_s21 + $0x30] sm:$0xf] %v3412_v16 }
 0x9a4   :  { %3729 = vst [vmem:[%s5222_s21 + $0x38] sm:$0xf] %v3435_v17 }

</bundles_post_ra>
